<compile_context>
chip_gen: v7x
topology: tpu7x:2x2x1
jax: 0.10.0
libtpu: 0.0.40
codegen_flags: <defaults>
</compile_context>

<pallas_src>
import functools

import jax
import jax.numpy as jnp
from jax.experimental import pallas as pl
from jax.experimental.pallas import tpu as pltpu


def _dn4_kernel(q_ref, s_ref, o_ref, *, way, hw, k):
    # q_ref: (Tq*HW, C)   bf16, L2-normalized query local descriptors
    # s_ref: (way, C, M)  bf16, L2-normalized support descriptors, (K, N) layout
    # o_ref: (Tq, way)    f32, image-to-class similarity tile
    rows = q_ref.shape[0]
    tq = rows // hw
    q = q_ref[...]                                                   # (rows, C)

    # Hoisted iotas (JAX does not CSE broadcast_in_dim).
    way_iota = jax.lax.broadcasted_iota(jnp.int32, (rows, way), 1)
    rowvals = jnp.zeros((rows, way), jnp.float32)

    for w in range(way):                                             # static, small
        s = s_ref[w]                                                 # (C, M)
        # (rows, C) x (C, M) -> (rows, M) cosine scores, f32 accumulate on MXU.
        scores = jax.lax.dot_general(
            q, s,
            dimension_numbers=(((1,), (0,)), ((), ())),
            preferred_element_type=jnp.float32)

        # top-k via k masked row maxes; accumulate per-row, reduce once later.
        cur = scores
        rv = jnp.zeros((rows, 1), jnp.float32)
        for _ in range(k):                                           # static
            m = jnp.max(cur, axis=-1, keepdims=True)                 # (rows, 1)
            rv = rv + m
            cur = jnp.where(cur == m, -jnp.inf, cur)
        rowvals = jnp.where(way_iota == w, rv, rowvals)

    # Sum the HW descriptor rows of each query with a small pooling matmul
    # (reshape-free, MXU-friendly). pool[qi, r] = 1 iff row r belongs to query qi.
    r_idx = jax.lax.broadcasted_iota(jnp.int32, (tq, rows), 1)
    q_idx = jax.lax.broadcasted_iota(jnp.int32, (tq, rows), 0)
    pool = jnp.logical_and(r_idx >= q_idx * hw,
                           r_idx < (q_idx + 1) * hw).astype(jnp.float32)
    o_ref[...] = jax.lax.dot_general(
        pool, rowvals,
        dimension_numbers=(((1,), (0,)), ((), ())),
        preferred_element_type=jnp.float32)


def _pick_block_q(Q, HW, C, way, M, *, vmem_budget=24 * 1024 * 1024,
                  target_rows=256, itemsize=2):
    """Largest Tq that divides Q, respects the (8,128) block rule, keeps the
    MXU LHS near its sweet spot, and fits a v7x-safe VMEM budget."""
    cands = [t for t in range(1, Q + 1)
             if Q % t == 0
             and (t % 8 == 0 or t == Q)
             and ((t * HW) % 8 == 0 or t == Q)]
    if not cands:
        cands = [Q]

    def vmem_need(t):
        rows = t * HW
        need = 2 * rows * C * itemsize          # query block (double-buffered)
        need += 2 * way * C * M * itemsize      # support block (constant index map)
        need += 3 * rows * M * 4                # per-class scores + masked copy (f32)
        need += rows * way * 4 + 2 * t * way * 4
        return need

    fitting = [t for t in cands
               if vmem_need(t) <= vmem_budget and t * HW <= max(target_rows, HW)]
    return max(fitting) if fitting else min(cands)


def img_to_class_metric(x1, x2, *, way_num=5, shot_num=5, neighbor_k=3,
                        compute_dtype=jnp.bfloat16, block_q=None):
    """x1: (Q, C, H, W) queries, x2: (way*shot, C, H, W) support. Returns (Q, way)."""
    Q, C, H, W = x1.shape
    S = x2.shape[0]
    assert S == way_num * shot_num
    HW = H * W
    M = shot_num * HW
    assert neighbor_k <= M, "neighbor_k must not exceed shot_num * H * W"

    x1 = x1.astype(jnp.float32)
    x2 = x2.astype(jnp.float32)

    # ---- glue (plain XLA, runs once): NCHW -> descriptors, normalize, cast ----
    qd = jnp.transpose(x1.reshape(Q, C, HW), (0, 2, 1))              # (Q, HW, C)
    qd = qd / jnp.sqrt(jnp.sum(qd * qd, axis=-1, keepdims=True))
    qd = qd.reshape(Q * HW, C).astype(compute_dtype)                 # (Q*HW, C)

    sd = jnp.transpose(x2.reshape(S, C, HW), (0, 2, 1))              # (S, HW, C)
    sd = sd / jnp.sqrt(jnp.sum(sd * sd, axis=-1, keepdims=True))
    sd = sd.reshape(way_num, M, C)
    sd = jnp.transpose(sd, (0, 2, 1)).astype(compute_dtype)          # (way, C, M)

    tq = block_q if block_q is not None else _pick_block_q(Q, HW, C, way_num, M)
    assert Q % tq == 0

    kernel = functools.partial(_dn4_kernel, way=way_num, hw=HW, k=neighbor_k)
    out = pl.pallas_call(
        kernel,
        out_shape=jax.ShapeDtypeStruct((Q, way_num), jnp.float32),
        grid=(Q // tq,),
        in_specs=[
            pl.BlockSpec((tq * HW, C), lambda i: (i, 0)),
            # Constant index map: support block is fetched once and stays
            # resident across grid steps. (On v7x one could additionally use
            # pipeline_mode=pl.Buffered(1) to drop its second buffer.)
            pl.BlockSpec((way_num, C, M), lambda i: (0, 0, 0)),
        ],
        out_specs=pl.BlockSpec((tq, way_num), lambda i: (i, 0)),
        compiler_params=pltpu.CompilerParams(
            dimension_semantics=("parallel",),
            vmem_limit_bytes=48 * 1024 * 1024),
    )(qd, sd)
    return out


def _reference(x1, x2, *, way_num, shot_num, neighbor_k,
               compute_dtype=jnp.bfloat16):
    Q, C, H, W = x1.shape
    HW = H * W
    q = jnp.transpose(x1.astype(jnp.float32).reshape(Q, C, HW), (0, 2, 1))
    q = q / jnp.sqrt(jnp.sum(q * q, axis=-1, keepdims=True))
    s = jnp.transpose(x2.astype(jnp.float32).reshape(x2.shape[0], C, HW), (0, 2, 1))
    s = s / jnp.sqrt(jnp.sum(s * s, axis=-1, keepdims=True))
    s = s.reshape(way_num, shot_num * HW, C)
    q = q.astype(compute_dtype)
    s = s.astype(compute_dtype)
    sims = jnp.einsum('qpc,wmc->qwpm', q, s, preferred_element_type=jnp.float32)
    topk = jax.lax.top_k(sims, neighbor_k)[0]
    return jnp.sum(topk, axis=(-1, -2))


if __name__ == "__main__":
    way_num, shot_num, neighbor_k = 3, 2, 3
    Q, C, H, W = 32, 32, 4, 4            # small, consistent with the module
    S = way_num * shot_num

    key = jax.random.PRNGKey(0)
    k1, k2 = jax.random.split(key)
    x1 = jax.random.normal(k1, (Q, C, H, W), dtype=jnp.float32)
    x2 = jax.random.normal(k2, (S, C, H, W), dtype=jnp.float32)

    out = img_to_class_metric(
        x1, x2, way_num=way_num, shot_num=shot_num, neighbor_k=neighbor_k)
    out = jax.block_until_ready(out)

    ref = _reference(
        x1, x2, way_num=way_num, shot_num=shot_num, neighbor_k=neighbor_k)
    assert out.shape == (Q, way_num)
    assert jnp.allclose(out, ref, rtol=1e-3, atol=1e-3), (out, ref)

    print("KERNEL_OK")
</pallas_src>

<mosaic_0001>
module attributes {stable_mosaic.version = 11 : i64} {
  func.func @_dn4_kernel(%arg0: i32, %arg1: memref<256x32xbf16, #tpu.memory_space<vmem>>, %arg2: memref<3x32x32xbf16, #tpu.memory_space<vmem>>, %arg3: memref<16x3xf32, #tpu.memory_space<vmem>>) attributes {dimension_semantics = [#tpu.dimension_semantics<parallel>], iteration_bounds = array<i64: 2>, scalar_prefetch = 0 : i64, scratch_operands = 0 : i64, tpu.core_type = #tpu.core_type<tc>, window_params = [{transform_indices = @transform_0, window_bounds = array<i64: 256, 32>}, {pipeline_mode = #tpu.pipeline_mode<synchronous>, transform_indices = @transform_1, window_bounds = array<i64: 3, 32, 32>}, {transform_indices = @transform_2, window_bounds = array<i64: 16, 3>}]} {
    %c0 = arith.constant 0 : index
    %c0_0 = arith.constant 0 : index
    %0 = vector.load %arg1[%c0, %c0_0] : memref<256x32xbf16, #tpu.memory_space<vmem>>, vector<256x32xbf16>
    %1 = tpu.iota {dimensions = array<i32: 1>} : vector<256x3xi32>
    %cst = arith.constant 0.000000e+00 : f32
    %2 = vector.broadcast %cst : f32 to vector<256x3xf32>
    %c0_1 = arith.constant 0 : index
    %c0_2 = arith.constant 0 : index
    %c0_3 = arith.constant 0 : index
    %3 = vector.load %arg2[%c0_1, %c0_2, %c0_3] : memref<3x32x32xbf16, #tpu.memory_space<vmem>>, vector<1x32x32xbf16>
    %4 = vector.shape_cast %3 : vector<1x32x32xbf16> to vector<32x32xbf16>
    %cst_4 = arith.constant dense<0.000000e+00> : vector<256x32xf32>
    %5 = tpu.matmul %0, %4, %cst_4 {dimension_numbers = #tpu.dot_dimension_numbers<[1], [0], [0], [1], [0, 0, 1, 1], [], []>} : vector<256x32xbf16>, vector<32x32xbf16>, vector<256x32xf32> -> vector<256x32xf32>
    %cst_5 = arith.constant 0.000000e+00 : f32
    %6 = vector.broadcast %cst_5 : f32 to vector<256x1xf32>
    %cst_6 = arith.constant dense<0xFF800000> : vector<256xf32>
    %7 = vector.multi_reduction <maximumf>, %5, %cst_6 [1] : vector<256x32xf32> to vector<256xf32>
    %8 = vector.shape_cast %7 : vector<256xf32> to vector<256x1xf32>
    %9 = arith.addf %6, %8 : vector<256x1xf32>
    %10 = vector.broadcast %8 : vector<256x1xf32> to vector<256x32xf32>
    %11 = arith.cmpf oeq, %5, %10 : vector<256x32xf32>
    %cst_7 = arith.constant 0xFF800000 : f32
    %12 = vector.broadcast %cst_7 : f32 to vector<256x32xf32>
    %13 = arith.select %11, %12, %5 : vector<256x32xi1>, vector<256x32xf32>
    %cst_8 = arith.constant dense<0xFF800000> : vector<256xf32>
    %14 = vector.multi_reduction <maximumf>, %13, %cst_8 [1] : vector<256x32xf32> to vector<256xf32>
    %15 = vector.shape_cast %14 : vector<256xf32> to vector<256x1xf32>
    %16 = arith.addf %9, %15 : vector<256x1xf32>
    %17 = vector.broadcast %15 : vector<256x1xf32> to vector<256x32xf32>
    %18 = arith.cmpf oeq, %13, %17 : vector<256x32xf32>
    %cst_9 = arith.constant 0xFF800000 : f32
    %19 = vector.broadcast %cst_9 : f32 to vector<256x32xf32>
    %20 = arith.select %18, %19, %13 : vector<256x32xi1>, vector<256x32xf32>
    %cst_10 = arith.constant dense<0xFF800000> : vector<256xf32>
    %21 = vector.multi_reduction <maximumf>, %20, %cst_10 [1] : vector<256x32xf32> to vector<256xf32>
    %22 = vector.shape_cast %21 : vector<256xf32> to vector<256x1xf32>
    %23 = arith.addf %16, %22 : vector<256x1xf32>
    %c0_i32 = arith.constant 0 : i32
    %24 = vector.broadcast %c0_i32 : i32 to vector<256x3xi32>
    %25 = arith.cmpi eq, %1, %24 : vector<256x3xi32>
    %26 = vector.shape_cast %23 : vector<256x1xf32> to vector<256x1xf32>
    %27 = vector.broadcast %26 : vector<256x1xf32> to vector<256x3xf32>
    %28 = arith.select %25, %27, %2 : vector<256x3xi1>, vector<256x3xf32>
    %c1 = arith.constant 1 : index
    %c0_11 = arith.constant 0 : index
    %c0_12 = arith.constant 0 : index
    %29 = vector.load %arg2[%c1, %c0_11, %c0_12] : memref<3x32x32xbf16, #tpu.memory_space<vmem>>, vector<1x32x32xbf16>
    %30 = vector.shape_cast %29 : vector<1x32x32xbf16> to vector<32x32xbf16>
    %cst_13 = arith.constant dense<0.000000e+00> : vector<256x32xf32>
    %31 = tpu.matmul %0, %30, %cst_13 {dimension_numbers = #tpu.dot_dimension_numbers<[1], [0], [0], [1], [0, 0, 1, 1], [], []>} : vector<256x32xbf16>, vector<32x32xbf16>, vector<256x32xf32> -> vector<256x32xf32>
    %cst_14 = arith.constant 0.000000e+00 : f32
    %32 = vector.broadcast %cst_14 : f32 to vector<256x1xf32>
    %cst_15 = arith.constant dense<0xFF800000> : vector<256xf32>
    %33 = vector.multi_reduction <maximumf>, %31, %cst_15 [1] : vector<256x32xf32> to vector<256xf32>
    %34 = vector.shape_cast %33 : vector<256xf32> to vector<256x1xf32>
    %35 = arith.addf %32, %34 : vector<256x1xf32>
    %36 = vector.broadcast %34 : vector<256x1xf32> to vector<256x32xf32>
    %37 = arith.cmpf oeq, %31, %36 : vector<256x32xf32>
    %cst_16 = arith.constant 0xFF800000 : f32
    %38 = vector.broadcast %cst_16 : f32 to vector<256x32xf32>
    %39 = arith.select %37, %38, %31 : vector<256x32xi1>, vector<256x32xf32>
    %cst_17 = arith.constant dense<0xFF800000> : vector<256xf32>
    %40 = vector.multi_reduction <maximumf>, %39, %cst_17 [1] : vector<256x32xf32> to vector<256xf32>
    %41 = vector.shape_cast %40 : vector<256xf32> to vector<256x1xf32>
    %42 = arith.addf %35, %41 : vector<256x1xf32>
    %43 = vector.broadcast %41 : vector<256x1xf32> to vector<256x32xf32>
    %44 = arith.cmpf oeq, %39, %43 : vector<256x32xf32>
    %cst_18 = arith.constant 0xFF800000 : f32
    %45 = vector.broadcast %cst_18 : f32 to vector<256x32xf32>
    %46 = arith.select %44, %45, %39 : vector<256x32xi1>, vector<256x32xf32>
    %cst_19 = arith.constant dense<0xFF800000> : vector<256xf32>
    %47 = vector.multi_reduction <maximumf>, %46, %cst_19 [1] : vector<256x32xf32> to vector<256xf32>
    %48 = vector.shape_cast %47 : vector<256xf32> to vector<256x1xf32>
    %49 = arith.addf %42, %48 : vector<256x1xf32>
    %c1_i32 = arith.constant 1 : i32
    %50 = vector.broadcast %c1_i32 : i32 to vector<256x3xi32>
    %51 = arith.cmpi eq, %1, %50 : vector<256x3xi32>
    %52 = vector.shape_cast %49 : vector<256x1xf32> to vector<256x1xf32>
    %53 = vector.broadcast %52 : vector<256x1xf32> to vector<256x3xf32>
    %54 = arith.select %51, %53, %28 : vector<256x3xi1>, vector<256x3xf32>
    %c2 = arith.constant 2 : index
    %c0_20 = arith.constant 0 : index
    %c0_21 = arith.constant 0 : index
    %55 = vector.load %arg2[%c2, %c0_20, %c0_21] : memref<3x32x32xbf16, #tpu.memory_space<vmem>>, vector<1x32x32xbf16>
    %56 = vector.shape_cast %55 : vector<1x32x32xbf16> to vector<32x32xbf16>
    %cst_22 = arith.constant dense<0.000000e+00> : vector<256x32xf32>
    %57 = tpu.matmul %0, %56, %cst_22 {dimension_numbers = #tpu.dot_dimension_numbers<[1], [0], [0], [1], [0, 0, 1, 1], [], []>} : vector<256x32xbf16>, vector<32x32xbf16>, vector<256x32xf32> -> vector<256x32xf32>
    %cst_23 = arith.constant 0.000000e+00 : f32
    %58 = vector.broadcast %cst_23 : f32 to vector<256x1xf32>
    %cst_24 = arith.constant dense<0xFF800000> : vector<256xf32>
    %59 = vector.multi_reduction <maximumf>, %57, %cst_24 [1] : vector<256x32xf32> to vector<256xf32>
    %60 = vector.shape_cast %59 : vector<256xf32> to vector<256x1xf32>
    %61 = arith.addf %58, %60 : vector<256x1xf32>
    %62 = vector.broadcast %60 : vector<256x1xf32> to vector<256x32xf32>
    %63 = arith.cmpf oeq, %57, %62 : vector<256x32xf32>
    %cst_25 = arith.constant 0xFF800000 : f32
    %64 = vector.broadcast %cst_25 : f32 to vector<256x32xf32>
    %65 = arith.select %63, %64, %57 : vector<256x32xi1>, vector<256x32xf32>
    %cst_26 = arith.constant dense<0xFF800000> : vector<256xf32>
    %66 = vector.multi_reduction <maximumf>, %65, %cst_26 [1] : vector<256x32xf32> to vector<256xf32>
    %67 = vector.shape_cast %66 : vector<256xf32> to vector<256x1xf32>
    %68 = arith.addf %61, %67 : vector<256x1xf32>
    %69 = vector.broadcast %67 : vector<256x1xf32> to vector<256x32xf32>
    %70 = arith.cmpf oeq, %65, %69 : vector<256x32xf32>
    %cst_27 = arith.constant 0xFF800000 : f32
    %71 = vector.broadcast %cst_27 : f32 to vector<256x32xf32>
    %72 = arith.select %70, %71, %65 : vector<256x32xi1>, vector<256x32xf32>
    %cst_28 = arith.constant dense<0xFF800000> : vector<256xf32>
    %73 = vector.multi_reduction <maximumf>, %72, %cst_28 [1] : vector<256x32xf32> to vector<256xf32>
    %74 = vector.shape_cast %73 : vector<256xf32> to vector<256x1xf32>
    %75 = arith.addf %68, %74 : vector<256x1xf32>
    %c2_i32 = arith.constant 2 : i32
    %76 = vector.broadcast %c2_i32 : i32 to vector<256x3xi32>
    %77 = arith.cmpi eq, %1, %76 : vector<256x3xi32>
    %78 = vector.shape_cast %75 : vector<256x1xf32> to vector<256x1xf32>
    %79 = vector.broadcast %78 : vector<256x1xf32> to vector<256x3xf32>
    %80 = arith.select %77, %79, %54 : vector<256x3xi1>, vector<256x3xf32>
    %81 = tpu.iota {dimensions = array<i32: 1>} : vector<16x256xi32>
    %82 = tpu.iota {dimensions = array<i32: 0>} : vector<16x256xi32>
    %c16_i32 = arith.constant 16 : i32
    %83 = vector.broadcast %c16_i32 : i32 to vector<16x256xi32>
    %84 = arith.muli %82, %83 : vector<16x256xi32>
    %85 = arith.cmpi sge, %81, %84 : vector<16x256xi32>
    %c1_i32_29 = arith.constant 1 : i32
    %86 = vector.broadcast %c1_i32_29 : i32 to vector<16x256xi32>
    %87 = arith.addi %82, %86 : vector<16x256xi32>
    %c16_i32_30 = arith.constant 16 : i32
    %88 = vector.broadcast %c16_i32_30 : i32 to vector<16x256xi32>
    %89 = arith.muli %87, %88 : vector<16x256xi32>
    %90 = arith.cmpi slt, %81, %89 : vector<16x256xi32>
    %91 = arith.andi %85, %90 : vector<16x256xi1>
    %92 = arith.extui %91 : vector<16x256xi1> to vector<16x256xi32>
    %93 = arith.sitofp %92 : vector<16x256xi32> to vector<16x256xf32>
    %cst_31 = arith.constant dense<0.000000e+00> : vector<16x3xf32>
    %94 = tpu.matmul %93, %80, %cst_31 {dimension_numbers = #tpu.dot_dimension_numbers<[1], [0], [0], [1], [0, 0, 1, 1], [], []>} : vector<16x256xf32>, vector<256x3xf32>, vector<16x3xf32> -> vector<16x3xf32>
    %c0_32 = arith.constant 0 : index
    %c0_33 = arith.constant 0 : index
    %95 = vector.load %arg3[%c0_32, %c0_33] : memref<16x3xf32, #tpu.memory_space<vmem>>, vector<16x3xf32>
    tpu.vector_store %arg3[%c0_32, %c0_33], %94 {strides = array<i32>} : memref<16x3xf32, #tpu.memory_space<vmem>>, vector<16x3xf32>,
    return
  }
  func.func @transform_0(%arg0: i32) -> (i32, i32) {
    %c0_i32 = arith.constant 0 : i32
    %c0_i32_0 = arith.constant 0 : i32
    return %arg0, %c0_i32 : i32, i32
  }
  func.func @transform_1(%arg0: i32) -> (i32, i32, i32) {
    %c0_i32 = arith.constant 0 : i32
    %c0_i32_0 = arith.constant 0 : i32
    %c0_i32_1 = arith.constant 0 : i32
    %c0_i32_2 = arith.constant 0 : i32
    return %c0_i32, %c0_i32_0, %c0_i32_1 : i32, i32, i32
  }
  func.func @transform_2(%arg0: i32) -> (i32, i32) {
    %c0_i32 = arith.constant 0 : i32
    %c0_i32_0 = arith.constant 0 : i32
    return %arg0, %c0_i32 : i32, i32
  }
}

</mosaic_0001>

<bundles_post_ra>
// kernel: tpu_custom_call.1
= control target key start
LH: loop header
LB: loop body
LE: loop exit
PB: predicated region body
PF: predicated region fallthrough
CT: control target
= control target key end

     0   :  { %s3031_s9 = smov 0   ;;  %s5651_s0 = inlined_call_operand.vmem [shape: bf16[512,32], index: 0, kind: input, shape index: {}]   ;;  %s5652_s1 = inlined_call_operand.vmem [shape: bf16[3,32,32], index: 1, kind: input, shape index: {}]   ;;  %s5653_s2 = inlined_call_operand.vmem [shape: f32[32,3], index: 2, kind: output, shape index: {}]  }
   0x1 LB: > { %s2643_s10 = sadd.s32 4294967295, %s3013_s9   ;;  %p2647_p0 = scmp.ge.s32.totalorder %s3013_s9, 1  ;;  %s3013_s9 = sphi %s3031_s9, %s12_s9  }
   0x2   : > { %p113_p1 = scmp.lt.s32.totalorder %s3013_s9, 3 }
   0x4   : > { %p114_p2 = pnand %p2647_p0, %p113_p1 }
   0x6   : > { %117 = sbr.rel (%p114_p2) target bundleno = 1177 (0x499), region = 28 }
   0xd   : > { %v2985_v0 = vld [vmem:[%s5652_s1] sm:$0xff]   ;;  %s2648_s13 = sshll.u32 %s2643_s10, 5  ;;  %v2986_v1 = vld [vmem:[%s5652_s1 + $0x8] sm:$0xff]   ;;  %v2999_v2 = vld [vmem:[%s5652_s1 + $0x10] sm:$0xff]   ;;  %vm278_vm0 = vcmask 261120   ;;  %s2650_s28 = sshll.u32 %s2643_s10, 1 }
   0xe   : > { %p136_p3 = scmp.lt.s32.totalorder %s2648_s13, 63  ;;  %2832 = vmatprep.subr.bf16.mxu0 %v2985_v0  ;;  %2972 = vmatprep.subr.bf16.mxu1 %v2985_v0  ;;  %v3003_v3 = vld [vmem:[%s5652_s1 + $0x20] sm:$0xff]   ;;  %v3000_v6 = vld [vmem:[%s5652_s1 + $0x18] sm:$0xff]   ;;  %v3006_v7 = vld [vmem:[%s5652_s1 + $0x28] sm:$0xff]   ;;  %p142_p4 = scmp.lt.s32.totalorder %s2650_s28, 3 }
   0xf   : > { %2833 = vmatpush3.bf16.msra.mxu0 %v2985_v0  ;;  %2974 = vmatpush3.bf16.msra.mxu1 %v2985_v0 }
  0x10   : > { %s6697_s13 = smov (!%p136_p3, %s2648_s13), 63  ;;  %2834 = vmatprep.subr.bf16.mxu0 %v2986_v1  ;;  %2973 = vmatprep.subr.bf16.mxu1 %v2986_v1  ;;  %s6699_s28 = smov (!%p142_p4, %s2650_s28), 3 }
  0x11   : > { %s2649_s20 = sshll.u32 %s6697_s13, 2  ;;  %s2651_s29 = sshll.u32 %s6699_s28, 3 }
  0x12   : > { %s3056_s23 = scalar_lea.vmem %s5651_s0, %s2649_s20  ;;  %s145_s4 = scalar_lea.vmem %s5653_s2, %s2651_s29 }
  0x13   : > { %2835 = vmatpush3.bf16.msra.mxu0 %v2986_v1  ;;  %2975 = vmatpush3.bf16.msra.mxu1 %v2986_v1  ;;  %v2987_v4 = vld [vmem:[%s3056_s23] sm:$0xff]   ;;  %v3060_v5 = vld [vmem:[%s3056_s23 + $0x50] sm:$0xff]   ;;  %v2989_v8 = vld [vmem:[%s3056_s23 + $0x8] sm:$0xff]  }
  0x14   : > { %2868 = vmatprep.subr.bf16.mxu1 %v2999_v2  ;;  %2904 = vmatprep.subr.bf16.mxu0 %v3003_v3  ;;  %v2990_v9 = vld [vmem:[%s3056_s23 + $0x58] sm:$0xff]   ;;  %v2991_v10 = vld [vmem:[%s3056_s23 + $0x10] sm:$0xff]   ;;  %v2993_v11 = vld [vmem:[%s3056_s23 + $0x60] sm:$0xff]  }
  0x15   : > { %2836 = vmatprep.mubr.msk.bf16.mxu0 %vm278_vm0, %v2987_v4  ;;  %2856 = vmatprep.mubr.msk.bf16.mxu1 %vm278_vm0, %v3060_v5  ;;  %v2992_v12 = vld [vmem:[%s3056_s23 + $0x18] sm:$0xff]   ;;  %v2994_v13 = vld [vmem:[%s3056_s23 + $0x68] sm:$0xff]   ;;  %v2995_v14 = vld [vmem:[%s3056_s23 + $0x20] sm:$0xff]  }
  0x16   : > { %2837 = vmatmul.mubr.msk.bf16.vlgmr.msra.gmra.mrb[0].mxu0 %vm278_vm0, %v2989_v8  ;;  %2857 = vmatmul.mubr.msk.bf16.vlgmr.msra.gmra.mrb[0].mxu1 %vm278_vm0, %v2990_v9  ;;  %v2997_v15 = vld [vmem:[%s3056_s23 + $0x70] sm:$0xff]   ;;  %v2996_v16 = vld [vmem:[%s3056_s23 + $0x28] sm:$0xff]   ;;  %v2998_v17 = vld [vmem:[%s3056_s23 + $0x78] sm:$0xff]  }
  0x17   : > { %2905 = vmatpush3.bf16.msra.mxu0 %v3003_v3  ;;  %2840 = vmatprep.mubr.msk.bf16.mxu0 %vm278_vm0, %v2991_v10  ;;  %v3001_v18 = vld [vmem:[%s3056_s23 + $0x30] sm:$0xff]   ;;  %v3002_v19 = vld [vmem:[%s3056_s23 + $0x38] sm:$0xff]   ;;  %v3004_v20 = vld [vmem:[%s3056_s23 + $0x40] sm:$0xff]  }
  0x18   : > { %2869 = vmatpush3.bf16.msra.mxu1 %v2999_v2  ;;  %2906 = vmatprep.subr.bf16.mxu0 %v3006_v7  ;;  %v3005_v21 = vld [vmem:[%s3056_s23 + $0x48] sm:$0xff]  }
  0x19   : > { %2870 = vmatprep.subr.bf16.mxu1 %v3000_v6  ;;  %2860 = vmatprep.mubr.msk.bf16.mxu1 %vm278_vm0, %v2993_v11 }
  0x1b   : > { %2907 = vmatpush3.bf16.msra.mxu0 %v3006_v7 }
  0x1c   : > { %2871 = vmatpush3.bf16.msra.mxu1 %v3000_v6 }
  0x1e   : > { %2841 = vmatmul.mubr.msk.bf16.gmra.mrb[4].mxu0 %vm278_vm0, %v2992_v12  ;;  %2861 = vmatmul.mubr.msk.bf16.gmra.mrb[4].mxu1 %vm278_vm0, %v2994_v13 }
  0x1f   : > { %2844 = vmatprep.mubr.msk.bf16.mxu0 %vm278_vm0, %v2995_v14  ;;  %2864 = vmatprep.mubr.msk.bf16.mxu1 %vm278_vm0, %v2997_v15 }
  0x26   : > { %2845 = vmatmul.mubr.msk.bf16.gmra.mrb[8].mxu0 %vm278_vm0, %v2996_v16  ;;  %2865 = vmatmul.mubr.msk.bf16.gmra.mrb[8].mxu1 %vm278_vm0, %v2998_v17 }
  0x27   : > { %2848 = vmatprep.mubr.msk.bf16.mxu0 %vm278_vm0, %v3001_v18  ;;  %2872 = vmatprep.mubr.msk.bf16.mxu1 %vm278_vm0, %v2987_v4 }
  0x2e   : > { %2849 = vmatmul.mubr.msk.bf16.gmra.mrb[12].mxu0 %vm278_vm0, %v3002_v19  ;;  %2873 = vmatmul.mubr.msk.bf16.vlgmr.msra.gmra.mrb[12].mxu1 %vm278_vm0, %v2989_v8 }
  0x2f   : > { %2852 = vmatprep.mubr.msk.bf16.mxu0 %vm278_vm0, %v3004_v20  ;;  %2876 = vmatprep.mubr.msk.bf16.mxu1 %vm278_vm0, %v2991_v10 }
  0x36   : > { %2853 = vmatmul.mubr.msk.bf16.gmra.mrb[16].mxu0 %vm278_vm0, %v3005_v21  ;;  %2877 = vmatmul.mubr.msk.bf16.gmra.mrb[16].mxu1 %vm278_vm0, %v2992_v12 }
  0x37   : > { %2908 = vmatprep.mubr.msk.bf16.mxu0 %vm278_vm0, %v2987_v4  ;;  %2880 = vmatprep.mubr.msk.bf16.mxu1 %vm278_vm0, %v2995_v14 }
  0x3e   : > { %2909 = vmatmul.mubr.msk.bf16.vlgmr.msra.gmra.mrb[20].mxu0 %vm278_vm0, %v2989_v8  ;;  %2881 = vmatmul.mubr.msk.bf16.gmra.mrb[20].mxu1 %vm278_vm0, %v2996_v16 }
  0x3f   : > { %2912 = vmatprep.mubr.msk.bf16.mxu0 %vm278_vm0, %v2991_v10  ;;  %2884 = vmatprep.mubr.msk.bf16.mxu1 %vm278_vm0, %v3001_v18 }
  0x46   : > { %2913 = vmatmul.mubr.msk.bf16.gmra.mrb[24].mxu0 %vm278_vm0, %v2992_v12  ;;  %2885 = vmatmul.mubr.msk.bf16.gmra.mrb[24].mxu1 %vm278_vm0, %v3002_v19 }
  0x47   : > { %2916 = vmatprep.mubr.msk.bf16.mxu0 %vm278_vm0, %v2995_v14  ;;  %2888 = vmatprep.mubr.msk.bf16.mxu1 %vm278_vm0, %v3004_v20 }
  0x4e   : > { %2917 = vmatmul.mubr.msk.bf16.gmra.mrb[28].mxu0 %vm278_vm0, %v2996_v16  ;;  %2889 = vmatmul.mubr.msk.bf16.gmra.mrb[28].mxu1 %vm278_vm0, %v3005_v21 }
  0x4f   : > { %2920 = vmatprep.mubr.msk.bf16.mxu0 %vm278_vm0, %v3001_v18  ;;  %2892 = vmatprep.mubr.msk.bf16.mxu1 %vm278_vm0, %v3060_v5 }
  0x56   : > { %2921 = vmatmul.mubr.msk.bf16.gmra.mrb[32].mxu0 %vm278_vm0, %v3002_v19  ;;  %2893 = vmatmul.mubr.msk.bf16.gmra.mrb[32].mxu1 %vm278_vm0, %v2990_v9 }
  0x57   : > { %2924 = vmatprep.mubr.msk.bf16.mxu0 %vm278_vm0, %v3004_v20  ;;  %2896 = vmatprep.mubr.msk.bf16.mxu1 %vm278_vm0, %v2993_v11 }
  0x5e   : > { %2925 = vmatmul.mubr.msk.bf16.gmra.mrb[36].mxu0 %vm278_vm0, %v3005_v21  ;;  %2897 = vmatmul.mubr.msk.bf16.gmra.mrb[36].mxu1 %vm278_vm0, %v2994_v13 }
  0x5f   : > { %2928 = vmatprep.mubr.msk.bf16.mxu0 %vm278_vm0, %v3060_v5  ;;  %2900 = vmatprep.mubr.msk.bf16.mxu1 %vm278_vm0, %v2997_v15 }
  0x66   : > { %2929 = vmatmul.mubr.msk.bf16.gmra.mrb[40].mxu0 %vm278_vm0, %v2990_v9  ;;  %2901 = vmatmul.mubr.msk.bf16.gmra.mrb[40].mxu1 %vm278_vm0, %v2998_v17 }
  0x67   : > { %2932 = vmatprep.mubr.msk.bf16.mxu0 %vm278_vm0, %v2993_v11 }
  0x6e   : > { %2933 = vmatmul.mubr.msk.bf16.gmra.mrb[44].mxu0 %vm278_vm0, %v2994_v13 }
  0x6f   : > { %2936 = vmatprep.mubr.msk.bf16.mxu0 %vm278_vm0, %v2997_v15 }
  0x76   : > { %2937 = vmatmul.mubr.msk.bf16.gmra.mrb[48].mxu0 %vm278_vm0, %v2998_v17 }
  0xe9   : > { %v3133_v22 = vpop.f32.mrb[0].mxu0  ;;  %v3135_v23 = vpop.f32.mrb[0].mxu1 }
  0xea   : > { %v3137_v24 = vpop.f32.mrb[1].mxu0  ;;  %v494_v25 = vsel %vm278_vm0, %v3133_v22, -inf  ;;  %v3141_v26 = vpop.f32.mrb[1].mxu1  ;;  %v554_v27 = vsel %vm278_vm0, %v3135_v23, -inf }
  0xeb   : > { %495 = vmax.xlane.f32.xlu1 %v494_v25  ;;  %v3145_v28 = vpop.f32.mrb[2].mxu0  ;;  %555 = vmax.xlane.f32.xlu0 %v554_v27  ;;  %v3147_v29 = vpop.f32.mrb[2].mxu1  ;;  %v488_v33 = vsel %vm278_vm0, %v3137_v24, -inf  ;;  %v548_v38 = vsel %vm278_vm0, %v3141_v26, -inf }
  0xec   : > { %v3149_v30 = vpop.f32.mrb[3].mxu0  ;;  %v3151_v31 = vpop.f32.mrb[3].mxu1  ;;  %v497_v32 = vsel %vm278_vm0, %v3145_v28, -inf  ;;  %v557_v35 = vsel %vm278_vm0, %v3147_v29, -inf }
  0xed   : > { %v551_v44 = vsel %vm278_vm0, %v3151_v31, -inf  ;;  %v491_v45 = vsel %vm278_vm0, %v3149_v30, -inf }
  0xef   : > { %498 = vmax.xlane.f32.xlu1 %v497_v32  ;;  %489 = vmax.xlane.f32.xlu0 %v488_v33 }
  0xf1   : > { %v3157_v34 = vpop.f32.mrb[4].mxu0  ;;  %v3163_v37 = vpop.f32.mrb[4].mxu1 }
  0xf2   : > { %v3161_v36 = vpop.f32.mrb[5].mxu0  ;;  %6081 = vst [vmem:[#allocation3_spill] sm:$0xff] %v3163_v37  ;;  %v3169_v40 = vpop.f32.mrb[5].mxu1  ;;  %v506_v50 = vsel %vm278_vm0, %v3157_v34, -inf  ;;  %v566_v57 = vsel %vm278_vm0, %v3163_v37, -inf }
  0xf3   : > { %6080 = vst [vmem:[#allocation2_spill] sm:$0xff] %v3161_v36  ;;  %558 = vmax.xlane.f32.xlu1 %v557_v35  ;;  %v3167_v39 = vpop.f32.mrb[6].mxu0  ;;  %6082 = vst [vmem:[#allocation4_spill] sm:$0xff] %v3169_v40  ;;  %549 = vmax.xlane.f32.xlu0 %v548_v38  ;;  %v3173_v42 = vpop.f32.mrb[6].mxu1  ;;  %v500_v62 = vsel %vm278_vm0, %v3161_v36, -inf  ;;  %v560_v5 = vsel %vm278_vm0, %v3169_v40, -inf }
  0xf4   : > { %v3171_v41 = vpop.f32.mrb[7].mxu0  ;;  %v3175_v43 = vpop.f32.mrb[7].mxu1  ;;  %v509_v47 = vsel %vm278_vm0, %v3167_v39, -inf  ;;  %v569_v56 = vsel %vm278_vm0, %v3173_v42, -inf }
  0xf5   : > { %6083 = vst [vmem:[#allocation5_spill] sm:$0xff] %v3171_v41  ;;  %6084 = vst [vmem:[#allocation6_spill] sm:$0xff] %v3175_v43  ;;  %v503_v59 = vsel %vm278_vm0, %v3171_v41, -inf  ;;  %v563_v4 = vsel %vm278_vm0, %v3175_v43, -inf }
  0xf7   : > { %552 = vmax.xlane.f32.xlu1 %v551_v44  ;;  %492 = vmax.xlane.f32.xlu0 %v491_v45 }
  0xf9   : > { %v3181_v46 = vpop.f32.mrb[8].mxu0  ;;  %v3187_v49 = vpop.f32.mrb[8].mxu1 }
  0xfa   : > { %6085 = vst [vmem:[#allocation7_spill] sm:$0xff] %v3181_v46  ;;  %v3185_v48 = vpop.f32.mrb[9].mxu0  ;;  %6087 = vst [vmem:[#allocation9_spill] sm:$0xff] %v3187_v49  ;;  %v3193_v52 = vpop.f32.mrb[9].mxu1  ;;  %v518_v10 = vsel %vm278_vm0, %v3181_v46, -inf  ;;  %v578_v17 = vsel %vm278_vm0, %v3187_v49, -inf }
  0xfb   : > { %6086 = vst [vmem:[#allocation8_spill] sm:$0xff] %v3185_v48  ;;  %510 = vmax.xlane.f32.xlu1 %v509_v47  ;;  %v3191_v51 = vpop.f32.mrb[10].mxu0  ;;  %6089 = vst [vmem:[#allocation11_spill] sm:$0xff] %v3193_v52  ;;  %507 = vmax.xlane.f32.xlu0 %v506_v50  ;;  %v3197_v54 = vpop.f32.mrb[10].mxu1  ;;  %v512_v25 = vsel %vm278_vm0, %v3185_v48, -inf  ;;  %v572_v45 = vsel %vm278_vm0, %v3193_v52, -inf }
  0xfc   : > { %6088 = vst [vmem:[#allocation10_spill] sm:$0xff] %v3191_v51  ;;  %v3195_v53 = vpop.f32.mrb[11].mxu0  ;;  %6091 = vst [vmem:[#allocation13_spill] sm:$0xff] %v3197_v54  ;;  %v3199_v55 = vpop.f32.mrb[11].mxu1  ;;  %v521_v7 = vsel %vm278_vm0, %v3191_v51, -inf  ;;  %v581_v16 = vsel %vm278_vm0, %v3197_v54, -inf }
  0xfd   : > { %6090 = vst [vmem:[#allocation12_spill] sm:$0xff] %v3195_v53  ;;  %6092 = vst [vmem:[#allocation14_spill] sm:$0xff] %v3199_v55  ;;  %v515_v19 = vsel %vm278_vm0, %v3195_v53, -inf  ;;  %v575_v44 = vsel %vm278_vm0, %v3199_v55, -inf }
  0xff   : > { %570 = vmax.xlane.f32.xlu1 %v569_v56  ;;  %567 = vmax.xlane.f32.xlu0 %v566_v57 }
 0x101   : > { %v3205_v58 = vpop.f32.mrb[12].mxu0  ;;  %v3209_v60 = vpop.f32.mrb[12].mxu1 }
 0x102   : > { %6093 = vst [vmem:[#allocation15_spill] sm:$0xff] %v3205_v58  ;;  %6094 = vst [vmem:[#allocation16_spill] sm:$0xff] %v3209_v60  ;;  %v3211_v61 = vpop.f32.mrb[13].mxu0  ;;  %v3215_v63 = vpop.f32.mrb[13].mxu1  ;;  %v1217_v47 = vsel %vm278_vm0, %v3209_v60, -inf  ;;  %v530_v50 = vsel %vm278_vm0, %v3205_v58, -inf }
 0x103   : > { %6095 = vst [vmem:[#allocation17_spill] sm:$0xff] %v3211_v61  ;;  %504 = vmax.xlane.f32.xlu1 %v503_v59  ;;  %6096 = vst [vmem:[#allocation18_spill] sm:$0xff] %v3215_v63  ;;  %v3217_v0 = vpop.f32.mrb[14].mxu0  ;;  %501 = vmax.xlane.f32.xlu0 %v500_v62  ;;  %v3219_v1 = vpop.f32.mrb[14].mxu1 }
 0x104   : > { %6097 = vst [vmem:[#allocation19_spill] sm:$0xff] %v3217_v0  ;;  %6098 = vst [vmem:[#allocation20_spill] sm:$0xff] %v3219_v1  ;;  %v3221_v2 = vpop.f32.mrb[15].mxu0  ;;  %v3223_v3 = vpop.f32.mrb[15].mxu1 }
 0x105   : > { %6099 = vst [vmem:[#allocation21_spill] sm:$0xff] %v3221_v2  ;;  %6100 = vst [vmem:[#allocation22_spill] sm:$0xff] %v3223_v3  ;;  %v527_v60 = vsel %vm278_vm0, %v3221_v2, -inf  ;;  %v1214_v58 = vsel %vm278_vm0, %v3223_v3, -inf }
 0x107   : > { %564 = vmax.xlane.f32.xlu1 %v563_v4  ;;  %561 = vmax.xlane.f32.xlu0 %v560_v5 }
 0x109   : > { %v3229_v6 = vpop.f32.mrb[16].mxu0  ;;  %v3233_v8 = vpop.f32.mrb[16].mxu1 }
 0x10a   : > { %6101 = vst [vmem:[#allocation23_spill] sm:$0xff] %v3229_v6  ;;  %6102 = vst [vmem:[#allocation24_spill] sm:$0xff] %v3233_v8  ;;  %v3235_v9 = vpop.f32.mrb[17].mxu0  ;;  %v3239_v11 = vpop.f32.mrb[17].mxu1 }
 0x10b   : > { %6103 = vst [vmem:[#allocation25_spill] sm:$0xff] %v3235_v9  ;;  %522 = vmax.xlane.f32.xlu1 %v521_v7  ;;  %6104 = vst [vmem:[#allocation26_spill] sm:$0xff] %v3239_v11  ;;  %v3241_v12 = vpop.f32.mrb[18].mxu0  ;;  %519 = vmax.xlane.f32.xlu0 %v518_v10  ;;  %v3243_v13 = vpop.f32.mrb[18].mxu1  ;;  %v536_v3 = vsel %vm278_vm0, %v3235_v9, -inf }
 0x10c   : > { %6105 = vst [vmem:[#allocation27_spill] sm:$0xff] %v3241_v12  ;;  %6106 = vst [vmem:[#allocation28_spill] sm:$0xff] %v3243_v13  ;;  %v3245_v14 = vpop.f32.mrb[19].mxu0  ;;  %v3247_v15 = vpop.f32.mrb[19].mxu1  ;;  %v545_v48 = vsel %vm278_vm0, %v3241_v12, -inf  ;;  %v1232_v49 = vsel %vm278_vm0, %v3243_v13, -inf }
 0x10d   : > { %6107 = vst [vmem:[#allocation29_spill] sm:$0xff] %v3245_v14  ;;  %6108 = vst [vmem:[#allocation30_spill] sm:$0xff] %v3247_v15  ;;  %v539_v12 = vsel %vm278_vm0, %v3245_v14, -inf  ;;  %v1226_v46 = vsel %vm278_vm0, %v3247_v15, -inf }
 0x10f   : > { %582 = vmax.xlane.f32.xlu1 %v581_v16  ;;  %579 = vmax.xlane.f32.xlu0 %v578_v17  ;;  %v1211_v16 = vsel %vm278_vm0, %v3215_v63, -inf  ;;  %v524_v17 = vsel %vm278_vm0, %v3211_v61, -inf }
 0x111   : > { %v3253_v18 = vpop.f32.mrb[20].mxu0  ;;  %v3259_v21 = vpop.f32.mrb[20].mxu1 }
 0x112   : > { %6109 = vst [vmem:[#allocation31_spill] sm:$0xff] %v3253_v18  ;;  %v3257_v20 = vpop.f32.mrb[21].mxu0  ;;  %6111 = vst [vmem:[#allocation33_spill] sm:$0xff] %v3259_v21  ;;  %v3265_v32 = vpop.f32.mrb[21].mxu1  ;;  %v1940_v13 = vsel %vm278_vm0, %v3253_v18, -inf  ;;  %v1241_v18 = vsel %vm278_vm0, %v3259_v21, -inf }
 0x113   : > { %6110 = vst [vmem:[#allocation32_spill] sm:$0xff] %v3257_v20  ;;  %516 = vmax.xlane.f32.xlu1 %v515_v19  ;;  %v3263_v27 = vpop.f32.mrb[22].mxu0  ;;  %6113 = vst [vmem:[#allocation35_spill] sm:$0xff] %v3265_v32  ;;  %513 = vmax.xlane.f32.xlu0 %v512_v25  ;;  %v3269_v35 = vpop.f32.mrb[22].mxu1  ;;  %v533_v25 = vsel %vm278_vm0, %v3217_v0, -inf }
 0x114   : > { %6112 = vst [vmem:[#allocation34_spill] sm:$0xff] %v3263_v27  ;;  %v3267_v33 = vpop.f32.mrb[23].mxu0  ;;  %6115 = vst [vmem:[#allocation37_spill] sm:$0xff] %v3269_v35  ;;  %v3271_v38 = vpop.f32.mrb[23].mxu1  ;;  %v1943_v40 = vsel %vm278_vm0, %v3263_v27, -inf  ;;  %v1244_v36 = vsel %vm278_vm0, %v3269_v35, -inf }
 0x115   : > { %6114 = vst [vmem:[#allocation36_spill] sm:$0xff] %v3267_v33  ;;  %v1934_v27 = vsel %vm278_vm0, %v3257_v20, -inf  ;;  %v1937_v41 = vsel %vm278_vm0, %v3267_v33, -inf }
 0x117   : > { %576 = vmax.xlane.f32.xlu1 %v575_v44  ;;  %573 = vmax.xlane.f32.xlu0 %v572_v45 }
 0x119   : > { %v3281_v56 = vpop.f32.mrb[24].mxu0  ;;  %v3285_v59 = vpop.f32.mrb[24].mxu1 }
 0x11a   : > { %6116 = vst [vmem:[#allocation38_spill] sm:$0xff] %v3281_v56  ;;  %v3283_v57 = vpop.f32.mrb[25].mxu0  ;;  %v3289_v4 = vpop.f32.mrb[25].mxu1  ;;  %v1952_v35 = vsel %vm278_vm0, %v3281_v56, -inf }
 0x11b   : > { %1218 = vmax.xlane.f32.xlu1 %v1217_v47  ;;  %v3287_v62 = vpop.f32.mrb[26].mxu0  ;;  %531 = vmax.xlane.f32.xlu0 %v530_v50  ;;  %v3293_v7 = vpop.f32.mrb[26].mxu1  ;;  %v1220_v47 = vsel %vm278_vm0, %v3219_v1, -inf  ;;  %v1946_v56 = vsel %vm278_vm0, %v3283_v57, -inf }
 0x11c   : > { %6117 = vst [vmem:[#allocation39_spill] sm:$0xff] %v3287_v62  ;;  %v3291_v5 = vpop.f32.mrb[27].mxu0  ;;  %v3295_v10 = vpop.f32.mrb[27].mxu1 }
 0x11f   : > { %1212 = vmax.xlane.f32.xlu1 %v1211_v16  ;;  %525 = vmax.xlane.f32.xlu0 %v524_v17 }
 0x121   : > { %v3301_v19 = vpop.f32.mrb[28].mxu0  ;;  %v3305_v44 = vpop.f32.mrb[28].mxu1 }
 0x122   : > { %v3307_v45 = vpop.f32.mrb[29].mxu0  ;;  %v3311_v50 = vpop.f32.mrb[29].mxu1 }
 0x123   : > { %534 = vmax.xlane.f32.xlu1 %v533_v25  ;;  %v3313_v16 = vpop.f32.mrb[30].mxu0  ;;  %1221 = vmax.xlane.f32.xlu0 %v1220_v47  ;;  %v3315_v63 = vpop.f32.mrb[30].mxu1  ;;  %v1229_v25 = vsel %vm278_vm0, %v3233_v8, -inf  ;;  %v542_v47 = vsel %vm278_vm0, %v3229_v6, -inf  ;;  %v1223_v6 = vsel %vm278_vm0, %v3239_v11, -inf }
 0x124   : > { %v3317_v17 = vpop.f32.mrb[31].mxu0  ;;  %v3319_v61 = vpop.f32.mrb[31].mxu1 }
 0x127   : > { %528 = vmax.xlane.f32.xlu1 %v527_v60  ;;  %1215 = vmax.xlane.f32.xlu0 %v1214_v58 }
 0x129   : > { %v3329_v1 = vpop.f32.mrb[32].mxu0  ;;  %v3331_v0 = vpop.f32.mrb[32].mxu1 }
 0x12a   : > { %6118 = vst [vmem:[#allocation40_spill] sm:$0xff] %v3329_v1  ;;  %v3333_v52 = vpop.f32.mrb[33].mxu0  ;;  %v3335_v55 = vpop.f32.mrb[33].mxu1 }
 0x12b   : > { %6119 = vst [vmem:[#allocation41_spill] sm:$0xff] %v3333_v52  ;;  %1230 = vmax.xlane.f32.xlu1 %v1229_v25  ;;  %6120 = vst [vmem:[#allocation42_spill] sm:$0xff] %v3335_v55  ;;  %v3337_v2 = vpop.f32.mrb[34].mxu0  ;;  %543 = vmax.xlane.f32.xlu0 %v542_v47  ;;  %v3339_v60 = vpop.f32.mrb[34].mxu1 }
 0x12c   : > { %v3341_v58 = vpop.f32.mrb[35].mxu0  ;;  %v3343_v8 = vpop.f32.mrb[35].mxu1 }
 0x12f   : > { %1224 = vmax.xlane.f32.xlu1 %v1223_v6  ;;  %537 = vmax.xlane.f32.xlu0 %v536_v3 }
 0x131   : > { %v3349_v25 = vpop.f32.mrb[36].mxu0  ;;  %v3355_v53 = vpop.f32.mrb[36].mxu1 }
 0x132   : > { %6121 = vst [vmem:[#allocation43_spill] sm:$0xff] %v3349_v25  ;;  %v3353_v47 = vpop.f32.mrb[37].mxu0  ;;  %6123 = vst [vmem:[#allocation45_spill] sm:$0xff] %v3355_v53  ;;  %v3361_v6 = vpop.f32.mrb[37].mxu1 }
 0x133   : > { %6122 = vst [vmem:[#allocation44_spill] sm:$0xff] %v3353_v47  ;;  %546 = vmax.xlane.f32.xlu1 %v545_v48  ;;  %v3359_v54 = vpop.f32.mrb[38].mxu0  ;;  %6125 = vst [vmem:[#allocation47_spill] sm:$0xff] %v3361_v6  ;;  %1233 = vmax.xlane.f32.xlu0 %v1232_v49  ;;  %v3365_v3 = vpop.f32.mrb[38].mxu1 }
 0x134   : > { %6124 = vst [vmem:[#allocation46_spill] sm:$0xff] %v3359_v54  ;;  %v3363_v11 = vpop.f32.mrb[39].mxu0  ;;  %6127 = vst [vmem:[#allocation49_spill] sm:$0xff] %v3365_v3  ;;  %v3367_v9 = vpop.f32.mrb[39].mxu1 }
 0x135   : > { %6126 = vst [vmem:[#allocation48_spill] sm:$0xff] %v3363_v11  ;;  %6128 = vst [vmem:[#allocation50_spill] sm:$0xff] %v3367_v9 }
 0x137   : > { %540 = vmax.xlane.f32.xlu1 %v539_v12  ;;  %1227 = vmax.xlane.f32.xlu0 %v1226_v46 }
 0x139   : > { %v3373_v48 = vpop.f32.mrb[40].mxu0  ;;  %v3379_v51 = vpop.f32.mrb[40].mxu1 }
 0x13a   : > { %6129 = vst [vmem:[#allocation51_spill] sm:$0xff] %v3373_v48  ;;  %v3377_v49 = vpop.f32.mrb[41].mxu0  ;;  %6131 = vst [vmem:[#allocation53_spill] sm:$0xff] %v3379_v51  ;;  %v3385_v14 = vpop.f32.mrb[41].mxu1 }
 0x13b   : > { %6130 = vst [vmem:[#allocation52_spill] sm:$0xff] %v3377_v49  ;;  %1941 = vmax.xlane.f32.xlu1 %v1940_v13  ;;  %v3383_v43 = vpop.f32.mrb[42].mxu0  ;;  %6133 = vst [vmem:[#allocation55_spill] sm:$0xff] %v3385_v14  ;;  %1944 = vmax.xlane.f32.xlu0 %v1943_v40  ;;  %v3389_v46 = vpop.f32.mrb[42].mxu1 }
 0x13c   : > { %6132 = vst [vmem:[#allocation54_spill] sm:$0xff] %v3383_v43  ;;  %v3387_v12 = vpop.f32.mrb[43].mxu0  ;;  %6135 = vst [vmem:[#allocation57_spill] sm:$0xff] %v3389_v46  ;;  %v3391_v15 = vpop.f32.mrb[43].mxu1 }
 0x13d   : > { %6134 = vst [vmem:[#allocation56_spill] sm:$0xff] %v3387_v12  ;;  %6136 = vst [vmem:[#allocation58_spill] sm:$0xff] %v3391_v15 }
 0x13f   : > { %1242 = vmax.xlane.f32.xlu1 %v1241_v18  ;;  %1245 = vmax.xlane.f32.xlu0 %v1244_v36  ;;  %v1235_v18 = vsel %vm278_vm0, %v3265_v32, -inf  ;;  %v1238_v36 = vsel %vm278_vm0, %v3271_v38, -inf }
 0x141   : > { %v3397_v13 = vpop.f32.mrb[44].mxu0 }
 0x142   : > { %6137 = vst [vmem:[#allocation59_spill] sm:$0xff] %v3397_v13  ;;  %v3401_v40 = vpop.f32.mrb[45].mxu0 }
 0x143   : > { %6138 = vst [vmem:[#allocation60_spill] sm:$0xff] %v3401_v40  ;;  %1935 = vmax.xlane.f32.xlu1 %v1934_v27  ;;  %v3405_v37 = vpop.f32.mrb[46].mxu0  ;;  %1938 = vmax.xlane.f32.xlu0 %v1937_v41  ;;  %v1955_v41 = vsel %vm278_vm0, %v3287_v62, -inf  ;;  %v1949_v62 = vsel %vm278_vm0, %v3291_v5, -inf }
 0x144   : > { %v3407_v21 = vpop.f32.mrb[47].mxu0 }
 0x147   : > { %1236 = vmax.xlane.f32.xlu1 %v1235_v18  ;;  %1239 = vmax.xlane.f32.xlu0 %v1238_v36  ;;  %v1253_v18 = vsel %vm278_vm0, %v3285_v59, -inf  ;;  %v1256_v36 = vsel %vm278_vm0, %v3293_v7, -inf }
 0x149   : > { %v3413_v20 = vpop.f32.mrb[48].mxu0 }
 0x14a   : > { %6139 = vst [vmem:[#allocation61_spill] sm:$0xff] %v3413_v20  ;;  %v3417_v33 = vpop.f32.mrb[49].mxu0 }
 0x14b   : > { %1953 = vmax.xlane.f32.xlu1 %v1952_v35  ;;  %v3421_v27 = vpop.f32.mrb[50].mxu0  ;;  %1956 = vmax.xlane.f32.xlu0 %v1955_v41  ;;  %v1247_v35 = vsel %vm278_vm0, %v3289_v4, -inf  ;;  %v1250_v41 = vsel %vm278_vm0, %v3295_v10, -inf }
 0x14c   : > { %v3423_v32 = vpop.f32.mrb[51].mxu0 }
 0x14f   : > { %1254 = vmax.xlane.f32.xlu1 %v1253_v18  ;;  %1257 = vmax.xlane.f32.xlu0 %v1256_v36  ;;  %v1265_v18 = vsel %vm278_vm0, %v3305_v44, -inf  ;;  %v1268_v36 = vsel %vm278_vm0, %v3315_v63, -inf }
 0x153   : > { %1947 = vmax.xlane.f32.xlu1 %v1946_v56  ;;  %1950 = vmax.xlane.f32.xlu0 %v1949_v62  ;;  %v1964_v56 = vsel %vm278_vm0, %v3301_v19, -inf  ;;  %v1967_v62 = vsel %vm278_vm0, %v3313_v16, -inf }
 0x157   : > { %1248 = vmax.xlane.f32.xlu1 %v1247_v35  ;;  %1251 = vmax.xlane.f32.xlu0 %v1250_v41  ;;  %v1259_v35 = vsel %vm278_vm0, %v3311_v50, -inf  ;;  %v1262_v41 = vsel %vm278_vm0, %v3319_v61, -inf }
 0x15b   : > { %1266 = vmax.xlane.f32.xlu1 %v1265_v18  ;;  %1269 = vmax.xlane.f32.xlu0 %v1268_v36  ;;  %v1958_v18 = vsel %vm278_vm0, %v3307_v45, -inf  ;;  %v1961_v36 = vsel %vm278_vm0, %v3317_v17, -inf }
 0x15f   : > { %1965 = vmax.xlane.f32.xlu1 %v1964_v56  ;;  %1968 = vmax.xlane.f32.xlu0 %v1967_v62  ;;  %v1277_v56 = vsel %vm278_vm0, %v3331_v0, -inf  ;;  %v1280_v62 = vsel %vm278_vm0, %v3339_v60, -inf }
 0x163   : > { %1260 = vmax.xlane.f32.xlu1 %v1259_v35  ;;  %1263 = vmax.xlane.f32.xlu0 %v1262_v41  ;;  %v1976_v35 = vsel %vm278_vm0, %v3329_v1, -inf  ;;  %v1979_v41 = vsel %vm278_vm0, %v3337_v2, -inf }
 0x167   : > { %1959 = vmax.xlane.f32.xlu1 %v1958_v18  ;;  %1962 = vmax.xlane.f32.xlu0 %v1961_v36  ;;  %v1271_v18 = vsel %vm278_vm0, %v3335_v55, -inf  ;;  %v1274_v36 = vsel %vm278_vm0, %v3343_v8, -inf  ;;  %v1991_v55 = vsel %vm278_vm0, %v3359_v54, -inf }
 0x16b   : > { %1278 = vmax.xlane.f32.xlu1 %v1277_v56  ;;  %1281 = vmax.xlane.f32.xlu0 %v1280_v62  ;;  %v1970_v56 = vsel %vm278_vm0, %v3333_v52, -inf  ;;  %v1973_v62 = vsel %vm278_vm0, %v3341_v58, -inf }
 0x16f   : > { %1977 = vmax.xlane.f32.xlu1 %v1976_v35  ;;  %1980 = vmax.xlane.f32.xlu0 %v1979_v41  ;;  %v1988_v41 = vsel %vm278_vm0, %v3349_v25, -inf }
 0x173   : > { %1272 = vmax.xlane.f32.xlu1 %v1271_v18  ;;  %1275 = vmax.xlane.f32.xlu0 %v1274_v36 }
 0x177   : > { %1971 = vmax.xlane.f32.xlu1 %v1970_v56  ;;  %1974 = vmax.xlane.f32.xlu0 %v1973_v62  ;;  %v1289_v56 = vsel %vm278_vm0, %v3355_v53, -inf  ;;  %v1292_v62 = vsel %vm278_vm0, %v3365_v3, -inf }
 0x178   : > { %v3469_v1 = vpop.xlane.xlu1 %495  ;;  %v3471_v35 = vpop.xlane.xlu0 %555 }
 0x179   : > { %6140 = vst [vmem:[#allocation62_spill] sm:$0xff] %v3469_v1  ;;  %6141 = vst [vmem:[#allocation63_spill] sm:$0xff] %v3471_v35  ;;  %vm618_vm2 = vcmp.eq.f32.partialorder %v3133_v22, %v3469_v1  ;;  %vm638_vm4 = vcmp.eq.f32.partialorder %v3135_v23, %v3471_v35 }
 0x17a   : > { %v3577_v1 = vsel %vm618_vm2, -inf, %v3133_v22 }
 0x17b   : > { %1989 = vmax.xlane.f32.xlu1 %v1988_v41  ;;  %1992 = vmax.xlane.f32.xlu0 %v1991_v55  ;;  %v1982_v41 = vsel %vm278_vm0, %v3353_v47, -inf  ;;  %v1985_v55 = vsel %vm278_vm0, %v3363_v11, -inf }
 0x17c   : > { %v3477_v18 = vpop.xlane.xlu1 %498  ;;  %v3479_v36 = vpop.xlane.xlu0 %489 }
 0x17d   : > { %6142 = vst [vmem:[#allocation64_spill] sm:$0xff] %v3477_v18  ;;  %6143 = vst [vmem:[#allocation65_spill] sm:$0xff] %v3479_v36  ;;  %vm619_vm1 = vcmp.eq.f32.partialorder %v3145_v28, %v3477_v18  ;;  %vm616_vm6 = vcmp.eq.f32.partialorder %v3137_v24, %v3479_v36 }
 0x17f   : > { %1290 = vmax.xlane.f32.xlu1 %v1289_v56  ;;  %1293 = vmax.xlane.f32.xlu0 %v1292_v62  ;;  %v1283_v56 = vsel %vm278_vm0, %v3361_v6, -inf  ;;  %v1286_v62 = vsel %vm278_vm0, %v3367_v9, -inf }
 0x180   : > { %v3485_v52 = vpop.xlane.xlu1 %558  ;;  %v3487_v25 = vpop.xlane.xlu0 %549 }
 0x181   : > { %6144 = vst [vmem:[#allocation66_spill] sm:$0xff] %v3485_v52  ;;  %6145 = vst [vmem:[#allocation67_spill] sm:$0xff] %v3487_v25  ;;  %vm639_vm3 = vcmp.eq.f32.partialorder %v3147_v29, %v3485_v52  ;;  %vm636_vm8 = vcmp.eq.f32.partialorder %v3141_v26, %v3487_v25 }
 0x182   : > { %v3588_v52 = vsel %vm639_vm3, -inf, %v3147_v29 }
 0x183   : > { %1983 = vmax.xlane.f32.xlu1 %v1982_v41  ;;  %1986 = vmax.xlane.f32.xlu0 %v1985_v55  ;;  %v2000_v41 = vsel %vm278_vm0, %v3373_v48, -inf  ;;  %v2003_v55 = vsel %vm278_vm0, %v3383_v43, -inf }
 0x184   : > { %v3493_v54 = vpop.xlane.xlu1 %552  ;;  %v3495_v53 = vpop.xlane.xlu0 %492 }
 0x185   : > { %6146 = vst [vmem:[#allocation68_spill] sm:$0xff] %v3493_v54  ;;  %6147 = vst [vmem:[#allocation69_spill] sm:$0xff] %v3495_v53  ;;  %vm617_vm5 = vcmp.eq.f32.partialorder %v3149_v30, %v3495_v53  ;;  %vm637_vm7 = vcmp.eq.f32.partialorder %v3151_v31, %v3493_v54 }
 0x186   : > { %v3606_v53 = vsel %vm617_vm5, -inf, %v3149_v30  ;;  %v3624_v54 = vsel %vm637_vm7, -inf, %v3151_v31 }
 0x187   : > { %1284 = vmax.xlane.f32.xlu1 %v1283_v56  ;;  %1287 = vmax.xlane.f32.xlu0 %v1286_v62  ;;  %v1301_v56 = vsel %vm278_vm0, %v3379_v51, -inf  ;;  %v1304_v62 = vsel %vm278_vm0, %v3389_v46, -inf  ;;  %6170 = vst [vmem:[#allocation92_spill] sm:$0xff] %v3624_v54 }
 0x188   : > { %v3501_v3 = vpop.xlane.xlu1 %510  ;;  %v3503_v47 = vpop.xlane.xlu0 %507 }
 0x189   : > { %6148 = vst [vmem:[#allocation70_spill] sm:$0xff] %v3501_v3  ;;  %6149 = vst [vmem:[#allocation71_spill] sm:$0xff] %v3503_v47  ;;  %vm623_vm9 = vcmp.eq.f32.partialorder %v3167_v39, %v3501_v3  ;;  %vm622_vm10 = vcmp.eq.f32.partialorder %v3157_v34, %v3503_v47  ;;  %v6177_v47 = vld [vmem:[#allocation3_spill] sm:$0xff] }
 0x18a   : > { %v3642_v3 = vsel %vm623_vm9, -inf, %v3167_v39 }
 0x18b   : > { %2001 = vmax.xlane.f32.xlu1 %v2000_v41  ;;  %2004 = vmax.xlane.f32.xlu0 %v2003_v55  ;;  %v1994_v41 = vsel %vm278_vm0, %v3377_v49, -inf  ;;  %v1997_v55 = vsel %vm278_vm0, %v3387_v12, -inf  ;;  %6174 = vst [vmem:[#allocation96_spill] sm:$0xff] %v3642_v3 }
 0x18c   : > { %v3509_v11 = vpop.xlane.xlu1 %570  ;;  %v3511_v6 = vpop.xlane.xlu0 %567 }
 0x18d   : > { %6150 = vst [vmem:[#allocation72_spill] sm:$0xff] %v3509_v11  ;;  %6151 = vst [vmem:[#allocation73_spill] sm:$0xff] %v3511_v6  ;;  %vm643_vm11 = vcmp.eq.f32.partialorder %v3173_v42, %v3509_v11  ;;  %vm642_vm12 = vcmp.eq.f32.partialorder %v6177_v47, %v3511_v6 }
 0x18e   : > { %v3660_v11 = vsel %vm643_vm11, -inf, %v3173_v42  ;;  %v3667_v6 = vsel %vm642_vm12, -inf, %v6177_v47 }
 0x18f   : > { %1302 = vmax.xlane.f32.xlu1 %v1301_v56  ;;  %1305 = vmax.xlane.f32.xlu0 %v1304_v62  ;;  %v1295_v56 = vsel %vm278_vm0, %v3385_v14, -inf  ;;  %v1298_v62 = vsel %vm278_vm0, %v3391_v15, -inf  ;;  %6179 = vst [vmem:[#allocation99_spill] sm:$0xff] %v3660_v11  ;;  %6182 = vst [vmem:[#allocation100_spill] sm:$0xff] %v3667_v6  ;;  %v758_v42 = vsel %vm278_vm0, %v3667_v6, -inf  ;;  %v6195_v6 = vld [vmem:[#allocation7_spill] sm:$0xff] }
 0x190   : > { %v3517_v9 = vpop.xlane.xlu1 %504  ;;  %v3519_v48 = vpop.xlane.xlu0 %501 }
 0x191   : > { %6152 = vst [vmem:[#allocation74_spill] sm:$0xff] %v3517_v9  ;;  %6153 = vst [vmem:[#allocation75_spill] sm:$0xff] %v3519_v48 }
 0x193   : > { %1995 = vmax.xlane.f32.xlu1 %v1994_v41  ;;  %1998 = vmax.xlane.f32.xlu0 %v1997_v55  ;;  %v2012_v41 = vsel %vm278_vm0, %v3397_v13, -inf  ;;  %v2015_v55 = vsel %vm278_vm0, %v3405_v37, -inf }
 0x194   : > { %v3525_v43 = vpop.xlane.xlu1 %564  ;;  %v3527_v51 = vpop.xlane.xlu0 %561 }
 0x195   : > { %6154 = vst [vmem:[#allocation76_spill] sm:$0xff] %v3525_v43  ;;  %6155 = vst [vmem:[#allocation77_spill] sm:$0xff] %v3527_v51 }
 0x197   : > { %1296 = vmax.xlane.f32.xlu1 %v1295_v56  ;;  %1299 = vmax.xlane.f32.xlu0 %v1298_v62  ;;  %v2006_v56 = vsel %vm278_vm0, %v3401_v40, -inf  ;;  %v2009_v62 = vsel %vm278_vm0, %v3407_v21, -inf }
 0x198   : > { %v3533_v46 = vpop.xlane.xlu1 %522  ;;  %v3535_v49 = vpop.xlane.xlu0 %519 }
 0x199   : > { %6156 = vst [vmem:[#allocation78_spill] sm:$0xff] %v3533_v46  ;;  %6157 = vst [vmem:[#allocation79_spill] sm:$0xff] %v3535_v49  ;;  %vm626_vm3 = vcmp.eq.f32.partialorder %v6195_v6, %v3535_v49 }
 0x19a   : > { %v3721_v49 = vsel %vm626_vm3, -inf, %v6195_v6 }
 0x19b   : > { %2013 = vmax.xlane.f32.xlu1 %v2012_v41  ;;  %2016 = vmax.xlane.f32.xlu0 %v2015_v55  ;;  %v2024_v41 = vsel %vm278_vm0, %v3413_v20, -inf  ;;  %v2027_v55 = vsel %vm278_vm0, %v3421_v27, -inf  ;;  %v2021_v20 = vsel %vm278_vm0, %v3423_v32, -inf  ;;  %6200 = vst [vmem:[#allocation106_spill] sm:$0xff] %v3721_v49 }
 0x19c   : > { %v3541_v12 = vpop.xlane.xlu1 %582  ;;  %v3543_v14 = vpop.xlane.xlu0 %579 }
 0x19d   : > { %6158 = vst [vmem:[#allocation80_spill] sm:$0xff] %v3541_v12  ;;  %6159 = vst [vmem:[#allocation81_spill] sm:$0xff] %v3543_v14 }
 0x19f   : > { %2007 = vmax.xlane.f32.xlu1 %v2006_v56  ;;  %2010 = vmax.xlane.f32.xlu0 %v2009_v62  ;;  %v2018_v62 = vsel %vm278_vm0, %v3417_v33, -inf }
 0x1a0   : > { %v3549_v15 = vpop.xlane.xlu1 %516  ;;  %v3551_v13 = vpop.xlane.xlu0 %513 }
 0x1a1   : > { %6160 = vst [vmem:[#allocation82_spill] sm:$0xff] %v3549_v15  ;;  %6161 = vst [vmem:[#allocation83_spill] sm:$0xff] %v3551_v13 }
 0x1a3   : > { %2025 = vmax.xlane.f32.xlu1 %v2024_v41  ;;  %2028 = vmax.xlane.f32.xlu0 %v2027_v55  ;;  %v3570_v41 = vsel %vm619_vm1, -inf, %v3145_v28  ;;  %v686_v28 = vsel %vm278_vm0, %v3577_v1, -inf }
 0x1a4   : > { %v3559_v40 = vpop.xlane.xlu1 %576  ;;  %v3563_v56 = vpop.xlane.xlu0 %573 }
 0x1a5   : > { %6162 = vst [vmem:[#allocation84_spill] sm:$0xff] %v3559_v40  ;;  %6163 = vst [vmem:[#allocation85_spill] sm:$0xff] %v3563_v56 }
 0x1a7   : > { %2019 = vmax.xlane.f32.xlu1 %v2018_v62  ;;  %2022 = vmax.xlane.f32.xlu0 %v2021_v20  ;;  %v689_v62 = vsel %vm278_vm0, %v3570_v41, -inf  ;;  %v3595_v20 = vsel %vm638_vm4, -inf, %v3135_v23 }
 0x1a8   : > { %v3574_v55 = vpop.xlane.xlu1 %1218  ;;  %v3581_v18 = vpop.xlane.xlu0 %531  ;;  %v746_v29 = vsel %vm278_vm0, %v3595_v20, -inf }
 0x1a9   : > { %6164 = vst [vmem:[#allocation86_spill] sm:$0xff] %v3574_v55  ;;  %6165 = vst [vmem:[#allocation87_spill] sm:$0xff] %v3581_v18 }
 0x1ab   : > { %690 = vmax.xlane.f32.xlu1 %v689_v62  ;;  %687 = vmax.xlane.f32.xlu0 %v686_v28  ;;  %v749_v62 = vsel %vm278_vm0, %v3588_v52, -inf  ;;  %v3613_v28 = vsel %vm616_vm6, -inf, %v3137_v24 }
 0x1ac   : > { %v3592_v22 = vpop.xlane.xlu1 %1212  ;;  %v3599_v35 = vpop.xlane.xlu0 %525  ;;  %v680_v30 = vsel %vm278_vm0, %v3613_v28, -inf }
 0x1ad   : > { %6166 = vst [vmem:[#allocation88_spill] sm:$0xff] %v3592_v22  ;;  %6167 = vst [vmem:[#allocation89_spill] sm:$0xff] %v3599_v35 }
 0x1af   : > { %750 = vmax.xlane.f32.xlu1 %v749_v62  ;;  %747 = vmax.xlane.f32.xlu0 %v746_v29  ;;  %v683_v62 = vsel %vm278_vm0, %v3606_v53, -inf  ;;  %v3631_v29 = vsel %vm636_vm8, -inf, %v3141_v26 }
 0x1b0   : > { %v3610_v23 = vpop.xlane.xlu1 %534  ;;  %v3617_v36 = vpop.xlane.xlu0 %1221  ;;  %6172 = vst [vmem:[#allocation94_spill] sm:$0xff] %v3631_v29  ;;  %v740_v31 = vsel %vm278_vm0, %v3631_v29, -inf  ;;  %v6183_v29 = vld [vmem:[#allocation2_spill] sm:$0xff] }
 0x1b1   : > { %6168 = vst [vmem:[#allocation90_spill] sm:$0xff] %v3610_v23  ;;  %6169 = vst [vmem:[#allocation91_spill] sm:$0xff] %v3617_v36  ;;  %vm620_vm14 = vcmp.eq.f32.partialorder %v6183_v29, %v3519_v48 }
 0x1b2   : > { %v3685_v48 = vsel %vm620_vm14, -inf, %v6183_v29 }
 0x1b3   : > { %684 = vmax.xlane.f32.xlu1 %v683_v62  ;;  %681 = vmax.xlane.f32.xlu0 %v680_v30  ;;  %v743_v62 = vsel %vm278_vm0, %v3624_v54, -inf  ;;  %v3649_v30 = vsel %vm622_vm10, -inf, %v3157_v34  ;;  %6188 = vst [vmem:[#allocation102_spill] sm:$0xff] %v3685_v48 }
 0x1b4   : > { %v3628_v24 = vpop.xlane.xlu1 %528  ;;  %v3635_v25 = vpop.xlane.xlu0 %1215  ;;  %6176 = vst [vmem:[#allocation98_spill] sm:$0xff] %v3649_v30  ;;  %v698_v39 = vsel %vm278_vm0, %v3649_v30, -inf  ;;  %v6189_v30 = vld [vmem:[#allocation4_spill] sm:$0xff] }
 0x1b5   : > { %6171 = vst [vmem:[#allocation93_spill] sm:$0xff] %v3628_v24  ;;  %6173 = vst [vmem:[#allocation95_spill] sm:$0xff] %v3635_v25  ;;  %vm640_vm1 = vcmp.eq.f32.partialorder %v6189_v30, %v3527_v51 }
 0x1b6   : > { %v3703_v51 = vsel %vm640_vm1, -inf, %v6189_v30 }
 0x1b7   : > { %744 = vmax.xlane.f32.xlu1 %v743_v62  ;;  %741 = vmax.xlane.f32.xlu0 %v740_v31  ;;  %v701_v62 = vsel %vm278_vm0, %v3642_v3, -inf  ;;  %v6180_v31 = vld [vmem:[#allocation5_spill] sm:$0xff]  ;;  %6194 = vst [vmem:[#allocation104_spill] sm:$0xff] %v3703_v51 }
 0x1b8   : > { %v3646_v26 = vpop.xlane.xlu1 %1230  ;;  %v3653_v54 = vpop.xlane.xlu0 %543  ;;  %vm621_vm13 = vcmp.eq.f32.partialorder %v6180_v31, %v3517_v9 }
 0x1b9   : > { %6175 = vst [vmem:[#allocation97_spill] sm:$0xff] %v3646_v26  ;;  %6178 = vst [vmem:[#allocation3_spill] sm:$0xff] %v3653_v54  ;;  %v3678_v9 = vsel %vm621_vm13, -inf, %v6180_v31  ;;  %v692_v31 = vsel %vm278_vm0, %v3685_v48, -inf  ;;  %v6201_v48 = vld [vmem:[#allocation9_spill] sm:$0xff] }
 0x1ba   : > { %6185 = vst [vmem:[#allocation101_spill] sm:$0xff] %v3678_v9  ;;  %vm646_vm5 = vcmp.eq.f32.partialorder %v6201_v48, %v3543_v14 }
 0x1bb   : > { %702 = vmax.xlane.f32.xlu1 %v701_v62  ;;  %699 = vmax.xlane.f32.xlu0 %v698_v39  ;;  %v761_v62 = vsel %vm278_vm0, %v3660_v11, -inf  ;;  %v6186_v39 = vld [vmem:[#allocation6_spill] sm:$0xff]  ;;  %v3739_v14 = vsel %vm646_vm5, -inf, %v6201_v48 }
 0x1bc   : > { %v3664_v34 = vpop.xlane.xlu1 %1224  ;;  %v3671_v3 = vpop.xlane.xlu0 %537  ;;  %vm641_vm15 = vcmp.eq.f32.partialorder %v6186_v39, %v3525_v43  ;;  %6206 = vst [vmem:[#allocation108_spill] sm:$0xff] %v3739_v14 }
 0x1bd   : > { %6181 = vst [vmem:[#allocation5_spill] sm:$0xff] %v3664_v34  ;;  %6184 = vst [vmem:[#allocation2_spill] sm:$0xff] %v3671_v3  ;;  %v3696_v43 = vsel %vm641_vm15, -inf, %v6186_v39  ;;  %v752_v39 = vsel %vm278_vm0, %v3703_v51, -inf  ;;  %v6207_v51 = vld [vmem:[#allocation8_spill] sm:$0xff] }
 0x1be   : > { %6191 = vst [vmem:[#allocation103_spill] sm:$0xff] %v3696_v43  ;;  %vm624_vm7 = vcmp.eq.f32.partialorder %v6207_v51, %v3551_v13 }
 0x1bf   : > { %762 = vmax.xlane.f32.xlu1 %v761_v62  ;;  %759 = vmax.xlane.f32.xlu0 %v758_v42  ;;  %v695_v62 = vsel %vm278_vm0, %v3678_v9, -inf  ;;  %v6192_v42 = vld [vmem:[#allocation10_spill] sm:$0xff]  ;;  %v3757_v13 = vsel %vm624_vm7, -inf, %v6207_v51 }
 0x1c0   : > { %v3682_v47 = vpop.xlane.xlu1 %546  ;;  %v3689_v11 = vpop.xlane.xlu0 %1233  ;;  %vm627_vm2 = vcmp.eq.f32.partialorder %v6192_v42, %v3533_v46  ;;  %6212 = vst [vmem:[#allocation110_spill] sm:$0xff] %v3757_v13 }
 0x1c1   : > { %6187 = vst [vmem:[#allocation6_spill] sm:$0xff] %v3682_v47  ;;  %6190 = vst [vmem:[#allocation4_spill] sm:$0xff] %v3689_v11  ;;  %v3714_v46 = vsel %vm627_vm2, -inf, %v6192_v42  ;;  %v710_v42 = vsel %vm278_vm0, %v3721_v49, -inf  ;;  %v6213_v49 = vld [vmem:[#allocation11_spill] sm:$0xff] }
 0x1c2   : > { %6197 = vst [vmem:[#allocation105_spill] sm:$0xff] %v3714_v46  ;;  %vm644_vm9 = vcmp.eq.f32.partialorder %v6213_v49, %v3563_v56 }
 0x1c3   : > { %696 = vmax.xlane.f32.xlu1 %v695_v62  ;;  %693 = vmax.xlane.f32.xlu0 %v692_v31  ;;  %v755_v62 = vsel %vm278_vm0, %v3696_v43, -inf  ;;  %v6198_v31 = vld [vmem:[#allocation13_spill] sm:$0xff]  ;;  %v3775_v56 = vsel %vm644_vm9, -inf, %v6213_v49 }
 0x1c4   : > { %v3700_v29 = vpop.xlane.xlu1 %540  ;;  %v3707_v9 = vpop.xlane.xlu0 %1227  ;;  %vm647_vm4 = vcmp.eq.f32.partialorder %v6198_v31, %v3541_v12  ;;  %6218 = vst [vmem:[#allocation112_spill] sm:$0xff] %v3775_v56 }
 0x1c5   : > { %6193 = vst [vmem:[#allocation10_spill] sm:$0xff] %v3700_v29  ;;  %6196 = vst [vmem:[#allocation7_spill] sm:$0xff] %v3707_v9  ;;  %v3732_v12 = vsel %vm647_vm4, -inf, %v6198_v31  ;;  %v770_v31 = vsel %vm278_vm0, %v3739_v14, -inf  ;;  %v6219_v14 = vld [vmem:[#allocation15_spill] sm:$0xff] }
 0x1c6   : > { %6203 = vst [vmem:[#allocation107_spill] sm:$0xff] %v3732_v12  ;;  %vm630_vm11 = vcmp.eq.f32.partialorder %v6219_v14, %v3581_v18 }
 0x1c7   : > { %756 = vmax.xlane.f32.xlu1 %v755_v62  ;;  %753 = vmax.xlane.f32.xlu0 %v752_v39  ;;  %v713_v62 = vsel %vm278_vm0, %v3714_v46, -inf  ;;  %v6204_v39 = vld [vmem:[#allocation12_spill] sm:$0xff]  ;;  %v3793_v18 = vsel %vm630_vm11, -inf, %v6219_v14 }
 0x1c8   : > { %v3718_v30 = vpop.xlane.xlu1 %1941  ;;  %v3725_v43 = vpop.xlane.xlu0 %1944  ;;  %vm625_vm6 = vcmp.eq.f32.partialorder %v6204_v39, %v3549_v15  ;;  %6224 = vst [vmem:[#allocation114_spill] sm:$0xff] %v3793_v18 }
 0x1c9   : > { %6199 = vst [vmem:[#allocation13_spill] sm:$0xff] %v3718_v30  ;;  %6202 = vst [vmem:[#allocation9_spill] sm:$0xff] %v3725_v43  ;;  %v3750_v15 = vsel %vm625_vm6, -inf, %v6204_v39  ;;  %v704_v39 = vsel %vm278_vm0, %v3757_v13, -inf  ;;  %v6225_v13 = vld [vmem:[#allocation16_spill] sm:$0xff] }
 0x1ca   : > { %6209 = vst [vmem:[#allocation109_spill] sm:$0xff] %v3750_v15  ;;  %vm1341_vm13 = vcmp.eq.f32.partialorder %v6225_v13, %v3574_v55 }
 0x1cb   : > { %714 = vmax.xlane.f32.xlu1 %v713_v62  ;;  %711 = vmax.xlane.f32.xlu0 %v710_v42  ;;  %v773_v62 = vsel %vm278_vm0, %v3732_v12, -inf  ;;  %v6210_v42 = vld [vmem:[#allocation14_spill] sm:$0xff]  ;;  %v3811_v55 = vsel %vm1341_vm13, -inf, %v6225_v13 }
 0x1cc   : > { %v3736_v6 = vpop.xlane.xlu1 %1242  ;;  %v3743_v46 = vpop.xlane.xlu0 %1245  ;;  %vm645_vm8 = vcmp.eq.f32.partialorder %v6210_v42, %v3559_v40  ;;  %6230 = vst [vmem:[#allocation116_spill] sm:$0xff] %v3811_v55 }
 0x1cd   : > { %6205 = vst [vmem:[#allocation12_spill] sm:$0xff] %v3736_v6  ;;  %6208 = vst [vmem:[#allocation8_spill] sm:$0xff] %v3743_v46  ;;  %v3768_v40 = vsel %vm645_vm8, -inf, %v6210_v42  ;;  %v764_v42 = vsel %vm278_vm0, %v3775_v56, -inf  ;;  %v6231_v56 = vld [vmem:[#allocation17_spill] sm:$0xff] }
 0x1ce   : > { %6215 = vst [vmem:[#allocation111_spill] sm:$0xff] %v3768_v40  ;;  %vm628_vm15 = vcmp.eq.f32.partialorder %v6231_v56, %v3599_v35 }
 0x1cf   : > { %774 = vmax.xlane.f32.xlu1 %v773_v62  ;;  %771 = vmax.xlane.f32.xlu0 %v770_v31  ;;  %v707_v62 = vsel %vm278_vm0, %v3750_v15, -inf  ;;  %v6216_v31 = vld [vmem:[#allocation19_spill] sm:$0xff]  ;;  %v3829_v35 = vsel %vm628_vm15, -inf, %v6231_v56 }
 0x1d0   : > { %v3754_v48 = vpop.xlane.xlu1 %1935  ;;  %v3761_v12 = vpop.xlane.xlu0 %1938  ;;  %vm631_vm10 = vcmp.eq.f32.partialorder %v6216_v31, %v3610_v23  ;;  %6236 = vst [vmem:[#allocation118_spill] sm:$0xff] %v3829_v35 }
 0x1d1   : > { %6211 = vst [vmem:[#allocation14_spill] sm:$0xff] %v3754_v48  ;;  %6214 = vst [vmem:[#allocation11_spill] sm:$0xff] %v3761_v12  ;;  %v3786_v23 = vsel %vm631_vm10, -inf, %v6216_v31  ;;  %v722_v31 = vsel %vm278_vm0, %v3793_v18, -inf  ;;  %v6237_v18 = vld [vmem:[#allocation18_spill] sm:$0xff] }
 0x1d2   : > { %6221 = vst [vmem:[#allocation113_spill] sm:$0xff] %v3786_v23  ;;  %vm1339_vm2 = vcmp.eq.f32.partialorder %v6237_v18, %v3592_v22 }
 0x1d3   : > { %708 = vmax.xlane.f32.xlu1 %v707_v62  ;;  %705 = vmax.xlane.f32.xlu0 %v704_v39  ;;  %v767_v62 = vsel %vm278_vm0, %v3768_v40, -inf  ;;  %v6222_v39 = vld [vmem:[#allocation20_spill] sm:$0xff]  ;;  %v3847_v22 = vsel %vm1339_vm2, -inf, %v6237_v18 }
 0x1d4   : > { %v3772_v51 = vpop.xlane.xlu1 %1236  ;;  %v3779_v15 = vpop.xlane.xlu0 %1239  ;;  %vm1342_vm12 = vcmp.eq.f32.partialorder %v6222_v39, %v3617_v36  ;;  %6242 = vst [vmem:[#allocation120_spill] sm:$0xff] %v3847_v22 }
 0x1d5   : > { %6217 = vst [vmem:[#allocation19_spill] sm:$0xff] %v3772_v51  ;;  %6220 = vst [vmem:[#allocation15_spill] sm:$0xff] %v3779_v15  ;;  %v3804_v36 = vsel %vm1342_vm12, -inf, %v6222_v39  ;;  %v1409_v39 = vsel %vm278_vm0, %v3811_v55, -inf  ;;  %v6243_v55 = vld [vmem:[#allocation23_spill] sm:$0xff]  ;;  %vm1348_vm2 = vcmp.eq.f32.partialorder %v3271_v38, %v3779_v15 }
 0x1d6   : > { %6227 = vst [vmem:[#allocation115_spill] sm:$0xff] %v3804_v36  ;;  %vm634_vm4 = vcmp.eq.f32.partialorder %v6243_v55, %v3653_v54  ;;  %v3984_v15 = vsel %vm1348_vm2, -inf, %v3271_v38 }
 0x1d7   : > { %768 = vmax.xlane.f32.xlu1 %v767_v62  ;;  %765 = vmax.xlane.f32.xlu0 %v764_v42  ;;  %v725_v62 = vsel %vm278_vm0, %v3786_v23, -inf  ;;  %v6228_v42 = vld [vmem:[#allocation21_spill] sm:$0xff]  ;;  %v3865_v54 = vsel %vm634_vm4, -inf, %v6243_v55 }
 0x1d8   : > { %v3790_v49 = vpop.xlane.xlu1 %1953  ;;  %v3797_v40 = vpop.xlane.xlu0 %1956  ;;  %vm629_vm14 = vcmp.eq.f32.partialorder %v6228_v42, %v3628_v24  ;;  %6248 = vst [vmem:[#allocation122_spill] sm:$0xff] %v3865_v54 }
 0x1d9   : > { %6223 = vst [vmem:[#allocation20_spill] sm:$0xff] %v3790_v49  ;;  %6226 = vst [vmem:[#allocation16_spill] sm:$0xff] %v3797_v40  ;;  %v3822_v24 = vsel %vm629_vm14, -inf, %v6228_v42  ;;  %v716_v42 = vsel %vm278_vm0, %v3829_v35, -inf  ;;  %v6249_v35 = vld [vmem:[#allocation24_spill] sm:$0xff] }
 0x1da   : > { %6233 = vst [vmem:[#allocation117_spill] sm:$0xff] %v3822_v24  ;;  %vm1345_vm6 = vcmp.eq.f32.partialorder %v6249_v35, %v3646_v26 }
 0x1db   : > { %726 = vmax.xlane.f32.xlu1 %v725_v62  ;;  %723 = vmax.xlane.f32.xlu0 %v722_v31  ;;  %v1412_v62 = vsel %vm278_vm0, %v3804_v36, -inf  ;;  %v6234_v31 = vld [vmem:[#allocation22_spill] sm:$0xff]  ;;  %v3883_v26 = vsel %vm1345_vm6, -inf, %v6249_v35 }
 0x1dc   : > { %v3808_v14 = vpop.xlane.xlu1 %1254  ;;  %v3815_v23 = vpop.xlane.xlu0 %1257  ;;  %vm1340_vm1 = vcmp.eq.f32.partialorder %v6234_v31, %v3635_v25  ;;  %6254 = vst [vmem:[#allocation124_spill] sm:$0xff] %v3883_v26 }
 0x1dd   : > { %6229 = vst [vmem:[#allocation21_spill] sm:$0xff] %v3808_v14  ;;  %6232 = vst [vmem:[#allocation17_spill] sm:$0xff] %v3815_v23  ;;  %v3840_v25 = vsel %vm1340_vm1, -inf, %v6234_v31  ;;  %v1403_v31 = vsel %vm278_vm0, %v3847_v22, -inf  ;;  %v6255_v22 = vld [vmem:[#allocation25_spill] sm:$0xff]  ;;  %vm1354_vm6 = vcmp.eq.f32.partialorder %v3293_v7, %v3815_v23 }
 0x1de   : > { %6239 = vst [vmem:[#allocation119_spill] sm:$0xff] %v3840_v25  ;;  %vm632_vm8 = vcmp.eq.f32.partialorder %v6255_v22, %v3671_v3  ;;  %v4020_v23 = vsel %vm1354_vm6, -inf, %v3293_v7 }
 0x1df   : > { %1413 = vmax.xlane.f32.xlu1 %v1412_v62  ;;  %1410 = vmax.xlane.f32.xlu0 %v1409_v39  ;;  %v719_v62 = vsel %vm278_vm0, %v3822_v24, -inf  ;;  %v6240_v39 = vld [vmem:[#allocation27_spill] sm:$0xff]  ;;  %v3901_v3 = vsel %vm632_vm8, -inf, %v6255_v22  ;;  %6290 = vst [vmem:[#allocation136_spill] sm:$0xff] %v4020_v23 }
 0x1e0   : > { %v3826_v13 = vpop.xlane.xlu1 %1947  ;;  %v3833_v36 = vpop.xlane.xlu0 %1950  ;;  %vm635_vm3 = vcmp.eq.f32.partialorder %v6240_v39, %v3682_v47  ;;  %6260 = vst [vmem:[#allocation126_spill] sm:$0xff] %v3901_v3 }
 0x1e1   : > { %6235 = vst [vmem:[#allocation22_spill] sm:$0xff] %v3826_v13  ;;  %6238 = vst [vmem:[#allocation18_spill] sm:$0xff] %v3833_v36  ;;  %v3858_v47 = vsel %vm635_vm3, -inf, %v6240_v39  ;;  %v734_v39 = vsel %vm278_vm0, %v3865_v54, -inf  ;;  %v6261_v54 = vld [vmem:[#allocation26_spill] sm:$0xff]  ;;  %vm2067_vm8 = vcmp.eq.f32.partialorder %v3291_v5, %v3833_v36 }
 0x1e2   : > { %6245 = vst [vmem:[#allocation121_spill] sm:$0xff] %v3858_v47  ;;  %vm1343_vm10 = vcmp.eq.f32.partialorder %v6261_v54, %v3664_v34  ;;  %v4038_v36 = vsel %vm2067_vm8, -inf, %v3291_v5 }
 0x1e3   : > { %720 = vmax.xlane.f32.xlu1 %v719_v62  ;;  %717 = vmax.xlane.f32.xlu0 %v716_v42  ;;  %v1406_v62 = vsel %vm278_vm0, %v3840_v25, -inf  ;;  %v6246_v42 = vld [vmem:[#allocation28_spill] sm:$0xff]  ;;  %v3919_v34 = vsel %vm1343_vm10, -inf, %v6261_v54 }
 0x1e4   : > { %v3844_v56 = vpop.xlane.xlu1 %1248  ;;  %v3851_v24 = vpop.xlane.xlu0 %1251  ;;  %vm1346_vm5 = vcmp.eq.f32.partialorder %v6246_v42, %v3689_v11  ;;  %6266 = vst [vmem:[#allocation128_spill] sm:$0xff] %v3919_v34 }
 0x1e5   : > { %6241 = vst [vmem:[#allocation27_spill] sm:$0xff] %v3844_v56  ;;  %6244 = vst [vmem:[#allocation23_spill] sm:$0xff] %v3851_v24  ;;  %v3876_v11 = vsel %vm1346_vm5, -inf, %v6246_v42  ;;  %v1421_v42 = vsel %vm278_vm0, %v3883_v26, -inf  ;;  %v6267_v26 = vld [vmem:[#allocation31_spill] sm:$0xff]  ;;  %vm1352_vm10 = vcmp.eq.f32.partialorder %v3295_v10, %v3851_v24 }
 0x1e6   : > { %6251 = vst [vmem:[#allocation123_spill] sm:$0xff] %v3876_v11  ;;  %vm2064_vm12 = vcmp.eq.f32.partialorder %v6267_v26, %v3718_v30  ;;  %v4056_v24 = vsel %vm1352_vm10, -inf, %v3295_v10 }
 0x1e7   : > { %1407 = vmax.xlane.f32.xlu1 %v1406_v62  ;;  %1404 = vmax.xlane.f32.xlu0 %v1403_v31  ;;  %v737_v62 = vsel %vm278_vm0, %v3858_v47, -inf  ;;  %v6252_v31 = vld [vmem:[#allocation29_spill] sm:$0xff]  ;;  %v3937_v30 = vsel %vm2064_vm12, -inf, %v6267_v26 }
 0x1e8   : > { %v3862_v18 = vpop.xlane.xlu1 %1266  ;;  %v3869_v25 = vpop.xlane.xlu0 %1269  ;;  %vm633_vm7 = vcmp.eq.f32.partialorder %v6252_v31, %v3700_v29 }
 0x1e9   : > { %6247 = vst [vmem:[#allocation28_spill] sm:$0xff] %v3862_v18  ;;  %6250 = vst [vmem:[#allocation24_spill] sm:$0xff] %v3869_v25  ;;  %v3894_v29 = vsel %vm633_vm7, -inf, %v6252_v31  ;;  %v728_v31 = vsel %vm278_vm0, %v3901_v3, -inf  ;;  %v6272_v3 = vld [vmem:[#allocation33_spill] sm:$0xff]  ;;  %vm1353_vm7 = vcmp.eq.f32.partialorder %v3285_v59, %v3808_v14  ;;  %vm1358_vm12 = vcmp.eq.f32.partialorder %v3315_v63, %v3869_v25 }
 0x1ea   : > { %6257 = vst [vmem:[#allocation125_spill] sm:$0xff] %v3894_v29  ;;  %vm1349_vm14 = vcmp.eq.f32.partialorder %v6272_v3, %v3736_v6  ;;  %v4074_v25 = vsel %vm1358_vm12, -inf, %v3315_v63 }
 0x1eb   : > { %738 = vmax.xlane.f32.xlu1 %v737_v62  ;;  %735 = vmax.xlane.f32.xlu0 %v734_v39  ;;  %v1424_v62 = vsel %vm278_vm0, %v3876_v11, -inf  ;;  %v6258_v39 = vld [vmem:[#allocation30_spill] sm:$0xff]  ;;  %v3955_v6 = vsel %vm1349_vm14, -inf, %v6272_v3 }
 0x1ec   : > { %v3880_v55 = vpop.xlane.xlu1 %1965  ;;  %v3887_v47 = vpop.xlane.xlu0 %1968  ;;  %vm1344_vm9 = vcmp.eq.f32.partialorder %v6258_v39, %v3707_v9  ;;  %6277 = vst [vmem:[#allocation131_spill] sm:$0xff] %v3955_v6 }
 0x1ed   : > { %6253 = vst [vmem:[#allocation29_spill] sm:$0xff] %v3880_v55  ;;  %6256 = vst [vmem:[#allocation25_spill] sm:$0xff] %v3887_v47  ;;  %v3912_v9 = vsel %vm1344_vm9, -inf, %v6258_v39  ;;  %v1415_v39 = vsel %vm278_vm0, %v3919_v34, -inf  ;;  %v6278_v34 = vld [vmem:[#allocation32_spill] sm:$0xff]  ;;  %vm2066_vm9 = vcmp.eq.f32.partialorder %v3283_v57, %v3826_v13  ;;  %vm2073_vm14 = vcmp.eq.f32.partialorder %v3313_v16, %v3887_v47 }
 0x1ee   : > { %6263 = vst [vmem:[#allocation127_spill] sm:$0xff] %v3912_v9  ;;  %vm2062_vm1 = vcmp.eq.f32.partialorder %v6278_v34, %v3754_v48  ;;  %v6282_v48 = vld [vmem:[#allocation35_spill] sm:$0xff]  ;;  %v4092_v47 = vsel %vm2073_vm14, -inf, %v3313_v16 }
 0x1ef   : > { %1425 = vmax.xlane.f32.xlu1 %v1424_v62  ;;  %1422 = vmax.xlane.f32.xlu0 %v1421_v42  ;;  %v731_v62 = vsel %vm278_vm0, %v3894_v29, -inf  ;;  %v6264_v42 = vld [vmem:[#allocation34_spill] sm:$0xff]  ;;  %vm1347_vm3 = vcmp.eq.f32.partialorder %v6282_v48, %v3772_v51 }
 0x1f0   : > { %v3898_v35 = vpop.xlane.xlu1 %1260  ;;  %v3905_v11 = vpop.xlane.xlu0 %1263  ;;  %vm2065_vm11 = vcmp.eq.f32.partialorder %v6264_v42, %v3725_v43  ;;  %v3991_v51 = vsel %vm1347_vm3, -inf, %v6282_v48 }
 0x1f1   : > { %6259 = vst [vmem:[#allocation30_spill] sm:$0xff] %v3898_v35  ;;  %6262 = vst [vmem:[#allocation26_spill] sm:$0xff] %v3905_v11  ;;  %v3930_v43 = vsel %vm2065_vm11, -inf, %v6264_v42  ;;  %v2132_v42 = vsel %vm278_vm0, %v3937_v30, -inf  ;;  %v1427_v38 = vsel %vm278_vm0, %v3991_v51, -inf  ;;  %vm1351_vm11 = vcmp.eq.f32.partialorder %v3289_v4, %v3844_v56 }
 0x1f2   : > { %6269 = vst [vmem:[#allocation129_spill] sm:$0xff] %v3930_v43  ;;  %vm1355_vm2 = vcmp.eq.f32.partialorder %v3311_v50, %v3898_v35 }
 0x1f3   : > { %732 = vmax.xlane.f32.xlu1 %v731_v62  ;;  %729 = vmax.xlane.f32.xlu0 %v728_v31  ;;  %v1418_v62 = vsel %vm278_vm0, %v3912_v9, -inf  ;;  %v6270_v31 = vld [vmem:[#allocation37_spill] sm:$0xff] }
 0x1f4   : > { %v3916_v22 = vpop.xlane.xlu1 %1959  ;;  %v3923_v29 = vpop.xlane.xlu0 %1962  ;;  %vm1350_vm13 = vcmp.eq.f32.partialorder %v6270_v31, %v3743_v46 }
 0x1f5   : > { %6265 = vst [vmem:[#allocation34_spill] sm:$0xff] %v3916_v22  ;;  %6268 = vst [vmem:[#allocation31_spill] sm:$0xff] %v3923_v29  ;;  %v3948_v46 = vsel %vm1350_vm13, -inf, %v6270_v31  ;;  %v1433_v31 = vsel %vm278_vm0, %v3955_v6, -inf  ;;  %v6286_v6 = vld [vmem:[#allocation38_spill] sm:$0xff]  ;;  %vm1357_vm13 = vcmp.eq.f32.partialorder %v3305_v44, %v3862_v18  ;;  %vm2071_vm3 = vcmp.eq.f32.partialorder %v3317_v17, %v3923_v29 }
 0x1f6   : > { %6274 = vst [vmem:[#allocation130_spill] sm:$0xff] %v3948_v46  ;;  %vm2068_vm5 = vcmp.eq.f32.partialorder %v6286_v6, %v3790_v49  ;;  %v4128_v29 = vsel %vm2071_vm3, -inf, %v3317_v17 }
 0x1f7   : > { %1419 = vmax.xlane.f32.xlu1 %v1418_v62  ;;  %1416 = vmax.xlane.f32.xlu0 %v1415_v39  ;;  %v2135_v62 = vsel %vm278_vm0, %v3930_v43, -inf  ;;  %v6275_v39 = vld [vmem:[#allocation36_spill] sm:$0xff] }
 0x1f8   : > { %v3934_v54 = vpop.xlane.xlu1 %1278  ;;  %v3941_v9 = vpop.xlane.xlu0 %1281  ;;  %vm2063_vm15 = vcmp.eq.f32.partialorder %v6275_v39, %v3761_v12 }
 0x1f9   : > { %6271 = vst [vmem:[#allocation37_spill] sm:$0xff] %v3934_v54  ;;  %6273 = vst [vmem:[#allocation33_spill] sm:$0xff] %v3941_v9  ;;  %v3966_v12 = vsel %vm2063_vm15, -inf, %v6275_v39  ;;  %vm2072_vm15 = vcmp.eq.f32.partialorder %v3301_v19, %v3880_v55  ;;  %vm1361_vm6 = vcmp.eq.f32.partialorder %v3331_v0, %v3934_v54  ;;  %v6307_v54 = vld [vmem:[#allocation40_spill] sm:$0xff] }
 0x1fa   : > { %6280 = vst [vmem:[#allocation132_spill] sm:$0xff] %v3966_v12 }
 0x1fb   : > { %2136 = vmax.xlane.f32.xlu1 %v2135_v62  ;;  %2133 = vmax.xlane.f32.xlu0 %v2132_v42  ;;  %v1436_v62 = vsel %vm278_vm0, %v3948_v46, -inf  ;;  %v3973_v42 = vsel %vm2062_vm1, -inf, %v6278_v34  ;;  %vm1356_vm1 = vcmp.eq.f32.partialorder %v3319_v61, %v3905_v11 }
 0x1fc   : > { %v3952_v26 = vpop.xlane.xlu1 %1977  ;;  %v3959_v43 = vpop.xlane.xlu0 %1980  ;;  %v2126_v39 = vsel %vm278_vm0, %v3973_v42, -inf  ;;  %v4110_v11 = vsel %vm1356_vm1, -inf, %v3319_v61 }
 0x1fd   : > { %6276 = vst [vmem:[#allocation36_spill] sm:$0xff] %v3952_v26  ;;  %6279 = vst [vmem:[#allocation32_spill] sm:$0xff] %v3959_v43  ;;  %vm2076_vm8 = vcmp.eq.f32.partialorder %v6307_v54, %v3952_v26  ;;  %v6312_v26 = vld [vmem:[#allocation42_spill] sm:$0xff] }
 0x1ff   : > { %1437 = vmax.xlane.f32.xlu1 %v1436_v62  ;;  %1434 = vmax.xlane.f32.xlu0 %v1433_v31  ;;  %v2129_v62 = vsel %vm278_vm0, %v3966_v12, -inf  ;;  %v6284_v31 = vld [vmem:[#allocation39_spill] sm:$0xff] }
 0x200   : > { %v3970_v3 = vpop.xlane.xlu1 %1272  ;;  %v3977_v46 = vpop.xlane.xlu0 %1275  ;;  %vm2069_vm4 = vcmp.eq.f32.partialorder %v6284_v31, %v3797_v40 }
 0x201   : > { %6281 = vst [vmem:[#allocation133_spill] sm:$0xff] %v3970_v3  ;;  %6283 = vst [vmem:[#allocation35_spill] sm:$0xff] %v3977_v46  ;;  %v4002_v40 = vsel %vm2069_vm4, -inf, %v6284_v31  ;;  %vm2070_vm4 = vcmp.eq.f32.partialorder %v3307_v45, %v3916_v22  ;;  %vm1359_vm10 = vcmp.eq.f32.partialorder %v6312_v26, %v3970_v3  ;;  %v6317_v3 = vld [vmem:[#allocation41_spill] sm:$0xff] }
 0x203   : > { %2130 = vmax.xlane.f32.xlu1 %v2129_v62  ;;  %2127 = vmax.xlane.f32.xlu0 %v2126_v39  ;;  %v1430_v62 = vsel %vm278_vm0, %v3984_v15, -inf  ;;  %v4009_v39 = vsel %vm2068_vm5, -inf, %v6286_v6  ;;  %vm1362_vm5 = vcmp.eq.f32.partialorder %v3339_v60, %v3941_v9 }
 0x204   : > { %v3988_v34 = vpop.xlane.xlu1 %1971  ;;  %v3995_v12 = vpop.xlane.xlu0 %1974  ;;  %v2144_v31 = vsel %vm278_vm0, %v4009_v39, -inf  ;;  %v4146_v9 = vsel %vm1362_vm5, -inf, %v3339_v60 }
 0x205   : > { %6285 = vst [vmem:[#allocation39_spill] sm:$0xff] %v3988_v34  ;;  %6287 = vst [vmem:[#allocation38_spill] sm:$0xff] %v3995_v12  ;;  %vm2074_vm12 = vcmp.eq.f32.partialorder %v6317_v3, %v3988_v34 }
 0x206   : > { %v4207_v34 = vsel %vm2074_vm12, -inf, %v6317_v3 }
 0x207   : > { %1431 = vmax.xlane.f32.xlu1 %v1430_v62  ;;  %1428 = vmax.xlane.f32.xlu0 %v1427_v38  ;;  %v2147_v62 = vsel %vm278_vm0, %v4002_v40, -inf  ;;  %v4027_v38 = vsel %vm1353_vm7, -inf, %v3285_v59  ;;  %vm2077_vm7 = vcmp.eq.f32.partialorder %v3337_v2, %v3959_v43  ;;  %6322 = vst [vmem:[#allocation160_spill] sm:$0xff] %v4207_v34 }
 0x208   : > { %v4006_v48 = vpop.xlane.xlu1 %1989  ;;  %v4013_v49 = vpop.xlane.xlu0 %1992  ;;  %6292 = vst [vmem:[#allocation138_spill] sm:$0xff] %v4027_v38  ;;  %v1445_v7 = vsel %vm278_vm0, %v4027_v38, -inf  ;;  %v4164_v43 = vsel %vm2077_vm7, -inf, %v3337_v2 }
 0x209   : > { %6288 = vst [vmem:[#allocation134_spill] sm:$0xff] %v4006_v48  ;;  %6289 = vst [vmem:[#allocation135_spill] sm:$0xff] %v4013_v49 }
 0x20a   : > { %6309 = vst [vmem:[#allocation153_spill] sm:$0xff] %v4164_v43 }
 0x20b   : > { %2148 = vmax.xlane.f32.xlu1 %v2147_v62  ;;  %2145 = vmax.xlane.f32.xlu0 %v2144_v31  ;;  %v1448_v62 = vsel %vm278_vm0, %v4020_v23, -inf  ;;  %v4045_v31 = vsel %vm2066_vm9, -inf, %v3283_v57  ;;  %vm1360_vm9 = vcmp.eq.f32.partialorder %v3343_v8, %v3977_v46 }
 0x20c   : > { %v4024_v6 = vpop.xlane.xlu1 %1290  ;;  %v4031_v14 = vpop.xlane.xlu0 %1293  ;;  %v2138_v5 = vsel %vm278_vm0, %v4045_v31, -inf  ;;  %v4182_v46 = vsel %vm1360_vm9, -inf, %v3343_v8 }
 0x20d   : > { %6291 = vst [vmem:[#allocation137_spill] sm:$0xff] %v4024_v6  ;;  %6293 = vst [vmem:[#allocation139_spill] sm:$0xff] %v4031_v14 }
 0x20e   : > { %6314 = vst [vmem:[#allocation156_spill] sm:$0xff] %v4182_v46 }
 0x20f   : > { %1449 = vmax.xlane.f32.xlu1 %v1448_v62  ;;  %1446 = vmax.xlane.f32.xlu0 %v1445_v7  ;;  %v2141_v62 = vsel %vm278_vm0, %v4038_v36, -inf  ;;  %v4063_v7 = vsel %vm1351_vm11, -inf, %v3289_v4  ;;  %vm2075_vm11 = vcmp.eq.f32.partialorder %v3341_v58, %v3995_v12 }
 0x210   : > { %v4042_v59 = vpop.xlane.xlu1 %1983  ;;  %v4049_v13 = vpop.xlane.xlu0 %1986  ;;  %v1439_v10 = vsel %vm278_vm0, %v4063_v7, -inf  ;;  %v4200_v12 = vsel %vm2075_vm11, -inf, %v3341_v58  ;;  %v2162_v58 = vsel %vm278_vm0, %v4207_v34, -inf  ;;  %v6332_v34 = vld [vmem:[#allocation44_spill] sm:$0xff] }
 0x211   : > { %6294 = vst [vmem:[#allocation140_spill] sm:$0xff] %v4042_v59  ;;  %6295 = vst [vmem:[#allocation141_spill] sm:$0xff] %v4049_v13  ;;  %vm2078_vm3 = vcmp.eq.f32.partialorder %v6332_v34, %v4042_v59 }
 0x212   : > { %6319 = vst [vmem:[#allocation159_spill] sm:$0xff] %v4200_v12  ;;  %v4261_v59 = vsel %vm2078_vm3, -inf, %v6332_v34 }
 0x213   : > { %2142 = vmax.xlane.f32.xlu1 %v2141_v62  ;;  %2139 = vmax.xlane.f32.xlu0 %v2138_v5  ;;  %v1442_v62 = vsel %vm278_vm0, %v4056_v24, -inf  ;;  %v4081_v5 = vsel %vm1357_vm13, -inf, %v3305_v44 }
 0x214   : > { %v4060_v57 = vpop.xlane.xlu1 %1284  ;;  %v4067_v56 = vpop.xlane.xlu0 %1287  ;;  %v1457_v63 = vsel %vm278_vm0, %v4081_v5, -inf }
 0x215   : > { %6296 = vst [vmem:[#allocation142_spill] sm:$0xff] %v4060_v57  ;;  %6297 = vst [vmem:[#allocation143_spill] sm:$0xff] %v4067_v56 }
 0x217   : > { %1443 = vmax.xlane.f32.xlu1 %v1442_v62  ;;  %1440 = vmax.xlane.f32.xlu0 %v1439_v10  ;;  %v1460_v62 = vsel %vm278_vm0, %v4074_v25, -inf  ;;  %v4099_v10 = vsel %vm2072_vm15, -inf, %v3301_v19 }
 0x218   : > { %v4078_v4 = vpop.xlane.xlu1 %2001  ;;  %v4085_v18 = vpop.xlane.xlu0 %2004  ;;  %v2156_v16 = vsel %vm278_vm0, %v4099_v10, -inf }
 0x219   : > { %6298 = vst [vmem:[#allocation144_spill] sm:$0xff] %v4078_v4  ;;  %6299 = vst [vmem:[#allocation145_spill] sm:$0xff] %v4085_v18 }
 0x21b   : > { %1461 = vmax.xlane.f32.xlu1 %v1460_v62  ;;  %1458 = vmax.xlane.f32.xlu0 %v1457_v63  ;;  %v2159_v62 = vsel %vm278_vm0, %v4092_v47, -inf  ;;  %v4117_v63 = vsel %vm1355_vm2, -inf, %v3311_v50 }
 0x21c   : > { %v4096_v44 = vpop.xlane.xlu1 %1302  ;;  %v4103_v55 = vpop.xlane.xlu0 %1305  ;;  %v1451_v61 = vsel %vm278_vm0, %v4117_v63, -inf }
 0x21d   : > { %6300 = vst [vmem:[#allocation146_spill] sm:$0xff] %v4096_v44  ;;  %6301 = vst [vmem:[#allocation147_spill] sm:$0xff] %v4103_v55 }
 0x21f   : > { %2160 = vmax.xlane.f32.xlu1 %v2159_v62  ;;  %2157 = vmax.xlane.f32.xlu0 %v2156_v16  ;;  %v1454_v62 = vsel %vm278_vm0, %v4110_v11, -inf  ;;  %v4135_v16 = vsel %vm2070_vm4, -inf, %v3307_v45 }
 0x220   : > { %v4114_v19 = vpop.xlane.xlu1 %1995  ;;  %v4121_v35 = vpop.xlane.xlu0 %1998  ;;  %v2150_v17 = vsel %vm278_vm0, %v4135_v16, -inf }
 0x221   : > { %6302 = vst [vmem:[#allocation148_spill] sm:$0xff] %v4114_v19  ;;  %6303 = vst [vmem:[#allocation149_spill] sm:$0xff] %v4121_v35 }
 0x223   : > { %1455 = vmax.xlane.f32.xlu1 %v1454_v62  ;;  %1452 = vmax.xlane.f32.xlu0 %v1451_v61  ;;  %v2153_v62 = vsel %vm278_vm0, %v4128_v29, -inf  ;;  %v4153_v61 = vsel %vm1361_vm6, -inf, %v3331_v0 }
 0x224   : > { %v4132_v50 = vpop.xlane.xlu1 %1296  ;;  %v4139_v22 = vpop.xlane.xlu0 %1299  ;;  %v1469_v60 = vsel %vm278_vm0, %v4153_v61, -inf }
 0x225   : > { %6304 = vst [vmem:[#allocation150_spill] sm:$0xff] %v4132_v50  ;;  %6305 = vst [vmem:[#allocation151_spill] sm:$0xff] %v4139_v22 }
 0x227   : > { %2154 = vmax.xlane.f32.xlu1 %v2153_v62  ;;  %2151 = vmax.xlane.f32.xlu0 %v2150_v17  ;;  %v1472_v62 = vsel %vm278_vm0, %v4146_v9, -inf  ;;  %v4171_v17 = vsel %vm2076_vm8, -inf, %v6307_v54 }
 0x228   : > { %v4150_v45 = vpop.xlane.xlu1 %2013  ;;  %v4157_v38 = vpop.xlane.xlu0 %2016  ;;  %6311 = vst [vmem:[#allocation155_spill] sm:$0xff] %v4171_v17  ;;  %v2168_v2 = vsel %vm278_vm0, %v4171_v17, -inf  ;;  %v6323_v17 = vld [vmem:[#allocation43_spill] sm:$0xff] }
 0x229   : > { %6306 = vst [vmem:[#allocation152_spill] sm:$0xff] %v4150_v45  ;;  %6308 = vst [vmem:[#allocation40_spill] sm:$0xff] %v4157_v38  ;;  %vm2080_vm14 = vcmp.eq.f32.partialorder %v6323_v17, %v4006_v48 }
 0x22a   : > { %v4225_v48 = vsel %vm2080_vm14, -inf, %v6323_v17  ;;  %vm2089_vm14 = vcmp.eq.f32.partialorder %v3405_v37, %v4157_v38 }
 0x22b   : > { %1473 = vmax.xlane.f32.xlu1 %v1472_v62  ;;  %1470 = vmax.xlane.f32.xlu0 %v1469_v60  ;;  %v2171_v62 = vsel %vm278_vm0, %v4164_v43, -inf  ;;  %v4189_v60 = vsel %vm1359_vm10, -inf, %v6312_v26  ;;  %v4362_v38 = vsel %vm2089_vm14, -inf, %v3405_v37 }
 0x22c   : > { %v4168_v0 = vpop.xlane.xlu1 %2007  ;;  %v4175_v23 = vpop.xlane.xlu0 %2010  ;;  %6316 = vst [vmem:[#allocation158_spill] sm:$0xff] %v4189_v60  ;;  %v1463_v8 = vsel %vm278_vm0, %v4189_v60, -inf  ;;  %v6328_v60 = vld [vmem:[#allocation45_spill] sm:$0xff]  ;;  %6362 = vst [vmem:[#allocation168_spill] sm:$0xff] %v4362_v38 }
 0x22d   : > { %6310 = vst [vmem:[#allocation154_spill] sm:$0xff] %v4168_v0  ;;  %6313 = vst [vmem:[#allocation42_spill] sm:$0xff] %v4175_v23  ;;  %vm1365_vm1 = vcmp.eq.f32.partialorder %v6328_v60, %v4024_v6 }
 0x22e   : > { %v4243_v6 = vsel %vm1365_vm1, -inf, %v6328_v60  ;;  %vm2087_vm1 = vcmp.eq.f32.partialorder %v3407_v21, %v4175_v23 }
 0x22f   : > { %2172 = vmax.xlane.f32.xlu1 %v2171_v62  ;;  %2169 = vmax.xlane.f32.xlu0 %v2168_v2  ;;  %v1466_v62 = vsel %vm278_vm0, %v4182_v46, -inf  ;;  %v6320_v2 = vld [vmem:[#allocation46_spill] sm:$0xff]  ;;  %v4380_v23 = vsel %vm2087_vm1, -inf, %v3407_v21 }
 0x230   : > { %v4186_v54 = vpop.xlane.xlu1 %2025  ;;  %v4193_v43 = vpop.xlane.xlu0 %2028  ;;  %vm2081_vm13 = vcmp.eq.f32.partialorder %v6320_v2, %v4013_v49  ;;  %6367 = vst [vmem:[#allocation171_spill] sm:$0xff] %v4380_v23 }
 0x231   : > { %6315 = vst [vmem:[#allocation157_spill] sm:$0xff] %v4186_v54  ;;  %6318 = vst [vmem:[#allocation41_spill] sm:$0xff] %v4193_v43  ;;  %v4218_v49 = vsel %vm2081_vm13, -inf, %v6320_v2  ;;  %v2180_v2 = vsel %vm278_vm0, %v4225_v48, -inf  ;;  %vm2093_vm3 = vcmp.eq.f32.partialorder %v3421_v27, %v4193_v43 }
 0x232   : > { %6325 = vst [vmem:[#allocation161_spill] sm:$0xff] %v4218_v49  ;;  %v4398_v43 = vsel %vm2093_vm3, -inf, %v3421_v27 }
 0x233   : > { %1467 = vmax.xlane.f32.xlu1 %v1466_v62  ;;  %1464 = vmax.xlane.f32.xlu0 %v1463_v8  ;;  %v2165_v62 = vsel %vm278_vm0, %v4200_v12, -inf  ;;  %v6326_v8 = vld [vmem:[#allocation49_spill] sm:$0xff]  ;;  %6372 = vst [vmem:[#allocation174_spill] sm:$0xff] %v4398_v43 }
 0x234   : > { %v4204_v26 = vpop.xlane.xlu1 %2019  ;;  %v4211_v46 = vpop.xlane.xlu0 %2022  ;;  %vm1366_vm15 = vcmp.eq.f32.partialorder %v6326_v8, %v4031_v14  ;;  %6327 = vst [vmem:[#allocation49_spill] sm:$0xff] %v4225_v48  ;;  %v6336_v48 = vld [vmem:[#allocation47_spill] sm:$0xff] }
 0x235   : > { %6321 = vst [vmem:[#allocation46_spill] sm:$0xff] %v4204_v26  ;;  %6324 = vst [vmem:[#allocation43_spill] sm:$0xff] %v4211_v46  ;;  %v4236_v14 = vsel %vm1366_vm15, -inf, %v6326_v8  ;;  %v1481_v8 = vsel %vm278_vm0, %v4243_v6, -inf  ;;  %vm1363_vm5 = vcmp.eq.f32.partialorder %v6336_v48, %v4060_v57 }
 0x236   : > { %6329 = vst [vmem:[#allocation45_spill] sm:$0xff] %v4236_v14  ;;  %v4279_v57 = vsel %vm1363_vm5, -inf, %v6336_v48  ;;  %vm2091_vm5 = vcmp.eq.f32.partialorder %v3423_v32, %v4211_v46 }
 0x237   : > { %2166 = vmax.xlane.f32.xlu1 %v2165_v62  ;;  %2163 = vmax.xlane.f32.xlu0 %v2162_v58  ;;  %v2183_v62 = vsel %vm278_vm0, %v4218_v49, -inf  ;;  %v6330_v58 = vld [vmem:[#allocation48_spill] sm:$0xff]  ;;  %v4416_v46 = vsel %vm2091_vm5, -inf, %v3423_v32 }
 0x238   : > { %v4222_v3 = vpop.xlane.xlu1 %690  ;;  %v4229_v12 = vpop.xlane.xlu0 %687  ;;  %vm2079_vm2 = vcmp.eq.f32.partialorder %v6330_v58, %v4049_v13  ;;  %6331 = vst [vmem:[#allocation48_spill] sm:$0xff] %v4243_v6  ;;  %v6340_v6 = vld [vmem:[#allocation51_spill] sm:$0xff]  ;;  %6376 = vst [vmem:[#allocation178_spill] sm:$0xff] %v4416_v46 }
 0x239   : > { %v4254_v13 = vsel %vm2079_vm2, -inf, %v6330_v58  ;;  %v2174_v58 = vsel %vm278_vm0, %v4261_v59, -inf  ;;  %vm2084_vm7 = vcmp.eq.f32.partialorder %v6340_v6, %v4078_v4 }
 0x23a   : > { %6333 = vst [vmem:[#allocation44_spill] sm:$0xff] %v4254_v13  ;;  %v4297_v4 = vsel %vm2084_vm7, -inf, %v6340_v6  ;;  %vm811_vm7 = vcmp.eq.f32.partialorder %v3570_v41, %v4222_v3 }
 0x23b   : > { %2184 = vmax.xlane.f32.xlu1 %v2183_v62  ;;  %2181 = vmax.xlane.f32.xlu0 %v2180_v2  ;;  %v1484_v62 = vsel %vm278_vm0, %v4236_v14, -inf  ;;  %v6334_v2 = vld [vmem:[#allocation50_spill] sm:$0xff]  ;;  %6344 = vst [vmem:[#allocation162_spill] sm:$0xff] %v4297_v4 }
 0x23c   : > { %v4240_v17 = vpop.xlane.xlu1 %750  ;;  %v4247_v49 = vpop.xlane.xlu0 %747  ;;  %vm1364_vm4 = vcmp.eq.f32.partialorder %v6334_v2, %v4067_v56  ;;  %6335 = vst [vmem:[#allocation50_spill] sm:$0xff] %v4261_v59  ;;  %v6345_v59 = vld [vmem:[#allocation53_spill] sm:$0xff] }
 0x23d   : > { %v4272_v56 = vsel %vm1364_vm4, -inf, %v6334_v2  ;;  %v1475_v2 = vsel %vm278_vm0, %v4279_v57, -inf  ;;  %vm1369_vm9 = vcmp.eq.f32.partialorder %v6345_v59, %v4096_v44 }
 0x23e   : > { %6337 = vst [vmem:[#allocation47_spill] sm:$0xff] %v4272_v56  ;;  %v4315_v44 = vsel %vm1369_vm9, -inf, %v6345_v59  ;;  %vm831_vm9 = vcmp.eq.f32.partialorder %v3588_v52, %v4240_v17 }
 0x23f   : > { %1485 = vmax.xlane.f32.xlu1 %v1484_v62  ;;  %1482 = vmax.xlane.f32.xlu0 %v1481_v8  ;;  %v2177_v62 = vsel %vm278_vm0, %v4254_v13, -inf  ;;  %v6338_v8 = vld [vmem:[#allocation54_spill] sm:$0xff] }
 0x240   : > { %v4258_v60 = vpop.xlane.xlu1 %684  ;;  %v4265_v14 = vpop.xlane.xlu0 %681  ;;  %vm2085_vm6 = vcmp.eq.f32.partialorder %v6338_v8, %v4085_v18  ;;  %6339 = vst [vmem:[#allocation54_spill] sm:$0xff] %v4279_v57  ;;  %v6350_v57 = vld [vmem:[#allocation52_spill] sm:$0xff] }
 0x241   : > { %v4290_v18 = vsel %vm2085_vm6, -inf, %v6338_v8  ;;  %v2192_v8 = vsel %vm278_vm0, %v4297_v4, -inf  ;;  %vm2082_vm11 = vcmp.eq.f32.partialorder %v6350_v57, %v4114_v19  ;;  %v6355_v4 = vld [vmem:[#allocation55_spill] sm:$0xff]  ;;  %vm2090_vm6 = vcmp.eq.f32.partialorder %v3417_v33, %v4204_v26 }
 0x242   : > { %6341 = vst [vmem:[#allocation51_spill] sm:$0xff] %v4290_v18  ;;  %v4333_v19 = vsel %vm2082_vm11, -inf, %v6350_v57  ;;  %vm1367_vm13 = vcmp.eq.f32.partialorder %v6355_v4, %v4132_v50  ;;  %v6360_v50 = vld [vmem:[#allocation59_spill] sm:$0xff]  ;;  %vm809_vm11 = vcmp.eq.f32.partialorder %v3606_v53, %v4258_v60 }
 0x243   : > { %2178 = vmax.xlane.f32.xlu1 %v2177_v62  ;;  %2175 = vmax.xlane.f32.xlu0 %v2174_v58  ;;  %v1478_v62 = vsel %vm278_vm0, %v4272_v56, -inf  ;;  %v6342_v58 = vld [vmem:[#allocation57_spill] sm:$0xff]  ;;  %vm2088_vm15 = vcmp.eq.f32.partialorder %v6360_v50, %v4150_v45  ;;  %v6365_v45 = vld [vmem:[#allocation60_spill] sm:$0xff] }
 0x244   : > { %v4276_v34 = vpop.xlane.xlu1 %744  ;;  %v4283_v13 = vpop.xlane.xlu0 %741  ;;  %vm1370_vm8 = vcmp.eq.f32.partialorder %v6342_v58, %v4103_v55  ;;  %vm2086_vm2 = vcmp.eq.f32.partialorder %v6365_v45, %v4168_v0  ;;  %v6370_v0 = vld [vmem:[#allocation61_spill] sm:$0xff] }
 0x245   : > { %v4308_v55 = vsel %vm1370_vm8, -inf, %v6342_v58  ;;  %v1493_v58 = vsel %vm278_vm0, %v4315_v44, -inf  ;;  %vm2092_vm4 = vcmp.eq.f32.partialorder %v6370_v0, %v4186_v54  ;;  %vm810_vm8 = vcmp.eq.f32.partialorder %v3577_v1, %v4229_v12 }
 0x246   : > { %6347 = vst [vmem:[#allocation163_spill] sm:$0xff] %v4308_v55 }
 0x247   : > { %1479 = vmax.xlane.f32.xlu1 %v1478_v62  ;;  %1476 = vmax.xlane.f32.xlu0 %v1475_v2  ;;  %v2195_v62 = vsel %vm278_vm0, %v4290_v18, -inf  ;;  %v6348_v2 = vld [vmem:[#allocation56_spill] sm:$0xff] }
 0x248   : > { %v4294_v48 = vpop.xlane.xlu1 %702  ;;  %v4301_v56 = vpop.xlane.xlu0 %699  ;;  %vm2083_vm10 = vcmp.eq.f32.partialorder %v6348_v2, %v4121_v35 }
 0x249   : > { %6343 = vst [vmem:[#allocation57_spill] sm:$0xff] %v4294_v48  ;;  %6346 = vst [vmem:[#allocation53_spill] sm:$0xff] %v4301_v56  ;;  %v4326_v35 = vsel %vm2083_vm10, -inf, %v6348_v2  ;;  %v2186_v2 = vsel %vm278_vm0, %v4333_v19, -inf  ;;  %vm830_vm10 = vcmp.eq.f32.partialorder %v3595_v20, %v4247_v49 }
 0x24a   : > { %6352 = vst [vmem:[#allocation164_spill] sm:$0xff] %v4326_v35 }
 0x24b   : > { %2196 = vmax.xlane.f32.xlu1 %v2195_v62  ;;  %2193 = vmax.xlane.f32.xlu0 %v2192_v8  ;;  %v1496_v62 = vsel %vm278_vm0, %v4308_v55, -inf  ;;  %v6353_v8 = vld [vmem:[#allocation58_spill] sm:$0xff] }
 0x24c   : > { %v4312_v6 = vpop.xlane.xlu1 %762  ;;  %v4319_v18 = vpop.xlane.xlu0 %759  ;;  %vm1368_vm12 = vcmp.eq.f32.partialorder %v6353_v8, %v4139_v22 }
 0x24d   : > { %6349 = vst [vmem:[#allocation56_spill] sm:$0xff] %v4312_v6  ;;  %6351 = vst [vmem:[#allocation52_spill] sm:$0xff] %v4319_v18  ;;  %v4344_v22 = vsel %vm1368_vm12, -inf, %v6353_v8  ;;  %vm808_vm12 = vcmp.eq.f32.partialorder %v3613_v28, %v4265_v14 }
 0x24e   : > { %6357 = vst [vmem:[#allocation165_spill] sm:$0xff] %v4344_v22 }
 0x24f   : > { %1497 = vmax.xlane.f32.xlu1 %v1496_v62  ;;  %1494 = vmax.xlane.f32.xlu0 %v1493_v58  ;;  %v2189_v62 = vsel %vm278_vm0, %v4326_v35, -inf  ;;  %v4351_v58 = vsel %vm1367_vm13, -inf, %v6355_v4 }
 0x250   : > { %v4330_v59 = vpop.xlane.xlu1 %696  ;;  %v4337_v55 = vpop.xlane.xlu0 %693  ;;  %6359 = vst [vmem:[#allocation167_spill] sm:$0xff] %v4351_v58  ;;  %v1487_v8 = vsel %vm278_vm0, %v4351_v58, -inf }
 0x251   : > { %6354 = vst [vmem:[#allocation58_spill] sm:$0xff] %v4330_v59  ;;  %6356 = vst [vmem:[#allocation55_spill] sm:$0xff] %v4337_v55 }
 0x253   : > { %2190 = vmax.xlane.f32.xlu1 %v2189_v62  ;;  %2187 = vmax.xlane.f32.xlu0 %v2186_v2  ;;  %v1490_v62 = vsel %vm278_vm0, %v4344_v22, -inf  ;;  %v4369_v2 = vsel %vm2088_vm15, -inf, %v6360_v50 }
 0x254   : > { %v4348_v57 = vpop.xlane.xlu1 %756  ;;  %v4355_v35 = vpop.xlane.xlu0 %753  ;;  %6364 = vst [vmem:[#allocation170_spill] sm:$0xff] %v4369_v2  ;;  %v2204_v37 = vsel %vm278_vm0, %v4369_v2, -inf  ;;  %v6390_v2 = vld [vmem:[#allocation98_spill] sm:$0xff] }
 0x255   : > { %6358 = vst [vmem:[#allocation166_spill] sm:$0xff] %v4348_v57  ;;  %6361 = vst [vmem:[#allocation59_spill] sm:$0xff] %v4355_v35  ;;  %vm814_vm1 = vcmp.eq.f32.partialorder %v6390_v2, %v4301_v56 }
 0x257   : > { %1491 = vmax.xlane.f32.xlu1 %v1490_v62  ;;  %1488 = vmax.xlane.f32.xlu0 %v1487_v8  ;;  %v2207_v62 = vsel %vm278_vm0, %v4362_v38, -inf  ;;  %v4387_v8 = vsel %vm2086_vm2, -inf, %v6365_v45 }
 0x258   : > { %v4366_v4 = vpop.xlane.xlu1 %714  ;;  %v4373_v22 = vpop.xlane.xlu0 %711  ;;  %6369 = vst [vmem:[#allocation173_spill] sm:$0xff] %v4387_v8  ;;  %v2198_v21 = vsel %vm278_vm0, %v4387_v8, -inf  ;;  %v6386_v8 = vld [vmem:[#allocation94_spill] sm:$0xff] }
 0x259   : > { %6363 = vst [vmem:[#allocation169_spill] sm:$0xff] %v4366_v4  ;;  %6366 = vst [vmem:[#allocation60_spill] sm:$0xff] %v4373_v22  ;;  %vm828_vm14 = vcmp.eq.f32.partialorder %v6386_v8, %v4283_v13 }
 0x25b   : > { %2208 = vmax.xlane.f32.xlu1 %v2207_v62  ;;  %2205 = vmax.xlane.f32.xlu0 %v2204_v37  ;;  %v2201_v62 = vsel %vm278_vm0, %v4380_v23, -inf  ;;  %v4405_v37 = vsel %vm2092_vm4, -inf, %v6370_v0 }
 0x25c   : > { %v4384_v50 = vpop.xlane.xlu1 %774  ;;  %v4391_v38 = vpop.xlane.xlu0 %771  ;;  %6374 = vst [vmem:[#allocation176_spill] sm:$0xff] %v4405_v37  ;;  %v2216_v27 = vsel %vm278_vm0, %v4405_v37, -inf  ;;  %v843_v37 = vsel %vm811_vm7, -inf, %v3570_v41  ;;  %v863_v41 = vsel %vm831_vm9, -inf, %v3588_v52  ;;  %v841_v52 = vsel %vm809_vm11, -inf, %v3606_v53 }
 0x25d   : > { %6368 = vst [vmem:[#allocation172_spill] sm:$0xff] %v4384_v50  ;;  %6371 = vst [vmem:[#allocation61_spill] sm:$0xff] %v4391_v38 }
 0x25f   : > { %2202 = vmax.xlane.f32.xlu1 %v2201_v62  ;;  %2199 = vmax.xlane.f32.xlu0 %v2198_v21  ;;  %v2219_v62 = vsel %vm278_vm0, %v4398_v43, -inf  ;;  %v4423_v21 = vsel %vm2090_vm6, -inf, %v3417_v33 }
 0x260   : > { %v4402_v45 = vpop.xlane.xlu1 %708  ;;  %v4409_v54 = vpop.xlane.xlu0 %705  ;;  %6378 = vst [vmem:[#allocation180_spill] sm:$0xff] %v4423_v21  ;;  %v2210_v32 = vsel %vm278_vm0, %v4423_v21, -inf }
 0x261   : > { %6373 = vst [vmem:[#allocation175_spill] sm:$0xff] %v4402_v45  ;;  %6375 = vst [vmem:[#allocation177_spill] sm:$0xff] %v4409_v54 }
 0x263   : > { %2220 = vmax.xlane.f32.xlu1 %v2219_v62  ;;  %2217 = vmax.xlane.f32.xlu0 %v2216_v27  ;;  %v2213_v62 = vsel %vm278_vm0, %v4416_v46, -inf  ;;  %v842_v27 = vsel %vm810_vm8, -inf, %v3577_v1  ;;  %v862_v1 = vsel %vm830_vm10, -inf, %v3595_v20  ;;  %v840_v20 = vsel %vm808_vm12, -inf, %v3613_v28 }
 0x264   : > { %v4420_v0 = vpop.xlane.xlu1 %768  ;;  %v4427_v26 = vpop.xlane.xlu0 %765  ;;  %v878_v46 = vsel %vm278_vm0, %v842_v27, -inf  ;;  %v938_v27 = vsel %vm278_vm0, %v862_v1, -inf  ;;  %v872_v1 = vsel %vm278_vm0, %v840_v20, -inf  ;;  %v860_v28 = vsel %vm828_vm14, -inf, %v6386_v8 }
 0x265   : > { %6377 = vst [vmem:[#allocation179_spill] sm:$0xff] %v4420_v0  ;;  %6379 = vst [vmem:[#allocation181_spill] sm:$0xff] %v4427_v26  ;;  %v932_v20 = vsel %vm278_vm0, %v860_v28, -inf  ;;  %v846_v8 = vsel %vm814_vm1, -inf, %v6390_v2 }
 0x266   : > { %v890_v28 = vsel %vm278_vm0, %v846_v8, -inf }
 0x267   : > { %2214 = vmax.xlane.f32.xlu1 %v2213_v62  ;;  %2211 = vmax.xlane.f32.xlu0 %v2210_v32  ;;  %v881_v62 = vsel %vm278_vm0, %v843_v37, -inf  ;;  %v941_v37 = vsel %vm278_vm0, %v863_v41, -inf  ;;  %v875_v41 = vsel %vm278_vm0, %v841_v52, -inf }
 0x268   : > { %v4436_v33 = vpop.xlane.xlu1 %726  ;;  %v4441_v43 = vpop.xlane.xlu0 %723 }
 0x269   : > { %6380 = vst [vmem:[#allocation182_spill] sm:$0xff] %v4436_v33  ;;  %6381 = vst [vmem:[#allocation183_spill] sm:$0xff] %v4441_v43 }
 0x26b   : > { %882 = vmax.xlane.f32.xlu1 %v881_v62  ;;  %879 = vmax.xlane.f32.xlu0 %v878_v46  ;;  %v6384_v62 = vld [vmem:[#allocation92_spill] sm:$0xff] }
 0x26c   : > { %v4448_v32 = vpop.xlane.xlu1 %1413  ;;  %v4453_v21 = vpop.xlane.xlu0 %1410  ;;  %vm829_vm13 = vcmp.eq.f32.partialorder %v6384_v62, %v4276_v34 }
 0x26d   : > { %6382 = vst [vmem:[#allocation184_spill] sm:$0xff] %v4448_v32  ;;  %6383 = vst [vmem:[#allocation185_spill] sm:$0xff] %v4453_v21  ;;  %v861_v53 = vsel %vm829_vm13, -inf, %v6384_v62 }
 0x26e   : > { %v935_v52 = vsel %vm278_vm0, %v861_v53, -inf }
 0x26f   : > { %942 = vmax.xlane.f32.xlu1 %v941_v37  ;;  %939 = vmax.xlane.f32.xlu0 %v938_v27  ;;  %v6388_v37 = vld [vmem:[#allocation96_spill] sm:$0xff] }
 0x270   : > { %v4460_v46 = vpop.xlane.xlu1 %720  ;;  %v4465_v23 = vpop.xlane.xlu0 %717  ;;  %vm815_vm15 = vcmp.eq.f32.partialorder %v6388_v37, %v4294_v48  ;;  %v6394_v48 = vld [vmem:[#allocation100_spill] sm:$0xff] }
 0x271   : > { %6385 = vst [vmem:[#allocation92_spill] sm:$0xff] %v4460_v46  ;;  %6387 = vst [vmem:[#allocation94_spill] sm:$0xff] %v4465_v23  ;;  %v847_v62 = vsel %vm815_vm15, -inf, %v6388_v37  ;;  %vm834_vm3 = vcmp.eq.f32.partialorder %v6394_v48, %v4319_v18 }
 0x272   : > { %v893_v53 = vsel %vm278_vm0, %v847_v62, -inf  ;;  %v866_v2 = vsel %vm834_vm3, -inf, %v6394_v48 }
 0x273   : > { %876 = vmax.xlane.f32.xlu1 %v875_v41  ;;  %873 = vmax.xlane.f32.xlu0 %v872_v1  ;;  %v6392_v41 = vld [vmem:[#allocation99_spill] sm:$0xff]  ;;  %v950_v8 = vsel %vm278_vm0, %v866_v2, -inf }
 0x274   : > { %v4472_v27 = vpop.xlane.xlu1 %1407  ;;  %v4477_v58 = vpop.xlane.xlu0 %1404  ;;  %vm835_vm2 = vcmp.eq.f32.partialorder %v6392_v41, %v4312_v6  ;;  %v6398_v6 = vld [vmem:[#allocation102_spill] sm:$0xff] }
 0x275   : > { %6389 = vst [vmem:[#allocation96_spill] sm:$0xff] %v4472_v27  ;;  %6391 = vst [vmem:[#allocation98_spill] sm:$0xff] %v4477_v58  ;;  %v867_v37 = vsel %vm835_vm2, -inf, %v6392_v41  ;;  %vm812_vm5 = vcmp.eq.f32.partialorder %v6398_v6, %v4337_v55 }
 0x276   : > { %v953_v62 = vsel %vm278_vm0, %v867_v37, -inf  ;;  %v844_v48 = vsel %vm812_vm5, -inf, %v6398_v6 }
 0x277   : > { %936 = vmax.xlane.f32.xlu1 %v935_v52  ;;  %933 = vmax.xlane.f32.xlu0 %v932_v20  ;;  %v6396_v52 = vld [vmem:[#allocation101_spill] sm:$0xff]  ;;  %v884_v2 = vsel %vm278_vm0, %v844_v48, -inf }
 0x278   : > { %v4484_v1 = vpop.xlane.xlu1 %738  ;;  %v4489_v56 = vpop.xlane.xlu0 %735  ;;  %vm813_vm4 = vcmp.eq.f32.partialorder %v6396_v52, %v4330_v59  ;;  %v6402_v59 = vld [vmem:[#allocation104_spill] sm:$0xff] }
 0x279   : > { %6393 = vst [vmem:[#allocation99_spill] sm:$0xff] %v4484_v1  ;;  %6395 = vst [vmem:[#allocation100_spill] sm:$0xff] %v4489_v56  ;;  %v845_v41 = vsel %vm813_vm4, -inf, %v6396_v52  ;;  %vm832_vm7 = vcmp.eq.f32.partialorder %v6402_v59, %v4355_v35 }
 0x27a   : > { %v887_v37 = vsel %vm278_vm0, %v845_v41, -inf  ;;  %v864_v6 = vsel %vm832_vm7, -inf, %v6402_v59 }
 0x27b   : > { %894 = vmax.xlane.f32.xlu1 %v893_v53  ;;  %891 = vmax.xlane.f32.xlu0 %v890_v28  ;;  %v6400_v53 = vld [vmem:[#allocation103_spill] sm:$0xff]  ;;  %v944_v48 = vsel %vm278_vm0, %v864_v6, -inf }
 0x27c   : > { %v4496_v20 = vpop.xlane.xlu1 %1425  ;;  %v4501_v18 = vpop.xlane.xlu0 %1422  ;;  %vm833_vm6 = vcmp.eq.f32.partialorder %v6400_v53, %v4348_v57  ;;  %v6405_v57 = vld [vmem:[#allocation106_spill] sm:$0xff] }
 0x27d   : > { %6397 = vst [vmem:[#allocation101_spill] sm:$0xff] %v4496_v20  ;;  %6399 = vst [vmem:[#allocation102_spill] sm:$0xff] %v4501_v18  ;;  %v865_v52 = vsel %vm833_vm6, -inf, %v6400_v53  ;;  %vm818_vm9 = vcmp.eq.f32.partialorder %v6405_v57, %v4373_v22 }
 0x27e   : > { %v947_v41 = vsel %vm278_vm0, %v865_v52, -inf  ;;  %v850_v59 = vsel %vm818_vm9, -inf, %v6405_v57 }
 0x27f   : > { %954 = vmax.xlane.f32.xlu1 %v953_v62  ;;  %951 = vmax.xlane.f32.xlu0 %v950_v8  ;;  %v6404_v62 = vld [vmem:[#allocation105_spill] sm:$0xff]  ;;  %v902_v6 = vsel %vm278_vm0, %v850_v59, -inf }
 0x280   : > { %v4508_v28 = vpop.xlane.xlu1 %732  ;;  %v4513_v55 = vpop.xlane.xlu0 %729  ;;  %vm819_vm8 = vcmp.eq.f32.partialorder %v6404_v62, %v4366_v4  ;;  %v6409_v4 = vld [vmem:[#allocation108_spill] sm:$0xff] }
 0x281   : > { %6401 = vst [vmem:[#allocation103_spill] sm:$0xff] %v4508_v28  ;;  %6403 = vst [vmem:[#allocation104_spill] sm:$0xff] %v4513_v55  ;;  %v851_v53 = vsel %vm819_vm8, -inf, %v6404_v62  ;;  %vm838_vm11 = vcmp.eq.f32.partialorder %v6409_v4, %v4391_v38 }
 0x282   : > { %v905_v52 = vsel %vm278_vm0, %v851_v53, -inf  ;;  %v870_v57 = vsel %vm838_vm11, -inf, %v6409_v4 }
 0x283   : > { %888 = vmax.xlane.f32.xlu1 %v887_v37  ;;  %885 = vmax.xlane.f32.xlu0 %v884_v2  ;;  %v6407_v37 = vld [vmem:[#allocation107_spill] sm:$0xff]  ;;  %v962_v59 = vsel %vm278_vm0, %v870_v57, -inf }
 0x284   : > { %v4520_v8 = vpop.xlane.xlu1 %1419  ;;  %v4525_v35 = vpop.xlane.xlu0 %1416  ;;  %vm839_vm10 = vcmp.eq.f32.partialorder %v6407_v37, %v4384_v50  ;;  %v6412_v50 = vld [vmem:[#allocation110_spill] sm:$0xff] }
 0x285   : > { %6406 = vst [vmem:[#allocation105_spill] sm:$0xff] %v4525_v35  ;;  %v871_v62 = vsel %vm839_vm10, -inf, %v6407_v37  ;;  %vm816_vm13 = vcmp.eq.f32.partialorder %v6412_v50, %v4409_v54 }
 0x286   : > { %v965_v53 = vsel %vm278_vm0, %v871_v62, -inf  ;;  %v848_v4 = vsel %vm816_vm13, -inf, %v6412_v50 }
 0x287   : > { %948 = vmax.xlane.f32.xlu1 %v947_v41  ;;  %945 = vmax.xlane.f32.xlu0 %v944_v48  ;;  %v6411_v41 = vld [vmem:[#allocation109_spill] sm:$0xff]  ;;  %v896_v57 = vsel %vm278_vm0, %v848_v4, -inf }
 0x288   : > { %v4532_v2 = vpop.xlane.xlu1 %2136  ;;  %v4537_v22 = vpop.xlane.xlu0 %2133  ;;  %vm817_vm12 = vcmp.eq.f32.partialorder %v6411_v41, %v4402_v45  ;;  %v6415_v45 = vld [vmem:[#allocation112_spill] sm:$0xff] }
 0x289   : > { %6408 = vst [vmem:[#allocation106_spill] sm:$0xff] %v4532_v2  ;;  %6410 = vst [vmem:[#allocation107_spill] sm:$0xff] %v4537_v22  ;;  %v849_v37 = vsel %vm817_vm12, -inf, %v6411_v41  ;;  %vm836_vm15 = vcmp.eq.f32.partialorder %v6415_v45, %v4427_v26 }
 0x28a   : > { %v899_v62 = vsel %vm278_vm0, %v849_v37, -inf  ;;  %v868_v50 = vsel %vm836_vm15, -inf, %v6415_v45 }
 0x28b   : > { %906 = vmax.xlane.f32.xlu1 %v905_v52  ;;  %903 = vmax.xlane.f32.xlu0 %v902_v6  ;;  %v6414_v52 = vld [vmem:[#allocation111_spill] sm:$0xff]  ;;  %v956_v4 = vsel %vm278_vm0, %v868_v50, -inf }
 0x28c   : > { %v4544_v48 = vpop.xlane.xlu1 %1437  ;;  %v4549_v38 = vpop.xlane.xlu0 %1434  ;;  %vm837_vm14 = vcmp.eq.f32.partialorder %v6414_v52, %v4420_v0  ;;  %v6417_v0 = vld [vmem:[#allocation116_spill] sm:$0xff] }
 0x28d   : > { %6413 = vst [vmem:[#allocation108_spill] sm:$0xff] %v4549_v38  ;;  %v869_v41 = vsel %vm837_vm14, -inf, %v6414_v52  ;;  %vm1533_vm2 = vcmp.eq.f32.partialorder %v6417_v0, %v4453_v21 }
 0x28e   : > { %v959_v37 = vsel %vm278_vm0, %v869_v41, -inf  ;;  %v1565_v45 = vsel %vm1533_vm2, -inf, %v6417_v0 }
 0x28f   : > { %966 = vmax.xlane.f32.xlu1 %v965_v53  ;;  %963 = vmax.xlane.f32.xlu0 %v962_v59  ;;  %v6416_v53 = vld [vmem:[#allocation115_spill] sm:$0xff]  ;;  %v1601_v50 = vsel %vm278_vm0, %v1565_v45, -inf }
 0x290   : > { %v4556_v6 = vpop.xlane.xlu1 %2130  ;;  %v4561_v54 = vpop.xlane.xlu0 %2127  ;;  %vm1534_vm1 = vcmp.eq.f32.partialorder %v6416_v53, %v4448_v32  ;;  %v6419_v32 = vld [vmem:[#allocation114_spill] sm:$0xff] }
 0x291   : > { %v1566_v52 = vsel %vm1534_vm1, -inf, %v6416_v53  ;;  %vm822_vm4 = vcmp.eq.f32.partialorder %v6419_v32, %v4441_v43 }
 0x292   : > { %v1604_v41 = vsel %vm278_vm0, %v1566_v52, -inf  ;;  %v854_v0 = vsel %vm822_vm4, -inf, %v6419_v32 }
 0x293   : > { %900 = vmax.xlane.f32.xlu1 %v899_v62  ;;  %897 = vmax.xlane.f32.xlu0 %v896_v57  ;;  %v6418_v62 = vld [vmem:[#allocation113_spill] sm:$0xff]  ;;  %v914_v45 = vsel %vm278_vm0, %v854_v0, -inf }
 0x294   : > { %v4568_v59 = vpop.xlane.xlu1 %1431  ;;  %v4573_v26 = vpop.xlane.xlu0 %1428  ;;  %vm823_vm3 = vcmp.eq.f32.partialorder %v6418_v62, %v4436_v33  ;;  %v6422_v33 = vld [vmem:[#allocation120_spill] sm:$0xff] }
 0x295   : > { %v855_v53 = vsel %vm823_vm3, -inf, %v6418_v62  ;;  %vm1531_vm6 = vcmp.eq.f32.partialorder %v6422_v33, %v4477_v58  ;;  %vm2256_vm3 = vcmp.eq.f32.partialorder %v3937_v30, %v4537_v22 }
 0x296   : > { %v917_v52 = vsel %vm278_vm0, %v855_v53, -inf  ;;  %v1563_v32 = vsel %vm1531_vm6, -inf, %v6422_v33 }
 0x297   : > { %960 = vmax.xlane.f32.xlu1 %v959_v37  ;;  %957 = vmax.xlane.f32.xlu0 %v956_v4  ;;  %v6420_v37 = vld [vmem:[#allocation119_spill] sm:$0xff]  ;;  %v1595_v0 = vsel %vm278_vm0, %v1563_v32, -inf }
 0x298   : > { %v4580_v57 = vpop.xlane.xlu1 %2148  ;;  %v4585_v21 = vpop.xlane.xlu0 %2145  ;;  %vm1532_vm5 = vcmp.eq.f32.partialorder %v6420_v37, %v4472_v27  ;;  %v6425_v27 = vld [vmem:[#allocation118_spill] sm:$0xff] }
 0x299   : > { %v1564_v62 = vsel %vm1532_vm5, -inf, %v6420_v37  ;;  %vm820_vm8 = vcmp.eq.f32.partialorder %v6425_v27, %v4465_v23 }
 0x29a   : > { %v1598_v53 = vsel %vm278_vm0, %v1564_v62, -inf  ;;  %v852_v33 = vsel %vm820_vm8, -inf, %v6425_v27  ;;  %vm1540_vm8 = vcmp.eq.f32.partialorder %v3984_v15, %v4568_v59 }
 0x29b   : > { %1605 = vmax.xlane.f32.xlu1 %v1604_v41  ;;  %1602 = vmax.xlane.f32.xlu0 %v1601_v50  ;;  %v6424_v41 = vld [vmem:[#allocation117_spill] sm:$0xff]  ;;  %v908_v32 = vsel %vm278_vm0, %v852_v33, -inf }
 0x29c   : > { %v4592_v4 = vpop.xlane.xlu1 %1449  ;;  %v4597_v43 = vpop.xlane.xlu0 %1446  ;;  %vm821_vm7 = vcmp.eq.f32.partialorder %v6424_v41, %v4460_v46  ;;  %v6427_v46 = vld [vmem:[#allocation122_spill] sm:$0xff] }
 0x29d   : > { %6421 = vst [vmem:[#allocation109_spill] sm:$0xff] %v4592_v4  ;;  %6423 = vst [vmem:[#allocation110_spill] sm:$0xff] %v4597_v43  ;;  %v853_v37 = vsel %vm821_vm7, -inf, %v6424_v41  ;;  %vm826_vm10 = vcmp.eq.f32.partialorder %v6427_v46, %v4489_v56  ;;  %vm2254_vm7 = vcmp.eq.f32.partialorder %v3973_v42, %v4561_v54 }
 0x29e   : > { %v911_v62 = vsel %vm278_vm0, %v853_v37, -inf  ;;  %v858_v27 = vsel %vm826_vm10, -inf, %v6427_v46  ;;  %vm2261_vm10 = vcmp.eq.f32.partialorder %v4002_v40, %v4580_v57 }
 0x29f   : > { %918 = vmax.xlane.f32.xlu1 %v917_v52  ;;  %915 = vmax.xlane.f32.xlu0 %v914_v45  ;;  %v6426_v52 = vld [vmem:[#allocation121_spill] sm:$0xff]  ;;  %v926_v33 = vsel %vm278_vm0, %v858_v27, -inf }
 0x2a0   : > { %v4604_v50 = vpop.xlane.xlu1 %2142  ;;  %v4609_v58 = vpop.xlane.xlu0 %2139  ;;  %vm827_vm9 = vcmp.eq.f32.partialorder %v6426_v52, %v4484_v1  ;;  %v6429_v1 = vld [vmem:[#allocation124_spill] sm:$0xff] }
 0x2a1   : > { %v859_v41 = vsel %vm827_vm9, -inf, %v6426_v52  ;;  %vm1537_vm12 = vcmp.eq.f32.partialorder %v6429_v1, %v4501_v18  ;;  %vm1539_vm9 = vcmp.eq.f32.partialorder %v3991_v51, %v4573_v26 }
 0x2a2   : > { %v929_v37 = vsel %vm278_vm0, %v859_v41, -inf  ;;  %v1569_v46 = vsel %vm1537_vm12, -inf, %v6429_v1  ;;  %vm2259_vm12 = vcmp.eq.f32.partialorder %v4038_v36, %v4604_v50 }
 0x2a3   : > { %1599 = vmax.xlane.f32.xlu1 %v1598_v53  ;;  %1596 = vmax.xlane.f32.xlu0 %v1595_v0  ;;  %v6428_v53 = vld [vmem:[#allocation123_spill] sm:$0xff]  ;;  %v1613_v27 = vsel %vm278_vm0, %v1569_v46, -inf }
 0x2a4   : > { %v4616_v45 = vpop.xlane.xlu1 %1443  ;;  %v4621_v23 = vpop.xlane.xlu0 %1440  ;;  %vm1538_vm11 = vcmp.eq.f32.partialorder %v6428_v53, %v4496_v20  ;;  %v6431_v20 = vld [vmem:[#allocation126_spill] sm:$0xff] }
 0x2a5   : > { %v1570_v52 = vsel %vm1538_vm11, -inf, %v6428_v53  ;;  %vm824_vm14 = vcmp.eq.f32.partialorder %v6431_v20, %v4513_v55  ;;  %vm2260_vm11 = vcmp.eq.f32.partialorder %v4009_v39, %v4585_v21 }
 0x2a6   : > { %v1616_v41 = vsel %vm278_vm0, %v1570_v52, -inf  ;;  %v856_v1 = vsel %vm824_vm14, -inf, %v6431_v20  ;;  %vm1544_vm14 = vcmp.eq.f32.partialorder %v4056_v24, %v4616_v45 }
 0x2a7   : > { %912 = vmax.xlane.f32.xlu1 %v911_v62  ;;  %909 = vmax.xlane.f32.xlu0 %v908_v32  ;;  %v6430_v62 = vld [vmem:[#allocation125_spill] sm:$0xff]  ;;  %v920_v46 = vsel %vm278_vm0, %v856_v1, -inf }
 0x2a8   : > { %v4628_v0 = vpop.xlane.xlu1 %1461  ;;  %v4633_v56 = vpop.xlane.xlu0 %1458  ;;  %vm825_vm13 = vcmp.eq.f32.partialorder %v6430_v62, %v4508_v28  ;;  %v6433_v28 = vld [vmem:[#allocation128_spill] sm:$0xff] }
 0x2a9   : > { %v857_v53 = vsel %vm825_vm13, -inf, %v6430_v62  ;;  %vm1535_vm1 = vcmp.eq.f32.partialorder %v6433_v28, %v4525_v35  ;;  %vm2258_vm13 = vcmp.eq.f32.partialorder %v4045_v31, %v4609_v58 }
 0x2aa   : > { %v923_v52 = vsel %vm278_vm0, %v857_v53, -inf  ;;  %v1567_v20 = vsel %vm1535_vm1, -inf, %v6433_v28  ;;  %v2288_v28 = vsel %vm2256_vm3, -inf, %v3937_v30  ;;  %vm1550_vm1 = vcmp.eq.f32.partialorder %v4074_v25, %v4628_v0 }
 0x2ab   : > { %930 = vmax.xlane.f32.xlu1 %v929_v37  ;;  %927 = vmax.xlane.f32.xlu0 %v926_v33  ;;  %v6432_v37 = vld [vmem:[#allocation127_spill] sm:$0xff]  ;;  %v1607_v1 = vsel %vm278_vm0, %v1567_v20, -inf  ;;  %v2324_v20 = vsel %vm278_vm0, %v2288_v28, -inf }
 0x2ac   : > { %v4640_v32 = vpop.xlane.xlu1 %2160  ;;  %v4645_v18 = vpop.xlane.xlu0 %2157  ;;  %vm1536_vm15 = vcmp.eq.f32.partialorder %v6432_v37, %v4520_v8 }
 0x2ad   : > { %v1568_v62 = vsel %vm1536_vm15, -inf, %v6432_v37  ;;  %vm1543_vm15 = vcmp.eq.f32.partialorder %v4063_v7, %v4621_v23  ;;  %vm2265_vm3 = vcmp.eq.f32.partialorder %v4092_v47, %v4640_v32 }
 0x2ae   : > { %v1610_v53 = vsel %vm278_vm0, %v1568_v62, -inf }
 0x2af   : > { %1617 = vmax.xlane.f32.xlu1 %v1616_v41  ;;  %1614 = vmax.xlane.f32.xlu0 %v1613_v27  ;;  %v6435_v41 = vld [vmem:[#allocation129_spill] sm:$0xff] }
 0x2b0   : > { %v4652_v33 = vpop.xlane.xlu1 %1455  ;;  %v4657_v55 = vpop.xlane.xlu0 %1452  ;;  %vm2257_vm2 = vcmp.eq.f32.partialorder %v6435_v41, %v4532_v2  ;;  %v6440_v2 = vld [vmem:[#allocation131_spill] sm:$0xff] }
 0x2b1   : > { %6434 = vst [vmem:[#allocation111_spill] sm:$0xff] %v4657_v55  ;;  %v2289_v37 = vsel %vm2257_vm2, -inf, %v6435_v41  ;;  %vm1541_vm5 = vcmp.eq.f32.partialorder %v6440_v2, %v4549_v38  ;;  %vm1549_vm2 = vcmp.eq.f32.partialorder %v4081_v5, %v4633_v56 }
 0x2b2   : > { %v2327_v62 = vsel %vm278_vm0, %v2289_v37, -inf  ;;  %v1573_v30 = vsel %vm1541_vm5, -inf, %v6440_v2  ;;  %v2286_v2 = vsel %vm2254_vm7, -inf, %v3973_v42  ;;  %v1571_v42 = vsel %vm1539_vm9, -inf, %v3991_v51 }
 0x2b3   : > { %924 = vmax.xlane.f32.xlu1 %v923_v52  ;;  %921 = vmax.xlane.f32.xlu0 %v920_v46  ;;  %v6438_v52 = vld [vmem:[#allocation130_spill] sm:$0xff]  ;;  %v1625_v28 = vsel %vm278_vm0, %v1573_v30, -inf  ;;  %v2318_v30 = vsel %vm278_vm0, %v2286_v2, -inf  ;;  %v1619_v2 = vsel %vm278_vm0, %v1571_v42, -inf  ;;  %v2292_v51 = vsel %vm2260_vm11, -inf, %v4009_v39 }
 0x2b4   : > { %v4664_v27 = vpop.xlane.xlu1 %2154  ;;  %v4669_v35 = vpop.xlane.xlu0 %2151  ;;  %vm1542_vm4 = vcmp.eq.f32.partialorder %v6438_v52, %v4544_v48  ;;  %v2336_v42 = vsel %vm278_vm0, %v2292_v51, -inf  ;;  %v2290_v39 = vsel %vm2258_vm13, -inf, %v4045_v31  ;;  %v1575_v31 = vsel %vm1543_vm15, -inf, %v4063_v7 }
 0x2b5   : > { %6436 = vst [vmem:[#allocation112_spill] sm:$0xff] %v4664_v27  ;;  %6437 = vst [vmem:[#allocation115_spill] sm:$0xff] %v4669_v35  ;;  %v1574_v41 = vsel %vm1542_vm4, -inf, %v6438_v52  ;;  %v2330_v51 = vsel %vm278_vm0, %v2290_v39, -inf  ;;  %v1631_v39 = vsel %vm278_vm0, %v1575_v31, -inf  ;;  %v1581_v7 = vsel %vm1549_vm2, -inf, %v4081_v5 }
 0x2b6   : > { %v1628_v37 = vsel %vm278_vm0, %v1574_v41, -inf  ;;  %vm2264_vm4 = vcmp.eq.f32.partialorder %v4099_v10, %v4645_v18  ;;  %v1649_v31 = vsel %vm278_vm0, %v1581_v7, -inf  ;;  %vm1548_vm5 = vcmp.eq.f32.partialorder %v4110_v11, %v4652_v33 }
 0x2b7   : > { %1611 = vmax.xlane.f32.xlu1 %v1610_v53  ;;  %1608 = vmax.xlane.f32.xlu0 %v1607_v1  ;;  %v6442_v53 = vld [vmem:[#allocation132_spill] sm:$0xff]  ;;  %v2296_v5 = vsel %vm2264_vm4, -inf, %v4099_v10  ;;  %vm2263_vm7 = vcmp.eq.f32.partialorder %v4128_v29, %v4664_v27 }
 0x2b8   : > { %v4676_v46 = vpop.xlane.xlu1 %1473  ;;  %v4681_v22 = vpop.xlane.xlu0 %1470  ;;  %vm2255_vm6 = vcmp.eq.f32.partialorder %v6442_v53, %v4556_v6  ;;  %v2348_v7 = vsel %vm278_vm0, %v2296_v5, -inf }
 0x2b9   : > { %6439 = vst [vmem:[#allocation116_spill] sm:$0xff] %v4676_v46  ;;  %6441 = vst [vmem:[#allocation113_spill] sm:$0xff] %v4681_v22  ;;  %v2287_v52 = vsel %vm2255_vm6, -inf, %v6442_v53  ;;  %v1572_v53 = vsel %vm1540_vm8, -inf, %v3984_v15  ;;  %v2293_v15 = vsel %vm2261_vm10, -inf, %v4002_v40  ;;  %v2291_v40 = vsel %vm2259_vm12, -inf, %v4038_v36 }
 0x2ba   : > { %v2321_v41 = vsel %vm278_vm0, %v2287_v52, -inf  ;;  %v1622_v52 = vsel %vm278_vm0, %v1572_v53, -inf  ;;  %v2339_v53 = vsel %vm278_vm0, %v2293_v15, -inf  ;;  %v2333_v15 = vsel %vm278_vm0, %v2291_v40, -inf }
 0x2bb   : > { %2328 = vmax.xlane.f32.xlu1 %v2327_v62  ;;  %2325 = vmax.xlane.f32.xlu0 %v2324_v20  ;;  %v1576_v36 = vsel %vm1544_vm14, -inf, %v4056_v24  ;;  %v1582_v24 = vsel %vm1550_vm1, -inf, %v4074_v25  ;;  %v2297_v25 = vsel %vm2265_vm3, -inf, %v4092_v47  ;;  %vm1547_vm6 = vcmp.eq.f32.partialorder %v4117_v63, %v4657_v55 }
 0x2bc   : > { %v4688_v1 = vpop.xlane.xlu1 %2172  ;;  %v4693_v38 = vpop.xlane.xlu0 %2169  ;;  %v1634_v40 = vsel %vm278_vm0, %v1576_v36, -inf  ;;  %v1652_v36 = vsel %vm278_vm0, %v1582_v24, -inf  ;;  %v2351_v24 = vsel %vm278_vm0, %v2297_v25, -inf  ;;  %v1580_v47 = vsel %vm1548_vm5, -inf, %v4110_v11 }
 0x2bd   : > { %6443 = vst [vmem:[#allocation114_spill] sm:$0xff] %v4688_v1  ;;  %6444 = vst [vmem:[#allocation119_spill] sm:$0xff] %v4693_v38  ;;  %v1579_v10 = vsel %vm1547_vm6, -inf, %v4117_v63  ;;  %vm2262_vm8 = vcmp.eq.f32.partialorder %v4135_v16, %v4669_v35  ;;  %v1646_v25 = vsel %vm278_vm0, %v1580_v47, -inf  ;;  %v2295_v11 = vsel %vm2263_vm7, -inf, %v4128_v29 }
 0x2be   : > { %v1643_v5 = vsel %vm278_vm0, %v1579_v10, -inf  ;;  %vm1554_vm9 = vcmp.eq.f32.partialorder %v4146_v9, %v4676_v46  ;;  %v2294_v63 = vsel %vm2262_vm8, -inf, %v4135_v16  ;;  %vm1553_vm10 = vcmp.eq.f32.partialorder %v4153_v61, %v4681_v22  ;;  %v6460_v46 = vld [vmem:[#allocation158_spill] sm:$0xff] }
 0x2bf   : > { %1629 = vmax.xlane.f32.xlu1 %v1628_v37  ;;  %1626 = vmax.xlane.f32.xlu0 %v1625_v28  ;;  %v2345_v47 = vsel %vm278_vm0, %v2295_v11, -inf  ;;  %v2342_v10 = vsel %vm278_vm0, %v2294_v63, -inf  ;;  %v1586_v29 = vsel %vm1554_vm9, -inf, %v4146_v9  ;;  %v1585_v16 = vsel %vm1553_vm10, -inf, %v4153_v61 }
 0x2c0   : > { %v4700_v62 = vpop.xlane.xlu1 %1467  ;;  %v4705_v20 = vpop.xlane.xlu0 %1464  ;;  %v1664_v11 = vsel %vm278_vm0, %v1586_v29, -inf  ;;  %v1661_v63 = vsel %vm278_vm0, %v1585_v16, -inf }
 0x2c1   : > { %6445 = vst [vmem:[#allocation120_spill] sm:$0xff] %v4700_v62  ;;  %6446 = vst [vmem:[#allocation117_spill] sm:$0xff] %v4705_v20  ;;  %vm1551_vm12 = vcmp.eq.f32.partialorder %v6460_v46, %v4705_v20 }
 0x2c2   : > { %v1583_v61 = vsel %vm1551_vm12, -inf, %v6460_v46 }
 0x2c3   : > { %2322 = vmax.xlane.f32.xlu1 %v2321_v41  ;;  %2319 = vmax.xlane.f32.xlu0 %v2318_v30  ;;  %v1655_v16 = vsel %vm278_vm0, %v1583_v61, -inf }
 0x2c4   : > { %v4712_v37 = vpop.xlane.xlu1 %2166  ;;  %v4717_v28 = vpop.xlane.xlu0 %2163 }
 0x2c5   : > { %6447 = vst [vmem:[#allocation118_spill] sm:$0xff] %v4712_v37  ;;  %6448 = vst [vmem:[#allocation121_spill] sm:$0xff] %v4717_v28 }
 0x2c7   : > { %1623 = vmax.xlane.f32.xlu1 %v1622_v52  ;;  %1620 = vmax.xlane.f32.xlu0 %v1619_v2 }
 0x2c8   : > { %v4724_v41 = vpop.xlane.xlu1 %2184  ;;  %v4729_v30 = vpop.xlane.xlu0 %2181 }
 0x2c9   : > { %6449 = vst [vmem:[#allocation122_spill] sm:$0xff] %v4724_v41  ;;  %6450 = vst [vmem:[#allocation123_spill] sm:$0xff] %v4729_v30 }
 0x2cb   : > { %2340 = vmax.xlane.f32.xlu1 %v2339_v53  ;;  %2337 = vmax.xlane.f32.xlu0 %v2336_v42 }
 0x2cc   : > { %v4736_v52 = vpop.xlane.xlu1 %1485  ;;  %v4741_v2 = vpop.xlane.xlu0 %1482 }
 0x2cd   : > { %6451 = vst [vmem:[#allocation124_spill] sm:$0xff] %v4736_v52  ;;  %6452 = vst [vmem:[#allocation125_spill] sm:$0xff] %v4741_v2 }
 0x2cf   : > { %2334 = vmax.xlane.f32.xlu1 %v2333_v15  ;;  %2331 = vmax.xlane.f32.xlu0 %v2330_v51 }
 0x2d0   : > { %v4748_v53 = vpop.xlane.xlu1 %2178  ;;  %v4753_v42 = vpop.xlane.xlu0 %2175 }
 0x2d1   : > { %6453 = vst [vmem:[#allocation126_spill] sm:$0xff] %v4748_v53  ;;  %6454 = vst [vmem:[#allocation127_spill] sm:$0xff] %v4753_v42 }
 0x2d3   : > { %1635 = vmax.xlane.f32.xlu1 %v1634_v40  ;;  %1632 = vmax.xlane.f32.xlu0 %v1631_v39 }
 0x2d4   : > { %v4760_v15 = vpop.xlane.xlu1 %1479  ;;  %v4765_v51 = vpop.xlane.xlu0 %1476 }
 0x2d7   : > { %1653 = vmax.xlane.f32.xlu1 %v1652_v36  ;;  %1650 = vmax.xlane.f32.xlu0 %v1649_v31 }
 0x2d8   : > { %v4772_v40 = vpop.xlane.xlu1 %2196  ;;  %v4777_v39 = vpop.xlane.xlu0 %2193 }
 0x2db   : > { %2352 = vmax.xlane.f32.xlu1 %v2351_v24  ;;  %2349 = vmax.xlane.f32.xlu0 %v2348_v7 }
 0x2dc   : > { %v4784_v36 = vpop.xlane.xlu1 %1497  ;;  %v4789_v31 = vpop.xlane.xlu0 %1494 }
 0x2dd   : > { %6455 = vst [vmem:[#allocation128_spill] sm:$0xff] %v4789_v31 }
 0x2df   : > { %1647 = vmax.xlane.f32.xlu1 %v1646_v25  ;;  %1644 = vmax.xlane.f32.xlu0 %v1643_v5  ;;  %v6458_v25 = vld [vmem:[#allocation156_spill] sm:$0xff] }
 0x2e0   : > { %v4796_v24 = vpop.xlane.xlu1 %2190  ;;  %v4801_v7 = vpop.xlane.xlu0 %2187  ;;  %vm1552_vm11 = vcmp.eq.f32.partialorder %v6458_v25, %v4700_v62  ;;  %v6464_v62 = vld [vmem:[#allocation160_spill] sm:$0xff] }
 0x2e1   : > { %6456 = vst [vmem:[#allocation129_spill] sm:$0xff] %v4796_v24  ;;  %6457 = vst [vmem:[#allocation130_spill] sm:$0xff] %v4801_v7  ;;  %v1584_v9 = vsel %vm1552_vm11, -inf, %v6458_v25  ;;  %vm2266_vm14 = vcmp.eq.f32.partialorder %v6464_v62, %v4717_v28  ;;  %vm1561_vm11 = vcmp.eq.f32.partialorder %v4315_v44, %v4789_v31 }
 0x2e2   : > { %v1658_v29 = vsel %vm278_vm0, %v1584_v9, -inf  ;;  %v2298_v46 = vsel %vm2266_vm14, -inf, %v6464_v62 }
 0x2e3   : > { %2346 = vmax.xlane.f32.xlu1 %v2345_v47  ;;  %2343 = vmax.xlane.f32.xlu0 %v2342_v10  ;;  %v6462_v47 = vld [vmem:[#allocation159_spill] sm:$0xff]  ;;  %v2354_v61 = vsel %vm278_vm0, %v2298_v46, -inf }
 0x2e4   : > { %v4808_v5 = vpop.xlane.xlu1 %1491  ;;  %v4813_v22 = vpop.xlane.xlu0 %1488  ;;  %vm2267_vm13 = vcmp.eq.f32.partialorder %v6462_v47, %v4712_v37  ;;  %v6468_v37 = vld [vmem:[#allocation49_spill] sm:$0xff] }
 0x2e5   : > { %6459 = vst [vmem:[#allocation131_spill] sm:$0xff] %v4808_v5  ;;  %6461 = vst [vmem:[#allocation132_spill] sm:$0xff] %v4813_v22  ;;  %v2299_v25 = vsel %vm2267_vm13, -inf, %v6462_v47  ;;  %vm2272_vm1 = vcmp.eq.f32.partialorder %v6468_v37, %v4729_v30  ;;  %vm2274_vm13 = vcmp.eq.f32.partialorder %v4333_v19, %v4801_v7  ;;  %v6540_v7 = vld [vmem:[#allocation181_spill] sm:$0xff] }
 0x2e6   : > { %v2357_v9 = vsel %vm278_vm0, %v2299_v25, -inf  ;;  %v2304_v62 = vsel %vm2272_vm1, -inf, %v6468_v37 }
 0x2e7   : > { %1665 = vmax.xlane.f32.xlu1 %v1664_v11  ;;  %1662 = vmax.xlane.f32.xlu0 %v1661_v63  ;;  %v6466_v11 = vld [vmem:[#allocation161_spill] sm:$0xff]  ;;  %v2372_v46 = vsel %vm278_vm0, %v2304_v62, -inf }
 0x2e8   : > { %v4820_v10 = vpop.xlane.xlu1 %2208  ;;  %v4825_v20 = vpop.xlane.xlu0 %2205  ;;  %vm2273_vm15 = vcmp.eq.f32.partialorder %v6466_v11, %v4724_v41  ;;  %v6472_v41 = vld [vmem:[#allocation48_spill] sm:$0xff] }
 0x2e9   : > { %6463 = vst [vmem:[#allocation156_spill] sm:$0xff] %v4820_v10  ;;  %6465 = vst [vmem:[#allocation158_spill] sm:$0xff] %v4825_v20  ;;  %v2305_v47 = vsel %vm2273_vm15, -inf, %v6466_v11  ;;  %vm1557_vm3 = vcmp.eq.f32.partialorder %v6472_v41, %v4741_v2 }
 0x2ea   : > { %v2375_v25 = vsel %vm278_vm0, %v2305_v47, -inf  ;;  %v1589_v37 = vsel %vm1557_vm3, -inf, %v6472_v41  ;;  %v6480_v41 = vld [vmem:[#allocation62_spill] sm:$0xff] }
 0x2eb   : > { %1659 = vmax.xlane.f32.xlu1 %v1658_v29  ;;  %1656 = vmax.xlane.f32.xlu0 %v1655_v16  ;;  %v6470_v29 = vld [vmem:[#allocation45_spill] sm:$0xff]  ;;  %v1673_v62 = vsel %vm278_vm0, %v1589_v37, -inf  ;;  %v778_v35 = vadd.f32 %v4229_v12, %v6480_v41  ;;  %v6484_v41 = vld [vmem:[#allocation63_spill] sm:$0xff] }
 0x2ec   : > { %v4832_v63 = vpop.xlane.xlu1 %2202  ;;  %v4837_v28 = vpop.xlane.xlu0 %2199  ;;  %vm1558_vm2 = vcmp.eq.f32.partialorder %v6470_v29, %v4736_v52  ;;  %v6476_v52 = vld [vmem:[#allocation50_spill] sm:$0xff] }
 0x2ed   : > { %6467 = vst [vmem:[#allocation159_spill] sm:$0xff] %v4832_v63  ;;  %6469 = vst [vmem:[#allocation160_spill] sm:$0xff] %v4837_v28  ;;  %v1590_v11 = vsel %vm1558_vm2, -inf, %v6470_v29  ;;  %vm2270_vm5 = vcmp.eq.f32.partialorder %v6476_v52, %v4753_v42 }
 0x2ee   : > { %v1676_v47 = vsel %vm278_vm0, %v1590_v11, -inf  ;;  %v2302_v27 = vsel %vm2270_vm5, -inf, %v6476_v52  ;;  %v6481_v11 = vld [vmem:[#allocation54_spill] sm:$0xff]  ;;  %v6483_v52 = vld [vmem:[#allocation51_spill] sm:$0xff] }
 0x2ef   : > { %2358 = vmax.xlane.f32.xlu1 %v2357_v9  ;;  %2355 = vmax.xlane.f32.xlu0 %v2354_v61  ;;  %v6474_v9 = vld [vmem:[#allocation44_spill] sm:$0xff]  ;;  %vm1555_vm7 = vcmp.eq.f32.partialorder %v6481_v11, %v4765_v51  ;;  %vm2277_vm8 = vcmp.eq.f32.partialorder %v6483_v52, %v4772_v40 }
 0x2f0   : > { %v4844_v16 = vpop.xlane.xlu1 %2220  ;;  %v4849_v30 = vpop.xlane.xlu0 %2217  ;;  %vm2271_vm4 = vcmp.eq.f32.partialorder %v6474_v9, %v4748_v53 }
 0x2f1   : > { %6471 = vst [vmem:[#allocation161_spill] sm:$0xff] %v4844_v16  ;;  %6473 = vst [vmem:[#allocation49_spill] sm:$0xff] %v4849_v30  ;;  %v2303_v53 = vsel %vm2271_vm4, -inf, %v6474_v9  ;;  %v2366_v9 = vsel %vm278_vm0, %v2302_v27, -inf }
 0x2f3   : > { %2376 = vmax.xlane.f32.xlu1 %v2375_v25  ;;  %2373 = vmax.xlane.f32.xlu0 %v2372_v46  ;;  %v6478_v25 = vld [vmem:[#allocation64_spill] sm:$0xff]  ;;  %v6479_v46 = vld [vmem:[#allocation47_spill] sm:$0xff] }
 0x2f4   : > { %v4856_v61 = vpop.xlane.xlu1 %2214  ;;  %v4861_v2 = vpop.xlane.xlu0 %2211  ;;  %v779_v29 = vadd.f32 %v4222_v3, %v6478_v25  ;;  %vm1556_vm6 = vcmp.eq.f32.partialorder %v6479_v46, %v4760_v15  ;;  %v2369_v3 = vsel %vm278_vm0, %v2303_v53, -inf  ;;  %v6485_v53 = vld [vmem:[#allocation162_spill] sm:$0xff] }
 0x2f5   : > { %6475 = vst [vmem:[#allocation45_spill] sm:$0xff] %v4856_v61  ;;  %6477 = vst [vmem:[#allocation48_spill] sm:$0xff] %v4861_v2  ;;  %v1588_v12 = vsel %vm1556_vm6, -inf, %v6479_v46  ;;  %vm2276_vm9 = vcmp.eq.f32.partialorder %v6485_v53, %v4777_v39 }
 0x2f7   : > { %1677 = vmax.xlane.f32.xlu1 %v1676_v47  ;;  %1674 = vmax.xlane.f32.xlu0 %v1673_v62  ;;  %v6482_v62 = vld [vmem:[#allocation66_spill] sm:$0xff] }
 0x2f8   : > { %v883_v42 = vpop.xlane.xlu1 %882  ;;  %v880_v37 = vpop.xlane.xlu0 %879  ;;  %v799_v25 = vadd.f32 %v4240_v17, %v6482_v62  ;;  %v1670_v17 = vsel %vm278_vm0, %v1588_v12, -inf }
 0x2f9   : > { %v4875_v47 = vadd.f32 %v883_v42, %v779_v29  ;;  %v4877_v55 = vadd.f32 %v880_v37, %v778_v35  ;;  %v798_v42 = vadd.f32 %v4247_v49, %v6484_v41  ;;  %v1587_v35 = vsel %vm1555_vm7, -inf, %v6481_v11  ;;  %v6487_v11 = vld [vmem:[#allocation163_spill] sm:$0xff]  ;;  %v6488_v41 = vld [vmem:[#allocation65_spill] sm:$0xff] }
 0x2fa   : > { %v1667_v46 = vsel %vm278_vm0, %v1587_v35, -inf  ;;  %v2309_v49 = vsel %vm2277_vm8, -inf, %v6483_v52  ;;  %vm1562_vm10 = vcmp.eq.f32.partialorder %v6487_v11, %v4784_v36 }
 0x2fb   : > { %2370 = vmax.xlane.f32.xlu1 %v2369_v3  ;;  %2367 = vmax.xlane.f32.xlu0 %v2366_v9  ;;  %v6486_v9 = vld [vmem:[#allocation69_spill] sm:$0xff] }
 0x2fc   : > { %v943_v29 = vpop.xlane.xlu1 %942  ;;  %v940_v27 = vpop.xlane.xlu0 %939  ;;  %v777_v62 = vadd.f32 %v4258_v60, %v6486_v9  ;;  %v2387_v60 = vsel %vm278_vm0, %v2309_v49, -inf  ;;  %v6491_v9 = vld [vmem:[#allocation67_spill] sm:$0xff] }
 0x2fd   : > { %v4891_v37 = vadd.f32 %v943_v29, %v799_v25  ;;  %v4893_v3 = vadd.f32 %v940_v27, %v798_v42  ;;  %v776_v25 = vadd.f32 %v4265_v14, %v6488_v41  ;;  %v2308_v42 = vsel %vm2276_vm9, -inf, %v6485_v53  ;;  %v6490_v53 = vld [vmem:[#allocation164_spill] sm:$0xff] }
 0x2fe   : > { %v2384_v52 = vsel %vm278_vm0, %v2308_v42, -inf  ;;  %v1594_v14 = vsel %vm1562_vm10, -inf, %v6487_v11  ;;  %vm2275_vm12 = vcmp.eq.f32.partialorder %v6490_v53, %v4796_v24 }
 0x2ff   : > { %1671 = vmax.xlane.f32.xlu1 %v1670_v17  ;;  %1668 = vmax.xlane.f32.xlu0 %v1667_v46  ;;  %v6489_v17 = vld [vmem:[#allocation68_spill] sm:$0xff] }
 0x300   : > { %v877_v29 = vpop.xlane.xlu1 %876  ;;  %v874_v12 = vpop.xlane.xlu0 %873  ;;  %v797_v46 = vadd.f32 %v4276_v34, %v6489_v17  ;;  %v1688_v34 = vsel %vm278_vm0, %v1594_v14, -inf  ;;  %v6495_v17 = vld [vmem:[#allocation71_spill] sm:$0xff] }
 0x301   : > { %v4907_v35 = vadd.f32 %v877_v29, %v777_v62  ;;  %v4909_v27 = vadd.f32 %v874_v12, %v776_v25  ;;  %v796_v62 = vadd.f32 %v4283_v13, %v6491_v9  ;;  %v1593_v25 = vsel %vm1561_vm11, -inf, %v4315_v44  ;;  %v6492_v12 = vld [vmem:[#allocation70_spill] sm:$0xff]  ;;  %v6494_v44 = vld [vmem:[#allocation165_spill] sm:$0xff]  ;;  %v6497_v14 = vld [vmem:[#allocation167_spill] sm:$0xff] }
 0x302   : > { %v1685_v11 = vsel %vm278_vm0, %v1593_v25, -inf  ;;  %v2307_v13 = vsel %vm2275_vm12, -inf, %v6490_v53  ;;  %vm1560_vm14 = vcmp.eq.f32.partialorder %v6494_v44, %v4808_v5  ;;  %v6496_v9 = vld [vmem:[#allocation53_spill] sm:$0xff]  ;;  %vm1559_vm15 = vcmp.eq.f32.partialorder %v6497_v14, %v4813_v22  ;;  %v6502_v22 = vld [vmem:[#allocation52_spill] sm:$0xff] }
 0x303   : > { %2388 = vmax.xlane.f32.xlu1 %v2387_v60  ;;  %2385 = vmax.xlane.f32.xlu0 %v2384_v52  ;;  %v6493_v60 = vld [vmem:[#allocation57_spill] sm:$0xff]  ;;  %v2381_v53 = vsel %vm278_vm0, %v2307_v13, -inf  ;;  %v6503_v13 = vld [vmem:[#allocation170_spill] sm:$0xff] }
 0x304   : > { %v937_v41 = vpop.xlane.xlu1 %936  ;;  %v934_v49 = vpop.xlane.xlu0 %933  ;;  %v783_v52 = vadd.f32 %v6493_v60, %v6492_v12  ;;  %v6499_v60 = vld [vmem:[#allocation56_spill] sm:$0xff]  ;;  %vm2280_vm2 = vcmp.eq.f32.partialorder %v6503_v13, %v4825_v20  ;;  %v6508_v20 = vld [vmem:[#allocation55_spill] sm:$0xff] }
 0x305   : > { %v4923_v29 = vadd.f32 %v937_v41, %v797_v46  ;;  %v4925_v42 = vadd.f32 %v934_v49, %v796_v62  ;;  %v782_v46 = vadd.f32 %v6496_v9, %v6495_v17  ;;  %v2306_v62 = vsel %vm2274_vm13, -inf, %v4333_v19  ;;  %v6500_v19 = vld [vmem:[#allocation168_spill] sm:$0xff]  ;;  %v6501_v9 = vld [vmem:[#allocation73_spill] sm:$0xff] }
 0x306   : > { %v2378_v12 = vsel %vm278_vm0, %v2306_v62, -inf  ;;  %v1592_v17 = vsel %vm1560_vm14, -inf, %v6494_v44  ;;  %vm2281_vm1 = vcmp.eq.f32.partialorder %v6500_v19, %v4820_v10 }
 0x307   : > { %1689 = vmax.xlane.f32.xlu1 %v1688_v34  ;;  %1686 = vmax.xlane.f32.xlu0 %v1685_v11  ;;  %v6498_v11 = vld [vmem:[#allocation72_spill] sm:$0xff]  ;;  %v1682_v44 = vsel %vm278_vm0, %v1592_v17, -inf  ;;  %v6509_v17 = vld [vmem:[#allocation173_spill] sm:$0xff] }
 0x308   : > { %v895_v41 = vpop.xlane.xlu1 %894  ;;  %v892_v25 = vpop.xlane.xlu0 %891  ;;  %v803_v5 = vadd.f32 %v6499_v60, %v6498_v11  ;;  %v6505_v60 = vld [vmem:[#allocation58_spill] sm:$0xff]  ;;  %vm2278_vm4 = vcmp.eq.f32.partialorder %v6509_v17, %v4837_v28  ;;  %v6514_v28 = vld [vmem:[#allocation59_spill] sm:$0xff] }
 0x309   : > { %v4939_v49 = vadd.f32 %v895_v41, %v783_v52  ;;  %v4941_v34 = vadd.f32 %v892_v25, %v782_v46  ;;  %v802_v52 = vadd.f32 %v6502_v22, %v6501_v9  ;;  %v1591_v46 = vsel %vm1559_vm15, -inf, %v6497_v14  ;;  %v6506_v14 = vld [vmem:[#allocation171_spill] sm:$0xff] }
 0x30a   : > { %v1679_v11 = vsel %vm278_vm0, %v1591_v46, -inf  ;;  %v2313_v22 = vsel %vm2281_vm1, -inf, %v6500_v19  ;;  %vm2279_vm3 = vcmp.eq.f32.partialorder %v6506_v14, %v4832_v63  ;;  %v6507_v9 = vld [vmem:[#allocation75_spill] sm:$0xff] }
 0x30b   : > { %2382 = vmax.xlane.f32.xlu1 %v2381_v53  ;;  %2379 = vmax.xlane.f32.xlu0 %v2378_v12  ;;  %v6504_v12 = vld [vmem:[#allocation74_spill] sm:$0xff]  ;;  %v2399_v19 = vsel %vm278_vm0, %v2313_v22, -inf }
 0x30c   : > { %v955_v41 = vpop.xlane.xlu1 %954  ;;  %v952_v62 = vpop.xlane.xlu0 %951  ;;  %v781_v10 = vadd.f32 %v6505_v60, %v6504_v12  ;;  %v6511_v60 = vld [vmem:[#allocation166_spill] sm:$0xff] }
 0x30d   : > { %v4955_v25 = vadd.f32 %v955_v41, %v803_v5  ;;  %v4957_v53 = vadd.f32 %v952_v62, %v802_v52  ;;  %v780_v5 = vadd.f32 %v6508_v20, %v6507_v9  ;;  %v2312_v52 = vsel %vm2280_vm2, -inf, %v6503_v13  ;;  %v6512_v13 = vld [vmem:[#allocation136_spill] sm:$0xff]  ;;  %v6513_v9 = vld [vmem:[#allocation77_spill] sm:$0xff]  ;;  %v6515_v22 = vld [vmem:[#allocation138_spill] sm:$0xff] }
 0x30e   : > { %v2396_v12 = vsel %vm278_vm0, %v2312_v52, -inf  ;;  %v2311_v20 = vsel %vm2279_vm3, -inf, %v6506_v14  ;;  %vm1546_vm5 = vcmp.eq.f32.partialorder %v6512_v13, %v4592_v4  ;;  %vm1545_vm6 = vcmp.eq.f32.partialorder %v6515_v22, %v4597_v43  ;;  %v6520_v43 = vld [vmem:[#allocation60_spill] sm:$0xff] }
 0x30f   : > { %1683 = vmax.xlane.f32.xlu1 %v1682_v44  ;;  %1680 = vmax.xlane.f32.xlu0 %v1679_v11  ;;  %v6510_v11 = vld [vmem:[#allocation76_spill] sm:$0xff]  ;;  %v2393_v14 = vsel %vm278_vm0, %v2311_v20, -inf }
 0x310   : > { %v889_v41 = vpop.xlane.xlu1 %888  ;;  %v886_v46 = vpop.xlane.xlu0 %885  ;;  %v801_v63 = vadd.f32 %v6511_v60, %v6510_v11  ;;  %v6517_v60 = vld [vmem:[#allocation169_spill] sm:$0xff]  ;;  %v6521_v20 = vld [vmem:[#allocation180_spill] sm:$0xff] }
 0x311   : > { %v4971_v62 = vadd.f32 %v889_v41, %v781_v10  ;;  %v4973_v44 = vadd.f32 %v886_v46, %v780_v5  ;;  %v800_v10 = vadd.f32 %v6514_v28, %v6513_v9  ;;  %v2310_v5 = vsel %vm2278_vm4, -inf, %v6509_v17  ;;  %v6518_v17 = vld [vmem:[#allocation178_spill] sm:$0xff]  ;;  %v6519_v9 = vld [vmem:[#allocation79_spill] sm:$0xff] }
 0x312   : > { %v2390_v11 = vsel %vm278_vm0, %v2310_v5, -inf  ;;  %v1578_v28 = vsel %vm1546_vm5, -inf, %v6512_v13  ;;  %vm2283_vm7 = vcmp.eq.f32.partialorder %v6518_v17, %v4856_v61  ;;  %vm2282_vm8 = vcmp.eq.f32.partialorder %v6521_v20, %v4861_v2  ;;  %v6526_v2 = vld [vmem:[#allocation61_spill] sm:$0xff] }
 0x313   : > { %2400 = vmax.xlane.f32.xlu1 %v2399_v19  ;;  %2397 = vmax.xlane.f32.xlu0 %v2396_v12  ;;  %v6516_v12 = vld [vmem:[#allocation78_spill] sm:$0xff]  ;;  %v1640_v13 = vsel %vm278_vm0, %v1578_v28, -inf  ;;  %v6527_v28 = vld [vmem:[#allocation176_spill] sm:$0xff] }
 0x314   : > { %v949_v41 = vpop.xlane.xlu1 %948  ;;  %v946_v52 = vpop.xlane.xlu0 %945  ;;  %v787_v4 = vadd.f32 %v6517_v60, %v6516_v12  ;;  %v6523_v60 = vld [vmem:[#allocation172_spill] sm:$0xff]  ;;  %vm2284_vm10 = vcmp.eq.f32.partialorder %v6527_v28, %v4849_v30  ;;  %v6533_v30 = vld [vmem:[#allocation83_spill] sm:$0xff] }
 0x315   : > { %v4987_v46 = vadd.f32 %v949_v41, %v801_v63  ;;  %v4989_v19 = vadd.f32 %v946_v52, %v800_v10  ;;  %v786_v63 = vadd.f32 %v6520_v43, %v6519_v9  ;;  %v1577_v10 = vsel %vm1545_vm6, -inf, %v6515_v22  ;;  %v6524_v22 = vld [vmem:[#allocation174_spill] sm:$0xff]  ;;  %v6525_v9 = vld [vmem:[#allocation81_spill] sm:$0xff] }
 0x316   : > { %v1637_v12 = vsel %vm278_vm0, %v1577_v10, -inf  ;;  %v2315_v43 = vsel %vm2283_vm7, -inf, %v6518_v17  ;;  %vm2285_vm9 = vcmp.eq.f32.partialorder %v6524_v22, %v4844_v16  ;;  %v6531_v16 = vld [vmem:[#allocation175_spill] sm:$0xff] }
 0x317   : > { %2394 = vmax.xlane.f32.xlu1 %v2393_v14  ;;  %2391 = vmax.xlane.f32.xlu0 %v2390_v11  ;;  %v6522_v11 = vld [vmem:[#allocation80_spill] sm:$0xff]  ;;  %v2405_v17 = vsel %vm278_vm0, %v2315_v43, -inf  ;;  %v6535_v43 = vld [vmem:[#allocation155_spill] sm:$0xff] }
 0x318   : > { %v907_v41 = vpop.xlane.xlu1 %906  ;;  %v904_v5 = vpop.xlane.xlu0 %903  ;;  %v807_v61 = vadd.f32 %v6523_v60, %v6522_v11  ;;  %vm2268_vm12 = vcmp.eq.f32.partialorder %v6535_v43, %v4693_v38  ;;  %v6539_v38 = vld [vmem:[#allocation85_spill] sm:$0xff] }
 0x319   : > { %v5003_v52 = vadd.f32 %v907_v41, %v787_v4  ;;  %v5005_v14 = vadd.f32 %v904_v5, %v786_v63  ;;  %v806_v4 = vadd.f32 %v6526_v2, %v6525_v9  ;;  %v2314_v63 = vsel %vm2282_vm8, -inf, %v6521_v20  ;;  %v6532_v20 = vld [vmem:[#allocation153_spill] sm:$0xff] }
 0x31a   : > { %v2402_v60 = vsel %vm278_vm0, %v2314_v63, -inf  ;;  %v2317_v9 = vsel %vm2285_vm9, -inf, %v6524_v22  ;;  %vm2269_vm11 = vcmp.eq.f32.partialorder %v6532_v20, %v4688_v1  ;;  %v6536_v22 = vlaneseq }
 0x31b   : > { %1641 = vmax.xlane.f32.xlu1 %v1640_v13  ;;  %1638 = vmax.xlane.f32.xlu0 %v1637_v12  ;;  %v6530_v12 = vld [vmem:[#allocation82_spill] sm:$0xff] }
 0x31c   : > { %v967_v41 = vpop.xlane.xlu1 %966  ;;  %v964_v10 = vpop.xlane.xlu0 %963  ;;  %v785_v2 = vadd.f32 %v6531_v16, %v6530_v12  ;;  %v2411_v16 = vsel %vm278_vm0, %v2317_v9, -inf  ;;  %v5041_v12 = vand.u32 127, %v6536_v22 }
 0x31d   : > { %v5019_v5 = vadd.f32 %v967_v41, %v807_v61  ;;  %v5021_v13 = vadd.f32 %v964_v10, %v806_v4  ;;  %v6534_v61 = vld [vmem:[#allocation177_spill] sm:$0xff]  ;;  %v2316_v10 = vsel %vm2284_vm10, -inf, %v6527_v28  ;;  %v2301_v28 = vsel %vm2269_vm11, -inf, %v6532_v20  ;;  %v6543_v20 = vld [vmem:[#allocation91_spill] sm:$0xff] }
 0x31e   : > { %v784_v41 = vadd.f32 %v6534_v61, %v6533_v30  ;;  %v6537_v30 = vld [vmem:[#allocation84_spill] sm:$0xff]  ;;  %v6538_v61 = vld [vmem:[#allocation179_spill] sm:$0xff]  ;;  %vm1000_vm13 = vcmp.eq.s32.totalorder %v5041_v12, 0  ;;  %vm1723_vm14 = vcmp.eq.s32.totalorder %v5041_v12, 1  ;;  %vm2446_vm8 = vcmp.eq.s32.totalorder %v5041_v12, 2 }
 0x31f   : > { %6528 = vst [vmem:[#allocation44_spill] sm:$0xff] %v5019_v5  ;;  %6529 = vst [vmem:[#allocation50_spill] sm:$0xff] %v5021_v13  ;;  %2406 = vmax.xlane.f32.xlu1 %v2405_v17  ;;  %2403 = vmax.xlane.f32.xlu0 %v2402_v60  ;;  %v2408_v60 = vsel %vm278_vm0, %v2316_v10, -inf  ;;  %v805_v1 = vadd.f32 %v6538_v61, %v6537_v30  ;;  %v2363_v10 = vsel %vm278_vm0, %v2301_v28, -inf  ;;  %v1004_v28 = vsel %vm1000_vm13, %v4875_v47, 0.0 }
 0x320   : > { %v901_v4 = vpop.xlane.xlu1 %900  ;;  %v898_v63 = vpop.xlane.xlu0 %897 }
 0x321   : > { %v5035_v17 = vadd.f32 %v901_v4, %v785_v2  ;;  %v5037_v11 = vadd.f32 %v898_v63, %v784_v41  ;;  %v804_v2 = vadd.f32 %v6540_v7, %v6539_v38  ;;  %v2300_v41 = vsel %vm2268_vm12, -inf, %v6535_v43  ;;  %v6545_v38 = vld [vmem:[#allocation86_spill] sm:$0xff]  ;;  %v6546_v7 = vld [vmem:[#allocation185_spill] sm:$0xff] }
 0x322   : > { %v1501_v61 = vadd.f32 %v6546_v7, %v6545_v38  ;;  %v6550_v38 = vld [vmem:[#allocation183_spill] sm:$0xff]  ;;  %vm2584_vm12 = vcmask 23552  }
 0x323   : > { %2412 = vmax.xlane.f32.xlu1 %v2411_v16  ;;  %2409 = vmax.xlane.f32.xlu0 %v2408_v60  ;;  %v2360_v16 = vsel %vm278_vm0, %v2300_v41, -inf  ;;  %v6544_v60 = vld [vmem:[#allocation184_spill] sm:$0xff]  ;;  %v1003_v41 = vsel %vm1000_vm13, %v4877_v55, 0.0  ;;  %v6553_v55 = vld [vmem:[#allocation95_spill] sm:$0xff] }
 0x324   : > { %v961_v4 = vpop.xlane.xlu1 %960  ;;  %v958_v63 = vpop.xlane.xlu0 %957  ;;  %v1502_v30 = vadd.f32 %v6544_v60, %v6543_v20 }
 0x325   : > { %v5050_v9 = vadd.f32 %v961_v4, %v805_v1  ;;  %v5052_v24 = vadd.f32 %v958_v63, %v804_v2 }
 0x327   : > { %6541 = vst [vmem:[#allocation64_spill] sm:$0xff] %v5050_v9  ;;  %6542 = vst [vmem:[#allocation47_spill] sm:$0xff] %v5052_v24  ;;  %2364 = vmax.xlane.f32.xlu1 %v2363_v10  ;;  %2361 = vmax.xlane.f32.xlu0 %v2360_v16  ;;  %v6547_v10 = vld [vmem:[#allocation90_spill] sm:$0xff]  ;;  %v6554_v24 = vld [vmem:[#allocation96_spill] sm:$0xff] }
 0x328   : > { %v1606_v1 = vpop.xlane.xlu1 %1605  ;;  %v1603_v43 = vpop.xlane.xlu0 %1602  ;;  %v6548_v16 = vld [vmem:[#allocation182_spill] sm:$0xff] }
 0x329   : > { %v1694_v2 = vadd.f32 %v1606_v1, %v1502_v30  ;;  %v1693_v4 = vadd.f32 %v1603_v43, %v1501_v61  ;;  %v791_v20 = vadd.f32 %v6548_v16, %v6547_v10  ;;  %v6549_v30 = vld [vmem:[#allocation87_spill] sm:$0xff]  ;;  %v6556_v9 = vld [vmem:[#allocation98_spill] sm:$0xff] }
 0x32a   : > { %v790_v7 = vadd.f32 %v6550_v38, %v6549_v30  ;;  %v6558_v38 = vld [vmem:[#allocation92_spill] sm:$0xff] }
 0x32b   : > { %v5070_v63 = vsel %vm1723_vm14, %v1694_v2, %v1004_v28  ;;  %v5076_v60 = vsel %vm1723_vm14, %v1693_v4, %v1003_v41  ;;  %v1500_v2 = vadd.f32 %v6554_v24, %v6553_v55  ;;  %v6555_v28 = vld [vmem:[#allocation88_spill] sm:$0xff]  ;;  %v1002_v4 = vsel %vm1000_vm13, %v4907_v35, 0.0  ;;  %v6557_v24 = vld [vmem:[#allocation93_spill] sm:$0xff] }
 0x32c   : > { %v919_v47 = vpop.xlane.xlu1 %918  ;;  %v916_v61 = vpop.xlane.xlu0 %915  ;;  %v1499_v13 = vadd.f32 %v6556_v9, %v6555_v28 }
 0x32d   : > { %v5080_v1 = vadd.f32 %v919_v47, %v791_v20  ;;  %v5082_v43 = vadd.f32 %v916_v61, %v790_v7  ;;  %v1001_v20 = vsel %vm1000_vm13, %v4909_v27, 0.0  ;;  %v789_v7 = vadd.f32 %v6558_v38, %v6557_v24  ;;  %v6559_v47 = vld [vmem:[#allocation89_spill] sm:$0xff]  ;;  %v6560_v61 = vld [vmem:[#allocation94_spill] sm:$0xff]  ;;  %v6563_v24 = vld [vmem:[#allocation3_spill] sm:$0xff] }
 0x32e   : > { %v788_v55 = vadd.f32 %v6560_v61, %v6559_v47  ;;  %v2481_v27 = vshrl.u32 %v6536_v22, 7  ;;  %v6564_v38 = vld [vmem:[#allocation100_spill] sm:$0xff]  ;;  %v2479_v47 = vadd.s32 128, %v5041_v12 }
 0x32f   : > { %6551 = vst [vmem:[#allocation62_spill] sm:$0xff] %v5080_v1  ;;  %6552 = vst [vmem:[#allocation54_spill] sm:$0xff] %v5082_v43  ;;  %v794_v43 = vadd.f32 %v6564_v38, %v6563_v24 }
 0x330   : > { %v1600_v10 = vpop.xlane.xlu1 %1599  ;;  %v1597_v16 = vpop.xlane.xlu0 %1596  ;;  %v2483_v61 = vmul.u32 16, %v2481_v27  ;;  %v5120_v22 = vadd.s32 8, %v2481_v27 }
 0x331   : > { %v1692_v5 = vadd.f32 %v1600_v10, %v1500_v2  ;;  %v1691_v41 = vadd.f32 %v1597_v16, %v1499_v13  ;;  %v6562_v10 = vld [vmem:[#allocation99_spill] sm:$0xff] }
 0x332   : > { %vm5125_vm0 = vcmp.ge.s32.totalorder %v5041_v12, %v2483_v61  ;;  %vm2486_vm15 = vcmp.ge.s32.totalorder %v2479_v47, %v2483_v61  ;;  %v1008_v61 = vsel %vm1000_vm13, %v4939_v49, 0.0  ;;  %v6579_v49 = vmov 0 }
 0x333   : > { %v5096_v30 = vsel %vm1723_vm14, %v1692_v5, %v1002_v4  ;;  %v5102_v9 = vsel %vm1723_vm14, %v1691_v41, %v1001_v20  ;;  %v6561_v5 = vld [vmem:[#allocation6_spill] sm:$0xff]  ;;  %v2489_v4 = vadd.s32 1, %v2481_v27  ;;  %v5141_v27 = vadd.s32 1, %v5120_v22 }
 0x334   : > { %v913_v35 = vpop.xlane.xlu1 %912  ;;  %v910_v13 = vpop.xlane.xlu0 %909  ;;  %v795_v16 = vadd.f32 %v6562_v10, %v6561_v5  ;;  %v6567_v5 = vmov 0  ;;  %v6570_v10 = vmov 0 }
 0x335   : > { %v5106_v2 = vadd.f32 %v913_v35, %v789_v7  ;;  %v5109_v28 = vadd.f32 %v910_v13, %v788_v55  ;;  %v2491_v7 = vmul.u32 16, %v2489_v4  ;;  %v6565_v55 = vld [vmem:[#allocation4_spill] sm:$0xff]  ;;  %v6566_v13 = vld [vmem:[#allocation101_spill] sm:$0xff]  ;;  %v6568_v5 = vsel %vm5125_vm0, 4294967295, %v6567_v5  ;;  %v6574_v4 = vld [vmem:[#allocation102_spill] sm:$0xff]  ;;  %6575 = vst [vmem:[#allocation63_spill] sm:$0xff] %v5141_v27 }
 0x336   : > { %v1506_v31 = vadd.f32 %v6566_v13, %v6565_v55  ;;  %6569 = vst [vmem:[#allocation66_spill] sm:$0xff] %v6568_v5  ;;  %v6074_v13 = vmov 1.0  }
 0x337   : > { %vm5130_vm1 = vcmp.lt.s32.totalorder %v5041_v12, %v2491_v7  ;;  %vm2494_vm2 = vcmp.lt.s32.totalorder %v2479_v47, %v2491_v7 }
 0x338   : > { %v931_v41 = vpop.xlane.xlu1 %930  ;;  %v928_v20 = vpop.xlane.xlu0 %927  ;;  %v6571_v10 = vsel %vm5130_vm1, 4294967295, %v6570_v10  ;;  %vm2497_vm3 = vmand %vm5125_vm0, %vm5130_vm1 }
 0x339   : > { %v5115_v1 = vadd.f32 %v931_v41, %v795_v16  ;;  %v5118_v35 = vadd.f32 %v928_v20, %v794_v43  ;;  %6572 = vst [vmem:[#allocation51_spill] sm:$0xff] %v6571_v10  ;;  %v6573_v16 = vld [vmem:[#allocation97_spill] sm:$0xff]  ;;  %vm2498_vm4 = vmand %vm2486_vm15, %vm2494_vm2  ;;  %v6578_v10 = vmul.u32 16, %v5120_v22 }
 0x33a   : > { %v1505_v43 = vadd.f32 %v6574_v4, %v6573_v16  ;;  %2734 = vmatprep.mubr.msk.f32.mxu1 %vm2498_vm4, %v6074_v13  ;;  %v1007_v16 = vsel %vm1000_vm13, %v4941_v34, 0.0  ;;  %v6576_v4 = vld [vmem:[#allocation10_spill] sm:$0xff]  ;;  %v6583_v13 = vld [vmem:[#allocation104_spill] sm:$0xff] }
 0x33b   : > { %vm5160_vm5 = vcmp.ge.s32.totalorder %v2479_v47, %v6578_v10 }
 0x33c   : > { %v1618_v24 = vpop.xlane.xlu1 %1617  ;;  %v1615_v38 = vpop.xlane.xlu0 %1614  ;;  %v6580_v49 = vsel %vm5160_vm5, 4294967295, %v6579_v49 }
 0x33d   : > { %v1698_v41 = vadd.f32 %v1618_v24, %v1506_v31  ;;  %v1697_v55 = vadd.f32 %v1615_v38, %v1505_v43  ;;  %v6577_v24 = vld [vmem:[#allocation103_spill] sm:$0xff]  ;;  %6581 = vst [vmem:[#allocation162_spill] sm:$0xff] %v6580_v49  ;;  %v6582_v38 = vld [vmem:[#allocation2_spill] sm:$0xff] }
 0x33e   : > { %v793_v20 = vadd.f32 %v6577_v24, %v6576_v4  ;;  %v792_v34 = vadd.f32 %v6583_v13, %v6582_v38  ;;  %v6590_v38 = vld [vmem:[#allocation105_spill] sm:$0xff] }
 0x33f   : > { %v5154_v31 = vsel %vm1723_vm14, %v1698_v41, %v1008_v61  ;;  %v5166_v43 = vsel %vm1723_vm14, %v1697_v55, %v1007_v16  ;;  %v6584_v41 = vmul.u32 16, %v5141_v27  ;;  %v6585_v61 = vmov 0  ;;  %v6588_v55 = vld [vmem:[#allocation7_spill] sm:$0xff]  ;;  %v6589_v16 = vld [vmem:[#allocation5_spill] sm:$0xff] }
 0x340   : > { %v925_v7 = vpop.xlane.xlu1 %924  ;;  %v922_v4 = vpop.xlane.xlu0 %921  ;;  %v1504_v13 = vadd.f32 %v4520_v8, %v6588_v55  ;;  %v1503_v5 = vadd.f32 %v6590_v38, %v6589_v16  ;;  %v6592_v8 = vld [vmem:[#allocation106_spill] sm:$0xff]  ;;  %v6593_v38 = vld [vmem:[#allocation13_spill] sm:$0xff] }
 0x341   : > { %vm5172_vm6 = vcmp.lt.s32.totalorder %v2479_v47, %v6584_v41  ;;  %v5176_v24 = vadd.f32 %v925_v7, %v793_v20  ;;  %v5182_v10 = vadd.f32 %v922_v4, %v792_v34  ;;  %v1006_v20 = vsel %vm1000_vm13, %v4971_v62, 0.0  ;;  %v6591_v4 = vld [vmem:[#allocation9_spill] sm:$0xff] }
 0x342   : > { %v6586_v61 = vsel %vm5172_vm6, 4294967295, %v6585_v61  ;;  %vm2500_vm7 = vmand %vm5160_vm5, %vm5172_vm6  ;;  %v2225_v55 = vadd.f32 %v6592_v8, %v6591_v4  ;;  %v6597_v4 = vld [vmem:[#allocation108_spill] sm:$0xff] }
 0x343   : > { %6587 = vst [vmem:[#allocation69_spill] sm:$0xff] %v6586_v61  ;;  %v1005_v61 = vsel %vm1000_vm13, %v4973_v44, 0.0 }
 0x344   : > { %v1612_v47 = vpop.xlane.xlu1 %1611  ;;  %v1609_v41 = vpop.xlane.xlu0 %1608 }
 0x345   : > { %v1696_v27 = vadd.f32 %v1612_v47, %v1504_v13  ;;  %v1695_v7 = vadd.f32 %v1609_v41, %v1503_v5  ;;  %v6594_v13 = vld [vmem:[#allocation107_spill] sm:$0xff] }
 0x346   : > { %v2224_v47 = vadd.f32 %v6594_v13, %v6593_v38 }
 0x347   : > { %v1729_v34 = vsel %vm1723_vm14, %v1696_v27, %v1006_v20  ;;  %v1728_v16 = vsel %vm1723_vm14, %v1695_v7, %v1005_v61  ;;  %v6595_v27 = vld [vmem:[#allocation8_spill] sm:$0xff] }
 0x348   : > { %v2329_v62 = vpop.xlane.xlu1 %2328  ;;  %v2326_v5 = vpop.xlane.xlu0 %2325  ;;  %v1510_v20 = vadd.f32 %v4544_v48, %v6595_v27  ;;  %v6596_v7 = vld [vmem:[#allocation12_spill] sm:$0xff]  ;;  %v1011_v48 = vsel %vm1000_vm13, %v5005_v14, 0.0  ;;  %v6599_v27 = vld [vmem:[#allocation14_spill] sm:$0xff] }
 0x349   : > { %v2417_v41 = vadd.f32 %v2329_v62, %v2225_v55  ;;  %v2416_v49 = vadd.f32 %v2326_v5, %v2224_v47  ;;  %v1509_v8 = vadd.f32 %v6597_v4, %v6596_v7 }
 0x34b   : > { %v5206_v44 = vsel %vm2446_vm8, %v2417_v41, %v5070_v63  ;;  %v5213_v61 = vsel %vm2446_vm8, %v2416_v49, %v5076_v60  ;;  %v1012_v63 = vsel %vm1000_vm13, %v5003_v52, 0.0  ;;  %v6598_v49 = vld [vmem:[#allocation11_spill] sm:$0xff] }
 0x34c   : > { %v1630_v38 = vpop.xlane.xlu1 %1629  ;;  %v2946_v55 = vpack.c.bf16 %v5206_v44, %v5213_v61  ;;  %v1627_v13 = vpop.xlane.xlu0 %1626  ;;  %v2223_v5 = vadd.f32 %v4556_v6, %v6598_v49 }
 0x34d   : > { %v1702_v47 = vadd.f32 %v1630_v38, %v1510_v20  ;;  %v1701_v62 = vadd.f32 %v1627_v13, %v1509_v8  ;;  %v2222_v20 = vadd.f32 %v4561_v54, %v6599_v27  ;;  %v6600_v38 = vld [vmem:[#allocation15_spill] sm:$0xff] }
 0x34e   : > { %v1508_v13 = vadd.f32 %v4568_v59, %v6600_v38  ;;  %v1009_v59 = vsel %vm1000_vm13, %v5037_v11, 0.0 }
 0x34f   : > { %v5227_v60 = vsel %vm1723_vm14, %v1702_v47, %v1012_v63  ;;  %v5233_v41 = vsel %vm1723_vm14, %v1701_v62, %v1011_v48  ;;  %v6601_v47 = vld [vmem:[#allocation19_spill] sm:$0xff] }
 0x350   : > { %v2323_v52 = vpop.xlane.xlu1 %2322  ;;  %v2320_v7 = vpop.xlane.xlu0 %2319  ;;  %v1507_v54 = vadd.f32 %v4573_v26, %v6601_v47  ;;  %v6602_v26 = vld [vmem:[#allocation16_spill] sm:$0xff] }
 0x351   : > { %v2415_v4 = vadd.f32 %v2323_v52, %v2223_v5  ;;  %v2414_v8 = vadd.f32 %v2320_v7, %v2222_v20  ;;  %v2229_v27 = vadd.f32 %v4580_v57, %v6602_v26  ;;  %v6603_v52 = vld [vmem:[#allocation20_spill] sm:$0xff]  ;;  %v6607_v26 = vld [vmem:[#allocation27_spill] sm:$0xff] }
 0x352   : > { %v2228_v7 = vadd.f32 %v4585_v21, %v6603_v52 }
 0x353   : > { %v5240_v14 = vsel %vm2446_vm8, %v2415_v4, %v5096_v30  ;;  %v5247_v6 = vsel %vm2446_vm8, %v2414_v8, %v5102_v9  ;;  %v1010_v30 = vsel %vm1000_vm13, %v5035_v17, 0.0 }
 0x354   : > { %v1624_v63 = vpop.xlane.xlu1 %1623  ;;  %v2942_v62 = vpack.c.bf16 %v5240_v14, %v5247_v6  ;;  %v1621_v48 = vpop.xlane.xlu0 %1620  ;;  %v6648_v14 = vld [vmem:[#allocation146_spill] sm:$0xff]  ;;  %v6649_v6 = vld [vmem:[#allocation128_spill] sm:$0xff] }
 0x355   : > { %v1700_v49 = vadd.f32 %v1624_v63, %v1508_v13  ;;  %v1699_v5 = vadd.f32 %v1621_v48, %v1507_v54  ;;  %v6604_v13 = vld [vmem:[#allocation18_spill] sm:$0xff] }
 0x356   : > { %v2227_v47 = vadd.f32 %v4604_v50, %v6604_v13  ;;  %v6605_v54 = vld [vmem:[#allocation22_spill] sm:$0xff]  ;;  %v6606_v50 = vld [vmem:[#allocation23_spill] sm:$0xff]  ;;  %v6609_v13 = vld [vmem:[#allocation28_spill] sm:$0xff] }
 0x357   : > { %v5261_v9 = vsel %vm1723_vm14, %v1700_v49, %v1010_v30  ;;  %v5267_v20 = vsel %vm1723_vm14, %v1699_v5, %v1009_v59  ;;  %v2226_v21 = vadd.f32 %v4609_v58, %v6605_v54  ;;  %v1512_v59 = vadd.f32 %v4616_v45, %v6606_v50  ;;  %v6611_v50 = vld [vmem:[#allocation29_spill] sm:$0xff] }
 0x358   : > { %v2341_v17 = vpop.xlane.xlu1 %2340  ;;  %v2338_v4 = vpop.xlane.xlu0 %2337  ;;  %v1511_v58 = vadd.f32 %v4621_v23, %v6607_v26  ;;  %v1013_v45 = vsel %vm1000_vm13, %v5109_v28, 0.0  ;;  %v6608_v23 = vld [vmem:[#allocation24_spill] sm:$0xff]  ;;  %v1020_v28 = vsel %vm1000_vm13, %v5115_v1, 0.0 }
 0x359   : > { %v2421_v8 = vadd.f32 %v2341_v17, %v2229_v27  ;;  %v2420_v38 = vadd.f32 %v2338_v4, %v2228_v7 }
 0x35b   : > { %v5274_v11 = vsel %vm2446_vm8, %v2421_v8, %v5154_v31  ;;  %v5281_v57 = vsel %vm2446_vm8, %v2420_v38, %v5166_v43  ;;  %v1518_v8 = vadd.f32 %v4628_v0, %v6608_v23 }
 0x35c   : > { %v2335_v63 = vpop.xlane.xlu1 %2334  ;;  %v2954_v48 = vpack.c.bf16 %v5274_v11, %v5281_v57  ;;  %v2332_v49 = vpop.xlane.xlu0 %2331  ;;  %v6672_v57 = vld [vmem:[#allocation21_spill] sm:$0xff] }
 0x35d   : > { %v2419_v30 = vadd.f32 %v2335_v63, %v2227_v47  ;;  %v2418_v5 = vadd.f32 %v2332_v49, %v2226_v21  ;;  %v1517_v47 = vadd.f32 %v4633_v56, %v6609_v13  ;;  %v1019_v49 = vsel %vm1000_vm13, %v5118_v35, 0.0 }
 0x35f   : > { %v5289_v31 = vsel %vm2446_vm8, %v2419_v30, %v1729_v34  ;;  %v5295_v43 = vsel %vm2446_vm8, %v2418_v5, %v1728_v16  ;;  %v1014_v34 = vsel %vm1000_vm13, %v5106_v2, 0.0  ;;  %v6610_v30 = vld [vmem:[#allocation25_spill] sm:$0xff] }
 0x360   : > { %v1636_v27 = vpop.xlane.xlu1 %1635  ;;  %v2950_v52 = vpack.c.bf16 %v5289_v31, %v5295_v43  ;;  %v1633_v7 = vpop.xlane.xlu0 %1632  ;;  %v2233_v5 = vadd.f32 %v4640_v32, %v6610_v30  ;;  %v6668_v31 = vld [vmem:[#allocation154_spill] sm:$0xff]  ;;  %v6669_v43 = vld [vmem:[#allocation160_spill] sm:$0xff] }
 0x361   : > { %v1704_v17 = vadd.f32 %v1636_v27, %v1512_v59  ;;  %v1703_v4 = vadd.f32 %v1633_v7, %v1511_v58  ;;  %v2232_v59 = vadd.f32 %v4645_v18, %v6611_v50  ;;  %v6612_v7 = vld [vmem:[#allocation26_spill] sm:$0xff] }
 0x363   : > { %v5309_v16 = vsel %vm1723_vm14, %v1704_v17, %v1014_v34  ;;  %v5315_v38 = vsel %vm1723_vm14, %v1703_v4, %v1013_v45  ;;  %v1516_v17 = vadd.f32 %v4652_v33, %v6612_v7  ;;  %v6613_v34 = vld [vmem:[#allocation30_spill] sm:$0xff]  ;;  %v6614_v4 = vld [vmem:[#allocation111_spill] sm:$0xff]  ;;  %v1017_v33 = vsel %vm1000_vm13, %v5182_v10, 0.0  ;;  %v6621_v7 = vld [vmem:[#allocation37_spill] sm:$0xff] }
 0x364   : > { %v1654_v2 = vpop.xlane.xlu1 %1653  ;;  %v1651_v54 = vpop.xlane.xlu0 %1650  ;;  %v1515_v18 = vadd.f32 %v6614_v4, %v6613_v34 }
 0x365   : > { %v1710_v21 = vadd.f32 %v1654_v2, %v1518_v8  ;;  %v1709_v63 = vadd.f32 %v1651_v54, %v1517_v47  ;;  %v6615_v2 = vld [vmem:[#allocation31_spill] sm:$0xff]  ;;  %v6616_v54 = vld [vmem:[#allocation112_spill] sm:$0xff] }
 0x367   : > { %v5327_v0 = vsel %vm1723_vm14, %v1710_v21, %v1020_v28  ;;  %v5333_v56 = vsel %vm1723_vm14, %v1709_v63, %v1019_v49  ;;  %v2231_v21 = vadd.f32 %v6616_v54, %v6615_v2  ;;  %v6617_v63 = vld [vmem:[#allocation34_spill] sm:$0xff]  ;;  %v6618_v49 = vld [vmem:[#allocation115_spill] sm:$0xff] }
 0x368   : > { %v2353_v1 = vpop.xlane.xlu1 %2352  ;;  %v2350_v26 = vpop.xlane.xlu0 %2349  ;;  %v2230_v30 = vadd.f32 %v6618_v49, %v6617_v63  ;;  %v6626_v63 = vld [vmem:[#allocation117_spill] sm:$0xff] }
 0x369   : > { %v2425_v58 = vadd.f32 %v2353_v1, %v2233_v5  ;;  %v2424_v27 = vadd.f32 %v2350_v26, %v2232_v59  ;;  %v6619_v1 = vld [vmem:[#allocation33_spill] sm:$0xff]  ;;  %v6620_v26 = vld [vmem:[#allocation116_spill] sm:$0xff] }
 0x36b   : > { %v5340_v35 = vsel %vm2446_vm8, %v2425_v58, %v5227_v60  ;;  %v5347_v32 = vsel %vm2446_vm8, %v2424_v27, %v5233_v41  ;;  %v1018_v60 = vsel %vm1000_vm13, %v5176_v24, 0.0  ;;  %v1522_v58 = vadd.f32 %v6620_v26, %v6619_v1  ;;  %v6627_v1 = vld [vmem:[#allocation38_spill] sm:$0xff] }
 0x36c   : > { %v1648_v45 = vpop.xlane.xlu1 %1647  ;;  %v2962_v23 = vpack.c.bf16 %v5340_v35, %v5347_v32  ;;  %v1645_v8 = vpop.xlane.xlu0 %1644  ;;  %v6628_v26 = vld [vmem:[#allocation118_spill] sm:$0xff]  ;;  %v6686_v32 = vld [vmem:[#allocation36_spill] sm:$0xff] }
 0x36d   : > { %v1708_v13 = vadd.f32 %v1648_v45, %v1516_v17  ;;  %v1707_v47 = vadd.f32 %v1645_v8, %v1515_v18  ;;  %v6622_v17 = vld [vmem:[#allocation113_spill] sm:$0xff] }
 0x36e   : > { %v1521_v34 = vadd.f32 %v6622_v17, %v6621_v7  ;;  %v6629_v17 = vld [vmem:[#allocation39_spill] sm:$0xff] }
 0x36f   : > { %v5361_v41 = vsel %vm1723_vm14, %v1708_v13, %v1018_v60  ;;  %v5367_v28 = vsel %vm1723_vm14, %v1707_v47, %v1017_v33  ;;  %v1023_v60 = vsel %vm1000_vm13, %v4893_v3, 0.0  ;;  %v6623_v47 = vld [vmem:[#allocation35_spill] sm:$0xff]  ;;  %v6624_v33 = vld [vmem:[#allocation120_spill] sm:$0xff]  ;;  %v1022_v3 = vsel %vm1000_vm13, %v4923_v29, 0.0 }
 0x370   : > { %v2347_v24 = vpop.xlane.xlu1 %2346  ;;  %v2344_v5 = vpop.xlane.xlu0 %2343  ;;  %v1520_v2 = vadd.f32 %v6624_v33, %v6623_v47 }
 0x371   : > { %v2423_v50 = vadd.f32 %v2347_v24, %v2231_v21  ;;  %v2422_v59 = vadd.f32 %v2344_v5, %v2230_v30  ;;  %v6625_v21 = vld [vmem:[#allocation133_spill] sm:$0xff] }
 0x372   : > { %v1519_v49 = vadd.f32 %v6626_v63, %v6625_v21  ;;  %v6634_v21 = vld [vmem:[#allocation123_spill] sm:$0xff] }
 0x373   : > { %v5374_v10 = vsel %vm2446_vm8, %v2423_v50, %v5261_v9  ;;  %v5381_v27 = vsel %vm2446_vm8, %v2422_v59, %v5267_v20  ;;  %v1024_v9 = vsel %vm1000_vm13, %v4891_v37, 0.0  ;;  %v1021_v50 = vsel %vm1000_vm13, %v4925_v42, 0.0 }
 0x374   : > { %v1666_v4 = vpop.xlane.xlu1 %1665  ;;  %v2958_v18 = vpack.c.bf16 %v5374_v10, %v5381_v27  ;;  %v1663_v45 = vpop.xlane.xlu0 %1662 }
 0x375   : > { %v1714_v8 = vadd.f32 %v1666_v4, %v1522_v58  ;;  %v1713_v13 = vadd.f32 %v1663_v45, %v1521_v34  ;;  %v2235_v58 = vadd.f32 %v6628_v26, %v6627_v1  ;;  %v6630_v34 = vld [vmem:[#allocation121_spill] sm:$0xff] }
 0x376   : > { %v2234_v4 = vadd.f32 %v6630_v34, %v6629_v17  ;;  %v6637_v26 = vld [vmem:[#allocation137_spill] sm:$0xff] }
 0x377   : > { %v5395_v20 = vsel %vm1723_vm14, %v1714_v8, %v1024_v9  ;;  %v5401_v54 = vsel %vm1723_vm14, %v1713_v13, %v1023_v60  ;;  %v6631_v13 = vld [vmem:[#allocation135_spill] sm:$0xff]  ;;  %v6632_v60 = vld [vmem:[#allocation122_spill] sm:$0xff] }
 0x378   : > { %v1660_v37 = vpop.xlane.xlu1 %1659  ;;  %v1657_v30 = vpop.xlane.xlu0 %1656  ;;  %v2241_v47 = vadd.f32 %v6632_v60, %v6631_v13  ;;  %v6639_v60 = vld [vmem:[#allocation141_spill] sm:$0xff] }
 0x379   : > { %v1712_v24 = vadd.f32 %v1660_v37, %v1520_v2  ;;  %v1711_v5 = vadd.f32 %v1657_v30, %v1519_v49  ;;  %v6633_v2 = vld [vmem:[#allocation134_spill] sm:$0xff] }
 0x37a   : > { %v2240_v63 = vadd.f32 %v6634_v21, %v6633_v2  ;;  %v6641_v21 = vld [vmem:[#allocation140_spill] sm:$0xff] }
 0x37b   : > { %v5413_v59 = vsel %vm1723_vm14, %v1712_v24, %v1022_v3  ;;  %v5419_v7 = vsel %vm1723_vm14, %v1711_v5, %v1021_v50  ;;  %v6636_v5 = vld [vmem:[#allocation124_spill] sm:$0xff] }
 0x37c   : > { %v2359_v29 = vpop.xlane.xlu1 %2358  ;;  %v2356_v45 = vpop.xlane.xlu0 %2355 }
 0x37d   : > { %v2427_v8 = vadd.f32 %v2359_v29, %v2235_v58  ;;  %v2426_v9 = vadd.f32 %v2356_v45, %v2234_v4 }
 0x37f   : > { %v5426_v42 = vsel %vm2446_vm8, %v2427_v8, %v5309_v16  ;;  %v5433_v33 = vsel %vm2446_vm8, %v2426_v9, %v5315_v38  ;;  %v6635_v16 = vld [vmem:[#allocation139_spill] sm:$0xff]  ;;  %v6638_v38 = vld [vmem:[#allocation125_spill] sm:$0xff]  ;;  %v1028_v8 = vsel %vm1000_vm13, %v4955_v25, 0.0 }
 0x380   : > { %v2377_v49 = vpop.xlane.xlu1 %2376  ;;  %v2966_v37 = vpack.c.bf16 %v5426_v42, %v5433_v33  ;;  %v2374_v30 = vpop.xlane.xlu0 %2373  ;;  %v1526_v50 = vadd.f32 %v6636_v5, %v6635_v16  ;;  %v1525_v58 = vadd.f32 %v6638_v38, %v6637_v26  ;;  %v6643_v16 = vld [vmem:[#allocation143_spill] sm:$0xff] }
 0x381   : > { %v2433_v24 = vadd.f32 %v2377_v49, %v2241_v47  ;;  %v2432_v3 = vadd.f32 %v2374_v30, %v2240_v63  ;;  %v6640_v47 = vld [vmem:[#allocation126_spill] sm:$0xff]  ;;  %v6642_v63 = vld [vmem:[#allocation127_spill] sm:$0xff] }
 0x382   : > { %v2239_v2 = vadd.f32 %v6640_v47, %v6639_v60  ;;  %v2238_v49 = vadd.f32 %v6642_v63, %v6641_v21 }
 0x383   : > { %v2466_v1 = vsel %vm2446_vm8, %v2433_v24, %v5327_v0  ;;  %v2465_v34 = vsel %vm2446_vm8, %v2432_v3, %v5333_v56  ;;  %v1027_v0 = vsel %vm1000_vm13, %v4957_v53, 0.0  ;;  %v1524_v53 = vadd.f32 %v4760_v15, %v6643_v16 }
 0x384   : > { %v1678_v17 = vpop.xlane.xlu1 %1677  ;;  %v1675_v4 = vpop.xlane.xlu0 %1674  ;;  %v2944_v45 = vpack.c.bf16 %v2466_v1, %v2465_v34 }
 0x385   : > { %v1718_v29 = vadd.f32 %v1678_v17, %v1526_v50  ;;  %v1717_v9 = vadd.f32 %v1675_v4, %v1525_v58  ;;  %v6644_v50 = vld [vmem:[#allocation142_spill] sm:$0xff]  ;;  %v1026_v4 = vsel %vm1000_vm13, %v4987_v46, 0.0  ;;  %v6646_v46 = vld [vmem:[#allocation144_spill] sm:$0xff] }
 0x386   : > { %v1523_v1 = vadd.f32 %v4765_v51, %v6644_v50 }
 0x387   : > { %v5457_v13 = vsel %vm1723_vm14, %v1718_v29, %v1028_v8  ;;  %v5463_v56 = vsel %vm1723_vm14, %v1717_v9, %v1027_v0  ;;  %v6645_v29 = vld [vmem:[#allocation145_spill] sm:$0xff]  ;;  %v2244_v9 = vadd.f32 %v4777_v39, %v6646_v46 }
 0x388   : > { %v2371_v25 = vpop.xlane.xlu1 %2370  ;;  %v2368_v30 = vpop.xlane.xlu0 %2367 }
 0x389   : > { %v2431_v24 = vadd.f32 %v2371_v25, %v2239_v2  ;;  %v2430_v3 = vadd.f32 %v2368_v30, %v2238_v49  ;;  %v6647_v2 = vld [vmem:[#allocation147_spill] sm:$0xff] }
 0x38a   : > { %v1530_v21 = vadd.f32 %v4784_v36, %v6647_v2  ;;  %v6650_v36 = vld [vmem:[#allocation44_spill] sm:$0xff] }
 0x38b   : > { %v2464_v5 = vsel %vm2446_vm8, %v2431_v24, %v5361_v41  ;;  %v2463_v38 = vsel %vm2446_vm8, %v2430_v3, %v5367_v28  ;;  %v1025_v41 = vsel %vm1000_vm13, %v4989_v19, 0.0  ;;  %v2245_v28 = vadd.f32 %v4772_v40, %v6645_v29  ;;  %v6651_v24 = vld [vmem:[#allocation50_spill] sm:$0xff]  ;;  %v6653_v3 = vld [vmem:[#allocation129_spill] sm:$0xff]  ;;  %v6659_v29 = vld [vmem:[#allocation132_spill] sm:$0xff] }
 0x38c   : > { %v1672_v26 = vpop.xlane.xlu1 %1671  ;;  %v1669_v58 = vpop.xlane.xlu0 %1668  ;;  %v2940_v34 = vpack.c.bf16 %v2464_v5, %v2463_v38  ;;  %v1032_v30 = vsel %vm1000_vm13, %v6650_v36, 0.0  ;;  %v1031_v44 = vsel %vm1000_vm13, %v6651_v24, 0.0  ;;  %v6655_v5 = vld [vmem:[#allocation130_spill] sm:$0xff] }
 0x38d   : > { %v1716_v17 = vadd.f32 %v1672_v26, %v1524_v53  ;;  %v1715_v15 = vadd.f32 %v1669_v58, %v1523_v1  ;;  %v6654_v53 = vld [vmem:[#allocation148_spill] sm:$0xff] }
 0x38e   : > { %2941 = vmatprep.subr.bf16.mxu1 %v2940_v34  ;;  %v2242_v50 = vadd.f32 %v6655_v5, %v6654_v53  ;;  %v6657_v34 = vld [vmem:[#allocation131_spill] sm:$0xff] }
 0x38f   : > { %v5485_v51 = vsel %vm1723_vm14, %v1716_v17, %v1026_v4  ;;  %v5491_v8 = vsel %vm1723_vm14, %v1715_v15, %v1025_v41  ;;  %2943 = vmatpush3.bf16.msra.mxu1 %v2942_v62  ;;  %v1529_v62 = vadd.f32 %v6649_v6, %v6648_v14  ;;  %v6656_v17 = vld [vmem:[#allocation151_spill] sm:$0xff]  ;;  %v6658_v41 = vld [vmem:[#allocation150_spill] sm:$0xff]  ;;  %v6662_v6 = vld [vmem:[#allocation40_spill] sm:$0xff] }
 0x390   : > { %v2389_v19 = vpop.xlane.xlu1 %2388  ;;  %v2386_v0 = vpop.xlane.xlu0 %2385  ;;  %2945 = vmatprep.subr.bf16.mxu1 %v2944_v45  ;;  %v1528_v4 = vadd.f32 %v6657_v34, %v6656_v17 }
 0x391   : > { %v2437_v60 = vadd.f32 %v2389_v19, %v2245_v28  ;;  %v2436_v47 = vadd.f32 %v2386_v0, %v2244_v9  ;;  %v1527_v28 = vadd.f32 %v6659_v29, %v6658_v41  ;;  %v6674_v29 = vld [vmem:[#allocation62_spill] sm:$0xff] }
 0x393   : > { %v2470_v40 = vsel %vm2446_vm8, %v2437_v60, %v5395_v20  ;;  %2947 = vmatpush3.bf16.msra.mxu1 %v2946_v55  ;;  %v2469_v45 = vsel %vm2446_vm8, %v2436_v47, %v5401_v54  ;;  %v6652_v55 = vld [vmem:[#allocation149_spill] sm:$0xff]  ;;  %v6660_v47 = vld [vmem:[#allocation64_spill] sm:$0xff] }
 0x394   : > { %v1690_v39 = vpop.xlane.xlu1 %1689  ;;  %v1687_v63 = vpop.xlane.xlu0 %1686  ;;  %v2952_v25 = vpack.c.bf16 %v2470_v40, %v2469_v45  ;;  %v2243_v16 = vadd.f32 %v6653_v3, %v6652_v55  ;;  %v1030_v2 = vsel %vm1000_vm13, %v6660_v47, 0.0  ;;  %v6661_v40 = vld [vmem:[#allocation47_spill] sm:$0xff]  ;;  %v6664_v45 = vld [vmem:[#allocation152_spill] sm:$0xff] }
 0x395   : > { %v1722_v49 = vadd.f32 %v1690_v39, %v1530_v21  ;;  %v1721_v20 = vadd.f32 %v1687_v63, %v1529_v62  ;;  %v6663_v62 = vld [vmem:[#allocation156_spill] sm:$0xff]  ;;  %v6665_v63 = vld [vmem:[#allocation158_spill] sm:$0xff]  ;;  %v6667_v55 = vld [vmem:[#allocation159_spill] sm:$0xff] }
 0x396   : > { %v2249_v39 = vadd.f32 %v6663_v62, %v6662_v6 }
 0x397   : > { %v5519_v61 = vsel %vm1723_vm14, %v1722_v49, %v1032_v30  ;;  %v5525_v54 = vsel %vm1723_vm14, %v1721_v20, %v1031_v44  ;;  %v2248_v49 = vadd.f32 %v6665_v63, %v6664_v45  ;;  %v6666_v44 = vld [vmem:[#allocation42_spill] sm:$0xff]  ;;  %v6680_v45 = vld [vmem:[#allocation41_spill] sm:$0xff] }
 0x398   : > { %v2383_v1 = vpop.xlane.xlu1 %2382  ;;  %v2380_v26 = vpop.xlane.xlu0 %2379  ;;  %v2247_v3 = vadd.f32 %v6667_v55, %v6666_v44  ;;  %v6681_v63 = vld [vmem:[#allocation161_spill] sm:$0xff] }
 0x399   : > { %v2435_v38 = vadd.f32 %v2383_v1, %v2243_v16  ;;  %v2434_v58 = vadd.f32 %v2380_v26, %v2242_v50 }
 0x39b   : > { %v2468_v15 = vsel %vm2446_vm8, %v2435_v38, %v5413_v59  ;;  %v2467_v9 = vsel %vm2446_vm8, %v2434_v58, %v5419_v7  ;;  %v1029_v59 = vsel %vm1000_vm13, %v6661_v40, 0.0  ;;  %v6670_v38 = vld [vmem:[#allocation17_spill] sm:$0xff] }
 0x39c   : > { %v1684_v46 = vpop.xlane.xlu1 %1683  ;;  %v1681_v19 = vpop.xlane.xlu0 %1680  ;;  %v2948_v60 = vpack.c.bf16 %v2468_v15, %v2467_v9  ;;  %v6671_v58 = vld [vmem:[#allocation109_spill] sm:$0xff]  ;;  %v6675_v9 = vld [vmem:[#allocation43_spill] sm:$0xff] }
 0x39d   : > { %v1720_v0 = vadd.f32 %v1684_v46, %v1528_v4  ;;  %v1719_v21 = vadd.f32 %v1681_v19, %v1527_v28  ;;  %v1514_v17 = vadd.f32 %v6671_v58, %v6670_v38  ;;  %v1016_v28 = vsel %vm1000_vm13, %v6674_v29, 0.0  ;;  %v6676_v19 = vld [vmem:[#allocation45_spill] sm:$0xff] }
 0x39e   : > { %2949 = vmatprep.subr.bf16.mxu1 %v2948_v60 }
 0x39f   : > { %v1753_v14 = vsel %vm1723_vm14, %v1720_v0, %v1030_v2  ;;  %v1752_v7 = vsel %vm1723_vm14, %v1719_v21, %v1029_v59  ;;  %2951 = vmatpush3.bf16.msra.mxu1 %v2950_v52  ;;  %v2246_v52 = vadd.f32 %v6669_v43, %v6668_v31  ;;  %v2251_v0 = vadd.f32 %v6676_v19, %v6675_v9  ;;  %v6679_v2 = vld [vmem:[#allocation48_spill] sm:$0xff]  ;;  %v6685_v31 = vld [vmem:[#allocation114_spill] sm:$0xff] }
 0x3a0   : > { %v2401_v36 = vpop.xlane.xlu1 %2400  ;;  %v2398_v30 = vpop.xlane.xlu0 %2397  ;;  %2953 = vmatprep.subr.bf16.mxu1 %v2952_v25 }
 0x3a1   : > { %v2441_v20 = vadd.f32 %v2401_v36, %v2249_v39  ;;  %v2440_v24 = vadd.f32 %v2398_v30, %v2248_v49  ;;  %v2253_v49 = vadd.f32 %v6681_v63, %v6680_v45  ;;  %v6682_v30 = vld [vmem:[#allocation157_spill] sm:$0xff] }
 0x3a3   : > { %v2474_v16 = vsel %vm2446_vm8, %v2441_v20, %v5457_v13  ;;  %2955 = vmatpush3.bf16.msra.mxu1 %v2954_v48  ;;  %v2473_v25 = vsel %vm2446_vm8, %v2440_v24, %v5463_v56  ;;  %v6673_v48 = vld [vmem:[#allocation110_spill] sm:$0xff]  ;;  %v6683_v20 = vld [vmem:[#allocation49_spill] sm:$0xff] }
 0x3a4   : > { %v2395_v53 = vpop.xlane.xlu1 %2394  ;;  %v2392_v5 = vpop.xlane.xlu0 %2391  ;;  %v2960_v1 = vpack.c.bf16 %v2474_v16, %v2473_v25  ;;  %v1513_v13 = vadd.f32 %v6673_v48, %v6672_v57  ;;  %v2252_v24 = vadd.f32 %v6683_v20, %v6682_v30  ;;  %v6684_v16 = vld [vmem:[#allocation32_spill] sm:$0xff] }
 0x3a5   : > { %v2439_v50 = vadd.f32 %v2395_v53, %v2247_v3  ;;  %v2438_v26 = vadd.f32 %v2392_v5, %v2246_v52  ;;  %v2237_v43 = vadd.f32 %v6685_v31, %v6684_v16 }
 0x3a7   : > { %v2472_v11 = vsel %vm2446_vm8, %v2439_v50, %v5485_v51  ;;  %v2471_v4 = vsel %vm2446_vm8, %v2438_v26, %v5491_v8  ;;  %v6677_v51 = vld [vmem:[#allocation54_spill] sm:$0xff]  ;;  %v6691_v26 = vmov 1.0  }
 0x3a8   : > { %v1642_v34 = vpop.xlane.xlu1 %1641  ;;  %v1639_v56 = vpop.xlane.xlu0 %1638  ;;  %v2956_v41 = vpack.c.bf16 %v2472_v11, %v2471_v4  ;;  %v1015_v60 = vsel %vm1000_vm13, %v6677_v51, 0.0  ;;  %v6678_v8 = vld [vmem:[#allocation46_spill] sm:$0xff] }
 0x3a9   : > { %v1706_v15 = vadd.f32 %v1642_v34, %v1514_v17  ;;  %v1705_v46 = vadd.f32 %v1639_v56, %v1513_v13  ;;  %v2250_v21 = vadd.f32 %v6679_v2, %v6678_v8 }
 0x3aa   : > { %2957 = vmatprep.subr.bf16.mxu1 %v2956_v41 }
 0x3ab   : > { %v1739_v47 = vsel %vm1723_vm14, %v1706_v15, %v1016_v28  ;;  %v1738_v40 = vsel %vm1723_vm14, %v1705_v46, %v1015_v60  ;;  %2959 = vmatpush3.bf16.msra.mxu1 %v2958_v18 }
 0x3ac   : > { %v2407_v59 = vpop.xlane.xlu1 %2406  ;;  %v2404_v6 = vpop.xlane.xlu0 %2403  ;;  %2961 = vmatprep.subr.bf16.mxu1 %v2960_v1  ;;  %v6689_v1 = vld [vmem:[#allocation63_spill] sm:$0xff] }
 0x3ad   : > { %v2443_v62 = vadd.f32 %v2407_v59, %v2251_v0  ;;  %v2442_v39 = vadd.f32 %v2404_v6, %v2250_v21 }
 0x3af   : > { %v2476_v36 = vsel %vm2446_vm8, %v2443_v62, %v1753_v14  ;;  %2963 = vmatpush3.bf16.msra.mxu1 %v2962_v23  ;;  %v2475_v27 = vsel %vm2446_vm8, %v2442_v39, %v1752_v7  ;;  %v6687_v23 = vld [vmem:[#allocation119_spill] sm:$0xff] }
 0x3b0   : > { %v2413_v10 = vpop.xlane.xlu1 %2412  ;;  %v2410_v18 = vpop.xlane.xlu0 %2409  ;;  %v2964_v55 = vpack.c.bf16 %v2476_v36, %v2475_v27  ;;  %v2236_v14 = vadd.f32 %v6687_v23, %v6686_v32 }
 0x3b1   : > { %v2445_v44 = vadd.f32 %v2413_v10, %v2253_v49  ;;  %v2444_v3 = vadd.f32 %v2410_v18, %v2252_v24 }
 0x3b2   : > { %2965 = vmatprep.subr.bf16.mxu1 %v2964_v55 }
 0x3b3   : > { %v2478_v35 = vsel %vm2446_vm8, %v2445_v44, %v5519_v61  ;;  %2967 = vmatpush3.bf16.msra.mxu1 %v2966_v37  ;;  %v2477_v52 = vsel %vm2446_vm8, %v2444_v3, %v5525_v54  ;;  %v6688_v37 = vmul.u32 16, %v5120_v22  ;;  %v6690_v54 = vmul.u32 16, %v6689_v1 }
 0x3b4   : > { %v2365_v7 = vpop.xlane.xlu1 %2364  ;;  %v2362_v53 = vpop.xlane.xlu0 %2361  ;;  %v2968_v5 = vpack.c.bf16 %v2478_v35, %v2477_v52 }
 0x3b5   : > { %v2429_v25 = vadd.f32 %v2365_v7, %v2237_v43  ;;  %v2428_v50 = vadd.f32 %v2362_v53, %v2236_v14  ;;  %vm2487_vm9 = vcmp.ge.s32.totalorder %v5041_v12, %v6688_v37  ;;  %vm2495_vm10 = vcmp.lt.s32.totalorder %v5041_v12, %v6690_v54 }
 0x3b6   : > { %2969 = vmatprep.subr.bf16.mxu1 %v2968_v5  ;;  %vm2499_vm11 = vmand %vm2487_vm9, %vm2495_vm10 }
 0x3b7   : > { %v2462_v61 = vsel %vm2446_vm8, %v2429_v25, %v1739_v47  ;;  %v2461_v42 = vsel %vm2446_vm8, %v2428_v50, %v1738_v40 }
 0x3b8   : > { %v2970_v33 = vpack.c.bf16 %v2462_v61, %v2461_v42 }
 0x3ba   : > { %2971 = vmatpush3.bf16.msra.mxu1 %v2970_v33 }
 0x3bd   : > { %2735 = vmatmul.mubr.msk.f32.vlgmr.msra.gmra.mrb[44].mxu1 %vm2497_vm3, %v6691_v26 }
 0x3be   : > { %2736 = vmatprep.mubr.msk.f32.mxu1 %vm2500_vm7, %v6691_v26 }
 0x3c1   : > { %2737 = vmatmul.mubr.msk.f32.gmra.mrb[46].mxu1 %vm2499_vm11, %v6691_v26 }
 0x490   : > { %v2826_v12 = vpop.f32.mrb[44].mxu1 }
 0x491   : > { %v2827_v22 = vpop.f32.mrb[45].mxu1 }
 0x492   : > { %v2828_v57 = vadd.f32 %v2827_v22, %v2826_v12 }
 0x494   : > { %2585 = vst.msk [vmem:[%s145_s4] sm:$0xff] %vm2584_vm12, %v2828_v57  ;;  %v2829_v48 = vpop.f32.mrb[46].mxu1 }
 0x495   : > { %v2830_v13 = vpop.f32.mrb[47].mxu1 }
 0x496   : > { %v2831_v34 = vadd.f32 %v2830_v13, %v2829_v48 }
 0x498   : > { %2586 = vst.msk [vmem:[%s145_s4 + $0x8] sm:$0xff] %vm2584_vm12, %v2831_v34 }
 0x499 PF: > { %s12_s9 = sadd.s32 1, %s3013_s9  }
 0x49a   : > { %p9_p5 = scmp.ge.s32.totalorder %s12_s9, 4  }
 0x49c   :  { %11 = sbr.rel (!%p9_p5) target bundleno = 1 (0x1), region = 60 }

</bundles_post_ra>
